<compile_context>
chip_gen: v7x
topology: tpu7x:2x2x1
jax: 0.10.0
libtpu: 0.0.40
codegen_flags: <defaults>
</compile_context>

<pallas_src>
import jax
import jax.numpy as jnp
import numpy as np
from jax.experimental import pallas as pl
from jax.experimental.pallas import tpu as pltpu

INPUT_SIZE = 9       # len(SENSOR_COLS)
HIDDEN_SIZE = 128
BN_EPS = 1e-5


# ----------------------------------------------------------------------------
# Packed bias/row-vector layout (one DMA; every segment starts 128-lane-aligned)
# ----------------------------------------------------------------------------
def _row_layout(H):
    sizes = (("b0", 4 * H), ("b1", 4 * H), ("ba1", H), ("wa2", H),
             ("bf1", H), ("bf2", H // 2), ("wf3", H // 2), ("ba2", 1), ("bf3", 1))
    offs, size_map, cur = {}, {}, 0
    for name, n in sizes:
        offs[name] = cur
        size_map[name] = n
        cur += ((n + 127) // 128) * 128
    return offs, size_map, cur


_ROW_OFF, _ROW_SIZE, _ROW_TOTAL = _row_layout(HIDDEN_SIZE)


# ----------------------------------------------------------------------------
# Pallas kernel: whole forward pass for the (small, padded) batch in one call.
# ----------------------------------------------------------------------------
def _lstm_fall_kernel(
    # inputs
    x_ref,              # (T*B, F)   f32, time-major (already transposed in wrapper)
    wih0_ref,           # (F, 4H)    bf16, BN folded in
    whh0_ref,           # (H, 4H)    bf16
    w1_ref,             # (2H, 4H)   bf16, [Wih1^T ; Whh1^T]
    wa1_ref,            # (H, H)     bf16
    wf1_ref,            # (H, H)     bf16
    wf2_ref,            # (H, H/2)   bf16
    rows_ref,           # (1, _ROW_TOTAL) f32 packed biases / row vectors
    # outputs
    out_ref,            # (B, 1)     f32
    # scratch
    gates0_ref,         # (T, B, 4H) f32  hoisted layer-0 gate pre-activations
    seq2_ref,           # (T, B, H)  f32  layer-1 hidden sequence (feeds attention)
):
    T, B, H = seq2_ref.shape

    def row(name):
        o = _ROW_OFF[name]
        return rows_ref[:, o:o + _ROW_SIZE[name]]

    # --- layer-0 input projection, hoisted to one (T*B, F) matmul -------------
    g0 = jnp.dot(x_ref[...].astype(jnp.bfloat16), wih0_ref[...],
                 preferred_element_type=jnp.float32) + row("b0")
    gates0_ref[...] = g0.reshape(T, B, 4 * H)

    b1 = row("b1")

    # --- LSTM gate math (PyTorch gate order i, f, g, o) ------------------------
    def lstm_gate_math(g, c_prev):
        i_g = jax.nn.sigmoid(g[:, 0 * H:1 * H])
        f_g = jax.nn.sigmoid(g[:, 1 * H:2 * H])
        g_g = jnp.tanh(g[:, 2 * H:3 * H])
        o_g = jax.nn.sigmoid(g[:, 3 * H:4 * H])
        c = f_g * c_prev + i_g * g_g
        h = o_g * jnp.tanh(c)
        return h, c

    def l0_step(t, h_prev, c_prev):
        g = gates0_ref[t]
        if t > 0:                      # at t == 0 the recurrent term is exactly 0
            g = g + jnp.dot(h_prev.astype(jnp.bfloat16), whh0_ref[...],
                            preferred_element_type=jnp.float32)
        return lstm_gate_math(g, c_prev)

    def l1_step(h0_t, h_prev, c_prev, first):
        if first:                      # h_prev == 0 -> only the Wih1 half matters
            g = jnp.dot(h0_t.astype(jnp.bfloat16), w1_ref[:H, :],
                        preferred_element_type=jnp.float32) + b1
        else:                          # fused input-projection + recurrence matmul
            hh = jnp.concatenate([h0_t, h_prev], axis=-1).astype(jnp.bfloat16)
            g = jnp.dot(hh, w1_ref[...], preferred_element_type=jnp.float32) + b1
        return lstm_gate_math(g, c_prev)

    # --- interleaved (software-pipelined) recurrences, fully unrolled (T = 8) --
    zero = jnp.zeros((B, H), jnp.float32)
    h0, c0 = l0_step(0, zero, zero)
    h0_prev = h0
    h1, c1 = zero, zero
    for t in range(1, T):
        h0, c0 = l0_step(t, h0, c0)                          # layer-0 step t
        h1, c1 = l1_step(h0_prev, h1, c1, first=(t == 1))    # layer-1 step t-1
        seq2_ref[t - 1] = h1
        h0_prev = h0
    h1, c1 = l1_step(h0_prev, h1, c1, first=False)           # layer-1 step T-1
    seq2_ref[T - 1] = h1

    # --- attention: Linear -> tanh -> (mul + lane-reduce score) -> softmax(T) --
    s2 = seq2_ref[...]                                        # (T, B, H)
    a = jnp.tanh(
        jnp.dot(s2.reshape(T * B, H).astype(jnp.bfloat16), wa1_ref[...],
                preferred_element_type=jnp.float32) + row("ba1"))
    e = (jnp.sum(a * row("wa2"), axis=-1, keepdims=True)
         + row("ba2")).reshape(T, B, 1)
    m = jnp.max(e, axis=0, keepdims=True)
    w = jnp.exp(e - m)
    w = w * pl.reciprocal(jnp.sum(w, axis=0, keepdims=True), approx=True)
    ctx = jnp.sum(w * s2, axis=0)                             # (B, H)

    # --- fc head: Linear->ReLU->(Drop)->Linear->ReLU->(Drop)->Linear->Sigmoid --
    z1 = jnp.maximum(
        jnp.dot(ctx.astype(jnp.bfloat16), wf1_ref[...],
                preferred_element_type=jnp.float32) + row("bf1"), 0.0)
    z2 = jnp.maximum(
        jnp.dot(z1.astype(jnp.bfloat16), wf2_ref[...],
                preferred_element_type=jnp.float32) + row("bf2"), 0.0)
    # N=1 output projection on the VPU (multiply + lane reduction), MXU stays free
    z3 = jnp.sum(z2 * row("wf3"), axis=-1, keepdims=True) + row("bf3")
    out_ref[...] = jax.nn.sigmoid(z3)                         # (B, 1)


# ----------------------------------------------------------------------------
# Wrapper: BN folding, weight transposes / bf16 cast, bias packing, padding
# ----------------------------------------------------------------------------
def lstm_fall_predictor(x, p):
    x = x.astype(jnp.float32)
    B, T, F = x.shape
    H = p["whh0"].shape[1]

    # Pad batch to a sublane multiple (8); padded rows are independent garbage
    # rows, sliced off after the call (row-wise math, so exact for real rows).
    Bp = max(8, ((B + 7) // 8) * 8)
    if Bp != B:
        x = jnp.pad(x, ((0, Bp - B), (0, 0), (0, 0)))
    # Time-major, flattened in the wrapper -> no in-kernel transpose.
    xt = jnp.transpose(x, (1, 0, 2)).reshape(T * Bp, F)

    # Fold eval-mode BatchNorm1d into the layer-0 input projection (exact):
    #   (x*scale + shift) @ Wih^T = x @ (Wih*scale)^T + Wih @ shift
    scale = p["bn_gamma"] / jnp.sqrt(p["bn_var"] + BN_EPS)
    shift = p["bn_beta"] - p["bn_mean"] * scale
    wih0_f = p["wih0"] * scale[None, :]          # (4H, F)
    b0_f = p["b0"] + p["wih0"] @ shift           # (4H,)

    def w(m):    # MXU weight: pre-transpose + bf16 (f32 accumulation in-kernel)
        return m.T.astype(jnp.bfloat16)

    # Fused layer-1 weight: [Wih1^T ; Whh1^T]  ->  (2H, 4H)
    w1 = jnp.concatenate([p["wih1"].T, p["whh1"].T], axis=0).astype(jnp.bfloat16)

    # Pack all small bias / row vectors into one f32 row (single DMA).
    rows = jnp.zeros((_ROW_TOTAL,), jnp.float32)
    packed = dict(b0=b0_f, b1=p["b1"], ba1=p["ba1"], wa2=p["wa2"][0],
                  bf1=p["bf1"], bf2=p["bf2"], wf3=p["wf3"][0],
                  ba2=p["ba2"], bf3=p["bf3"])
    for name, vec in packed.items():
        o = _ROW_OFF[name]
        rows = rows.at[o:o + _ROW_SIZE[name]].set(vec.astype(jnp.float32))
    rows = rows.reshape(1, _ROW_TOTAL)

    args = (xt, w(wih0_f), w(p["whh0"]), w1, w(p["wa1"]),
            w(p["wf1"]), w(p["wf2"]), rows)

    vmem_spec = pl.BlockSpec(memory_space=pltpu.MemorySpace.VMEM)
    out = pl.pallas_call(
        _lstm_fall_kernel,
        out_shape=jax.ShapeDtypeStruct((Bp, 1), jnp.float32),
        in_specs=[vmem_spec] * len(args),
        out_specs=vmem_spec,
        scratch_shapes=[
            pltpu.VMEM((T, Bp, 4 * H), jnp.float32),  # hoisted layer-0 gate pre-acts
            pltpu.VMEM((T, Bp, H), jnp.float32),      # layer-1 hidden sequence
        ],
    )(*args)
    return out[:B]


# ----------------------------------------------------------------------------
# Deterministic parameter init (synthetic; matches nn.Module shapes)
# ----------------------------------------------------------------------------
def init_params(key, input_size=INPUT_SIZE, hidden_size=HIDDEN_SIZE):
    F, H = input_size, hidden_size
    ks = jax.random.split(key, 20)

    def rnd(k, shape, scale=0.1):
        return (jax.random.normal(k, shape) * scale).astype(jnp.float32)

    return dict(
        bn_gamma=(1.0 + 0.1 * jax.random.normal(ks[0], (F,))).astype(jnp.float32),
        bn_beta=rnd(ks[1], (F,)),
        bn_mean=rnd(ks[2], (F,)),
        bn_var=(1.0 + 0.1 * jnp.abs(jax.random.normal(ks[3], (F,)))).astype(jnp.float32),
        # LSTM layer 0 (b0 = b_ih + b_hh combined)
        wih0=rnd(ks[4], (4 * H, F)),
        whh0=rnd(ks[5], (4 * H, H)),
        b0=rnd(ks[6], (4 * H,)),
        # LSTM layer 1
        wih1=rnd(ks[7], (4 * H, H)),
        whh1=rnd(ks[8], (4 * H, H)),
        b1=rnd(ks[9], (4 * H,)),
        # attention
        wa1=rnd(ks[10], (H, H)), ba1=rnd(ks[11], (H,)),
        wa2=rnd(ks[12], (1, H)), ba2=rnd(ks[13], (1,)),
        # fc head
        wf1=rnd(ks[14], (H, H)), bf1=rnd(ks[15], (H,)),
        wf2=rnd(ks[16], (H // 2, H)), bf2=rnd(ks[17], (H // 2,)),
        wf3=rnd(ks[18], (1, H // 2)), bf3=rnd(ks[19], (1,)),
    )


# ----------------------------------------------------------------------------
# Pure-JAX reference (mirrors the PyTorch forward, eval mode, full f32)
# ----------------------------------------------------------------------------
def reference_forward(x, p):
    scale = p["bn_gamma"] / jnp.sqrt(p["bn_var"] + BN_EPS)
    shift = p["bn_beta"] - p["bn_mean"] * scale
    xn = x * scale + shift

    def lstm_layer(inp, wih, whh, b):
        B, T, _ = inp.shape
        H = whh.shape[1]

        def step(carry, x_t):
            h, c = carry
            g = x_t @ wih.T + h @ whh.T + b
            i, f, gg, o = jnp.split(g, 4, axis=-1)
            i, f, o = jax.nn.sigmoid(i), jax.nn.sigmoid(f), jax.nn.sigmoid(o)
            gg = jnp.tanh(gg)
            c = f * c + i * gg
            h = o * jnp.tanh(c)
            return (h, c), h

        init = (jnp.zeros((B, H), jnp.float32), jnp.zeros((B, H), jnp.float32))
        _, ys = jax.lax.scan(step, init, jnp.swapaxes(inp, 0, 1))
        return jnp.swapaxes(ys, 0, 1)

    o1 = lstm_layer(xn, p["wih0"], p["whh0"], p["b0"])
    o2 = lstm_layer(o1, p["wih1"], p["whh1"], p["b1"])
    a = jnp.tanh(o2 @ p["wa1"].T + p["ba1"])
    e = a @ p["wa2"].T + p["ba2"]                 # (B, T, 1)
    w = jax.nn.softmax(e, axis=1)
    ctx = jnp.sum(w * o2, axis=1)                 # (B, H)
    z1 = jax.nn.relu(ctx @ p["wf1"].T + p["bf1"])
    z2 = jax.nn.relu(z1 @ p["wf2"].T + p["bf2"])
    return jax.nn.sigmoid(z2 @ p["wf3"].T + p["bf3"])


if __name__ == "__main__":
    key = jax.random.PRNGKey(0)
    k_param, k_x = jax.random.split(key)

    B, T, F = 2, 8, INPUT_SIZE
    params = init_params(k_param)
    x = jax.random.normal(k_x, (B, T, F), dtype=jnp.float32)

    out = jax.block_until_ready(lstm_fall_predictor(x, params))
    ref = jax.block_until_ready(reference_forward(x, params))

    assert out.shape == (B, 1)
    np.testing.assert_allclose(np.asarray(out), np.asarray(ref), rtol=2e-2, atol=2e-2)

    print("KERNEL_OK")
</pallas_src>

<mosaic_0001>
module attributes {stable_mosaic.version = 11 : i64} {
  func.func @_lstm_fall_kernel(%arg0: memref<64x9xf32, #tpu.memory_space<vmem>>, %arg1: memref<9x512xbf16, #tpu.memory_space<vmem>>, %arg2: memref<128x512xbf16, #tpu.memory_space<vmem>>, %arg3: memref<256x512xbf16, #tpu.memory_space<vmem>>, %arg4: memref<128x128xbf16, #tpu.memory_space<vmem>>, %arg5: memref<128x128xbf16, #tpu.memory_space<vmem>>, %arg6: memref<128x64xbf16, #tpu.memory_space<vmem>>, %arg7: memref<1x1920xf32, #tpu.memory_space<vmem>>, %arg8: memref<8x1xf32, #tpu.memory_space<vmem>>, %arg9: memref<8x8x512xf32, #tpu.memory_space<vmem>>, %arg10: memref<8x8x128xf32, #tpu.memory_space<vmem>>) attributes {dimension_semantics = [], scalar_prefetch = 0 : i64, scratch_operands = 2 : i64, tpu.core_type = #tpu.core_type<tc>} {
    %c0 = arith.constant 0 : index
    %c0_0 = arith.constant 0 : index
    %0 = vector.load %arg0[%c0, %c0_0] : memref<64x9xf32, #tpu.memory_space<vmem>>, vector<64x9xf32>
    %1 = arith.truncf %0 : vector<64x9xf32> to vector<64x9xbf16>
    %c0_1 = arith.constant 0 : index
    %c0_2 = arith.constant 0 : index
    %2 = vector.load %arg1[%c0_1, %c0_2] : memref<9x512xbf16, #tpu.memory_space<vmem>>, vector<9x512xbf16>
    %cst = arith.constant dense<0.000000e+00> : vector<64x512xf32>
    %3 = tpu.matmul %1, %2, %cst {dimension_numbers = #tpu.dot_dimension_numbers<[1], [0], [0], [1], [0, 0, 1, 1], [], []>} : vector<64x9xbf16>, vector<9x512xbf16>, vector<64x512xf32> -> vector<64x512xf32>
    %c0_3 = arith.constant 0 : index
    %c0_4 = arith.constant 0 : index
    %4 = vector.load %arg7[%c0_3, %c0_4] : memref<1x1920xf32, #tpu.memory_space<vmem>>, vector<1x512xf32>
    %5 = vector.broadcast %4 : vector<1x512xf32> to vector<64x512xf32>
    %6 = arith.addf %3, %5 : vector<64x512xf32>
    %7 = vector.shape_cast %6 : vector<64x512xf32> to vector<8x8x512xf32>
    %c0_5 = arith.constant 0 : index
    %c0_6 = arith.constant 0 : index
    %c0_7 = arith.constant 0 : index
    %8 = vector.load %arg9[%c0_5, %c0_6, %c0_7] : memref<8x8x512xf32, #tpu.memory_space<vmem>>, vector<8x8x512xf32>
    tpu.vector_store %arg9[%c0_5, %c0_6, %c0_7], %7 {strides = array<i32>} : memref<8x8x512xf32, #tpu.memory_space<vmem>>, vector<8x8x512xf32>,
    %c0_8 = arith.constant 0 : index
    %c512 = arith.constant 512 : index
    %9 = vector.load %arg7[%c0_8, %c512] : memref<1x1920xf32, #tpu.memory_space<vmem>>, vector<1x512xf32>
    %cst_9 = arith.constant 0.000000e+00 : f32
    %10 = vector.broadcast %cst_9 : f32 to vector<8x128xf32>
    %c0_10 = arith.constant 0 : index
    %c0_11 = arith.constant 0 : index
    %c0_12 = arith.constant 0 : index
    %11 = vector.load %arg9[%c0_10, %c0_11, %c0_12] : memref<8x8x512xf32, #tpu.memory_space<vmem>>, vector<1x8x512xf32>
    %12 = vector.shape_cast %11 : vector<1x8x512xf32> to vector<8x512xf32>
    %13 = vector.extract_strided_slice %12 {offsets = [0, 0], sizes = [8, 128], strides = [1, 1]} : vector<8x512xf32> to vector<8x128xf32>
    %14 = arith.negf %13 : vector<8x128xf32>
    %15 = math.exp %14 : vector<8x128xf32>
    %cst_13 = arith.constant 1.000000e+00 : f32
    %16 = vector.broadcast %cst_13 : f32 to vector<8x128xf32>
    %17 = arith.addf %16, %15 : vector<8x128xf32>
    %18 = arith.divf %16, %17 : vector<8x128xf32>
    %19 = vector.extract_strided_slice %12 {offsets = [0, 128], sizes = [8, 128], strides = [1, 1]} : vector<8x512xf32> to vector<8x128xf32>
    %20 = arith.negf %19 : vector<8x128xf32>
    %21 = math.exp %20 : vector<8x128xf32>
    %cst_14 = arith.constant 1.000000e+00 : f32
    %22 = vector.broadcast %cst_14 : f32 to vector<8x128xf32>
    %23 = arith.addf %22, %21 : vector<8x128xf32>
    %24 = arith.divf %22, %23 : vector<8x128xf32>
    %25 = vector.extract_strided_slice %12 {offsets = [0, 256], sizes = [8, 128], strides = [1, 1]} : vector<8x512xf32> to vector<8x128xf32>
    %26 = math.tanh %25 : vector<8x128xf32>
    %27 = vector.extract_strided_slice %12 {offsets = [0, 384], sizes = [8, 128], strides = [1, 1]} : vector<8x512xf32> to vector<8x128xf32>
    %28 = arith.negf %27 : vector<8x128xf32>
    %29 = math.exp %28 : vector<8x128xf32>
    %cst_15 = arith.constant 1.000000e+00 : f32
    %30 = vector.broadcast %cst_15 : f32 to vector<8x128xf32>
    %31 = arith.addf %30, %29 : vector<8x128xf32>
    %32 = arith.divf %30, %31 : vector<8x128xf32>
    %33 = arith.mulf %24, %10 : vector<8x128xf32>
    %34 = arith.mulf %18, %26 : vector<8x128xf32>
    %35 = arith.addf %33, %34 : vector<8x128xf32>
    %36 = math.tanh %35 : vector<8x128xf32>
    %37 = arith.mulf %32, %36 : vector<8x128xf32>
    %c1 = arith.constant 1 : index
    %c0_16 = arith.constant 0 : index
    %c0_17 = arith.constant 0 : index
    %38 = vector.load %arg9[%c1, %c0_16, %c0_17] : memref<8x8x512xf32, #tpu.memory_space<vmem>>, vector<1x8x512xf32>
    %39 = vector.shape_cast %38 : vector<1x8x512xf32> to vector<8x512xf32>
    %40 = arith.truncf %37 : vector<8x128xf32> to vector<8x128xbf16>
    %c0_18 = arith.constant 0 : index
    %c0_19 = arith.constant 0 : index
    %41 = vector.load %arg2[%c0_18, %c0_19] : memref<128x512xbf16, #tpu.memory_space<vmem>>, vector<128x512xbf16>
    %cst_20 = arith.constant dense<0.000000e+00> : vector<8x512xf32>
    %42 = tpu.matmul %40, %41, %cst_20 {dimension_numbers = #tpu.dot_dimension_numbers<[1], [0], [0], [1], [0, 0, 1, 1], [], []>} : vector<8x128xbf16>, vector<128x512xbf16>, vector<8x512xf32> -> vector<8x512xf32>
    %43 = arith.addf %39, %42 : vector<8x512xf32>
    %44 = vector.extract_strided_slice %43 {offsets = [0, 0], sizes = [8, 128], strides = [1, 1]} : vector<8x512xf32> to vector<8x128xf32>
    %45 = arith.negf %44 : vector<8x128xf32>
    %46 = math.exp %45 : vector<8x128xf32>
    %cst_21 = arith.constant 1.000000e+00 : f32
    %47 = vector.broadcast %cst_21 : f32 to vector<8x128xf32>
    %48 = arith.addf %47, %46 : vector<8x128xf32>
    %49 = arith.divf %47, %48 : vector<8x128xf32>
    %50 = vector.extract_strided_slice %43 {offsets = [0, 128], sizes = [8, 128], strides = [1, 1]} : vector<8x512xf32> to vector<8x128xf32>
    %51 = arith.negf %50 : vector<8x128xf32>
    %52 = math.exp %51 : vector<8x128xf32>
    %cst_22 = arith.constant 1.000000e+00 : f32
    %53 = vector.broadcast %cst_22 : f32 to vector<8x128xf32>
    %54 = arith.addf %53, %52 : vector<8x128xf32>
    %55 = arith.divf %53, %54 : vector<8x128xf32>
    %56 = vector.extract_strided_slice %43 {offsets = [0, 256], sizes = [8, 128], strides = [1, 1]} : vector<8x512xf32> to vector<8x128xf32>
    %57 = math.tanh %56 : vector<8x128xf32>
    %58 = vector.extract_strided_slice %43 {offsets = [0, 384], sizes = [8, 128], strides = [1, 1]} : vector<8x512xf32> to vector<8x128xf32>
    %59 = arith.negf %58 : vector<8x128xf32>
    %60 = math.exp %59 : vector<8x128xf32>
    %cst_23 = arith.constant 1.000000e+00 : f32
    %61 = vector.broadcast %cst_23 : f32 to vector<8x128xf32>
    %62 = arith.addf %61, %60 : vector<8x128xf32>
    %63 = arith.divf %61, %62 : vector<8x128xf32>
    %64 = arith.mulf %55, %35 : vector<8x128xf32>
    %65 = arith.mulf %49, %57 : vector<8x128xf32>
    %66 = arith.addf %64, %65 : vector<8x128xf32>
    %67 = math.tanh %66 : vector<8x128xf32>
    %68 = arith.mulf %63, %67 : vector<8x128xf32>
    %69 = arith.truncf %37 : vector<8x128xf32> to vector<8x128xbf16>
    %c0_24 = arith.constant 0 : index
    %c0_25 = arith.constant 0 : index
    %70 = vector.load %arg3[%c0_24, %c0_25] : memref<256x512xbf16, #tpu.memory_space<vmem>>, vector<128x512xbf16>
    %cst_26 = arith.constant dense<0.000000e+00> : vector<8x512xf32>
    %71 = tpu.matmul %69, %70, %cst_26 {dimension_numbers = #tpu.dot_dimension_numbers<[1], [0], [0], [1], [0, 0, 1, 1], [], []>} : vector<8x128xbf16>, vector<128x512xbf16>, vector<8x512xf32> -> vector<8x512xf32>
    %72 = vector.broadcast %9 : vector<1x512xf32> to vector<8x512xf32>
    %73 = arith.addf %71, %72 : vector<8x512xf32>
    %74 = vector.extract_strided_slice %73 {offsets = [0, 0], sizes = [8, 128], strides = [1, 1]} : vector<8x512xf32> to vector<8x128xf32>
    %75 = arith.negf %74 : vector<8x128xf32>
    %76 = math.exp %75 : vector<8x128xf32>
    %cst_27 = arith.constant 1.000000e+00 : f32
    %77 = vector.broadcast %cst_27 : f32 to vector<8x128xf32>
    %78 = arith.addf %77, %76 : vector<8x128xf32>
    %79 = arith.divf %77, %78 : vector<8x128xf32>
    %80 = vector.extract_strided_slice %73 {offsets = [0, 128], sizes = [8, 128], strides = [1, 1]} : vector<8x512xf32> to vector<8x128xf32>
    %81 = arith.negf %80 : vector<8x128xf32>
    %82 = math.exp %81 : vector<8x128xf32>
    %cst_28 = arith.constant 1.000000e+00 : f32
    %83 = vector.broadcast %cst_28 : f32 to vector<8x128xf32>
    %84 = arith.addf %83, %82 : vector<8x128xf32>
    %85 = arith.divf %83, %84 : vector<8x128xf32>
    %86 = vector.extract_strided_slice %73 {offsets = [0, 256], sizes = [8, 128], strides = [1, 1]} : vector<8x512xf32> to vector<8x128xf32>
    %87 = math.tanh %86 : vector<8x128xf32>
    %88 = vector.extract_strided_slice %73 {offsets = [0, 384], sizes = [8, 128], strides = [1, 1]} : vector<8x512xf32> to vector<8x128xf32>
    %89 = arith.negf %88 : vector<8x128xf32>
    %90 = math.exp %89 : vector<8x128xf32>
    %cst_29 = arith.constant 1.000000e+00 : f32
    %91 = vector.broadcast %cst_29 : f32 to vector<8x128xf32>
    %92 = arith.addf %91, %90 : vector<8x128xf32>
    %93 = arith.divf %91, %92 : vector<8x128xf32>
    %94 = arith.mulf %85, %10 : vector<8x128xf32>
    %95 = arith.mulf %79, %87 : vector<8x128xf32>
    %96 = arith.addf %94, %95 : vector<8x128xf32>
    %97 = math.tanh %96 : vector<8x128xf32>
    %98 = arith.mulf %93, %97 : vector<8x128xf32>
    %c0_30 = arith.constant 0 : index
    %c0_31 = arith.constant 0 : index
    %c0_32 = arith.constant 0 : index
    %99 = vector.load %arg10[%c0_30, %c0_31, %c0_32] : memref<8x8x128xf32, #tpu.memory_space<vmem>>, vector<1x8x128xf32>
    %100 = vector.shape_cast %99 : vector<1x8x128xf32> to vector<8x128xf32>
    %101 = vector.shape_cast %98 : vector<8x128xf32> to vector<1x8x128xf32>
    tpu.vector_store %arg10[%c0_30, %c0_31, %c0_32], %101 {strides = array<i32>} : memref<8x8x128xf32, #tpu.memory_space<vmem>>, vector<1x8x128xf32>,
    %c2 = arith.constant 2 : index
    %c0_33 = arith.constant 0 : index
    %c0_34 = arith.constant 0 : index
    %102 = vector.load %arg9[%c2, %c0_33, %c0_34] : memref<8x8x512xf32, #tpu.memory_space<vmem>>, vector<1x8x512xf32>
    %103 = vector.shape_cast %102 : vector<1x8x512xf32> to vector<8x512xf32>
    %104 = arith.truncf %68 : vector<8x128xf32> to vector<8x128xbf16>
    %c0_35 = arith.constant 0 : index
    %c0_36 = arith.constant 0 : index
    %105 = vector.load %arg2[%c0_35, %c0_36] : memref<128x512xbf16, #tpu.memory_space<vmem>>, vector<128x512xbf16>
    %cst_37 = arith.constant dense<0.000000e+00> : vector<8x512xf32>
    %106 = tpu.matmul %104, %105, %cst_37 {dimension_numbers = #tpu.dot_dimension_numbers<[1], [0], [0], [1], [0, 0, 1, 1], [], []>} : vector<8x128xbf16>, vector<128x512xbf16>, vector<8x512xf32> -> vector<8x512xf32>
    %107 = arith.addf %103, %106 : vector<8x512xf32>
    %108 = vector.extract_strided_slice %107 {offsets = [0, 0], sizes = [8, 128], strides = [1, 1]} : vector<8x512xf32> to vector<8x128xf32>
    %109 = arith.negf %108 : vector<8x128xf32>
    %110 = math.exp %109 : vector<8x128xf32>
    %cst_38 = arith.constant 1.000000e+00 : f32
    %111 = vector.broadcast %cst_38 : f32 to vector<8x128xf32>
    %112 = arith.addf %111, %110 : vector<8x128xf32>
    %113 = arith.divf %111, %112 : vector<8x128xf32>
    %114 = vector.extract_strided_slice %107 {offsets = [0, 128], sizes = [8, 128], strides = [1, 1]} : vector<8x512xf32> to vector<8x128xf32>
    %115 = arith.negf %114 : vector<8x128xf32>
    %116 = math.exp %115 : vector<8x128xf32>
    %cst_39 = arith.constant 1.000000e+00 : f32
    %117 = vector.broadcast %cst_39 : f32 to vector<8x128xf32>
    %118 = arith.addf %117, %116 : vector<8x128xf32>
    %119 = arith.divf %117, %118 : vector<8x128xf32>
    %120 = vector.extract_strided_slice %107 {offsets = [0, 256], sizes = [8, 128], strides = [1, 1]} : vector<8x512xf32> to vector<8x128xf32>
    %121 = math.tanh %120 : vector<8x128xf32>
    %122 = vector.extract_strided_slice %107 {offsets = [0, 384], sizes = [8, 128], strides = [1, 1]} : vector<8x512xf32> to vector<8x128xf32>
    %123 = arith.negf %122 : vector<8x128xf32>
    %124 = math.exp %123 : vector<8x128xf32>
    %cst_40 = arith.constant 1.000000e+00 : f32
    %125 = vector.broadcast %cst_40 : f32 to vector<8x128xf32>
    %126 = arith.addf %125, %124 : vector<8x128xf32>
    %127 = arith.divf %125, %126 : vector<8x128xf32>
    %128 = arith.mulf %119, %66 : vector<8x128xf32>
    %129 = arith.mulf %113, %121 : vector<8x128xf32>
    %130 = arith.addf %128, %129 : vector<8x128xf32>
    %131 = math.tanh %130 : vector<8x128xf32>
    %132 = arith.mulf %127, %131 : vector<8x128xf32>
    %133 = tpu.concatenate %68, %98 in 1 : vector<8x128xf32>, vector<8x128xf32> -> vector<8x256xf32>
    %134 = arith.truncf %133 : vector<8x256xf32> to vector<8x256xbf16>
    %c0_41 = arith.constant 0 : index
    %c0_42 = arith.constant 0 : index
    %135 = vector.load %arg3[%c0_41, %c0_42] : memref<256x512xbf16, #tpu.memory_space<vmem>>, vector<256x512xbf16>
    %cst_43 = arith.constant dense<0.000000e+00> : vector<8x512xf32>
    %136 = tpu.matmul %134, %135, %cst_43 {dimension_numbers = #tpu.dot_dimension_numbers<[1], [0], [0], [1], [0, 0, 1, 1], [], []>} : vector<8x256xbf16>, vector<256x512xbf16>, vector<8x512xf32> -> vector<8x512xf32>
    %137 = vector.broadcast %9 : vector<1x512xf32> to vector<8x512xf32>
    %138 = arith.addf %136, %137 : vector<8x512xf32>
    %139 = vector.extract_strided_slice %138 {offsets = [0, 0], sizes = [8, 128], strides = [1, 1]} : vector<8x512xf32> to vector<8x128xf32>
    %140 = arith.negf %139 : vector<8x128xf32>
    %141 = math.exp %140 : vector<8x128xf32>
    %cst_44 = arith.constant 1.000000e+00 : f32
    %142 = vector.broadcast %cst_44 : f32 to vector<8x128xf32>
    %143 = arith.addf %142, %141 : vector<8x128xf32>
    %144 = arith.divf %142, %143 : vector<8x128xf32>
    %145 = vector.extract_strided_slice %138 {offsets = [0, 128], sizes = [8, 128], strides = [1, 1]} : vector<8x512xf32> to vector<8x128xf32>
    %146 = arith.negf %145 : vector<8x128xf32>
    %147 = math.exp %146 : vector<8x128xf32>
    %cst_45 = arith.constant 1.000000e+00 : f32
    %148 = vector.broadcast %cst_45 : f32 to vector<8x128xf32>
    %149 = arith.addf %148, %147 : vector<8x128xf32>
    %150 = arith.divf %148, %149 : vector<8x128xf32>
    %151 = vector.extract_strided_slice %138 {offsets = [0, 256], sizes = [8, 128], strides = [1, 1]} : vector<8x512xf32> to vector<8x128xf32>
    %152 = math.tanh %151 : vector<8x128xf32>
    %153 = vector.extract_strided_slice %138 {offsets = [0, 384], sizes = [8, 128], strides = [1, 1]} : vector<8x512xf32> to vector<8x128xf32>
    %154 = arith.negf %153 : vector<8x128xf32>
    %155 = math.exp %154 : vector<8x128xf32>
    %cst_46 = arith.constant 1.000000e+00 : f32
    %156 = vector.broadcast %cst_46 : f32 to vector<8x128xf32>
    %157 = arith.addf %156, %155 : vector<8x128xf32>
    %158 = arith.divf %156, %157 : vector<8x128xf32>
    %159 = arith.mulf %150, %96 : vector<8x128xf32>
    %160 = arith.mulf %144, %152 : vector<8x128xf32>
    %161 = arith.addf %159, %160 : vector<8x128xf32>
    %162 = math.tanh %161 : vector<8x128xf32>
    %163 = arith.mulf %158, %162 : vector<8x128xf32>
    %c1_47 = arith.constant 1 : index
    %c0_48 = arith.constant 0 : index
    %c0_49 = arith.constant 0 : index
    %164 = vector.load %arg10[%c1_47, %c0_48, %c0_49] : memref<8x8x128xf32, #tpu.memory_space<vmem>>, vector<1x8x128xf32>
    %165 = vector.shape_cast %164 : vector<1x8x128xf32> to vector<8x128xf32>
    %166 = vector.shape_cast %163 : vector<8x128xf32> to vector<1x8x128xf32>
    tpu.vector_store %arg10[%c1_47, %c0_48, %c0_49], %166 {strides = array<i32>} : memref<8x8x128xf32, #tpu.memory_space<vmem>>, vector<1x8x128xf32>,
    %c3 = arith.constant 3 : index
    %c0_50 = arith.constant 0 : index
    %c0_51 = arith.constant 0 : index
    %167 = vector.load %arg9[%c3, %c0_50, %c0_51] : memref<8x8x512xf32, #tpu.memory_space<vmem>>, vector<1x8x512xf32>
    %168 = vector.shape_cast %167 : vector<1x8x512xf32> to vector<8x512xf32>
    %169 = arith.truncf %132 : vector<8x128xf32> to vector<8x128xbf16>
    %c0_52 = arith.constant 0 : index
    %c0_53 = arith.constant 0 : index
    %170 = vector.load %arg2[%c0_52, %c0_53] : memref<128x512xbf16, #tpu.memory_space<vmem>>, vector<128x512xbf16>
    %cst_54 = arith.constant dense<0.000000e+00> : vector<8x512xf32>
    %171 = tpu.matmul %169, %170, %cst_54 {dimension_numbers = #tpu.dot_dimension_numbers<[1], [0], [0], [1], [0, 0, 1, 1], [], []>} : vector<8x128xbf16>, vector<128x512xbf16>, vector<8x512xf32> -> vector<8x512xf32>
    %172 = arith.addf %168, %171 : vector<8x512xf32>
    %173 = vector.extract_strided_slice %172 {offsets = [0, 0], sizes = [8, 128], strides = [1, 1]} : vector<8x512xf32> to vector<8x128xf32>
    %174 = arith.negf %173 : vector<8x128xf32>
    %175 = math.exp %174 : vector<8x128xf32>
    %cst_55 = arith.constant 1.000000e+00 : f32
    %176 = vector.broadcast %cst_55 : f32 to vector<8x128xf32>
    %177 = arith.addf %176, %175 : vector<8x128xf32>
    %178 = arith.divf %176, %177 : vector<8x128xf32>
    %179 = vector.extract_strided_slice %172 {offsets = [0, 128], sizes = [8, 128], strides = [1, 1]} : vector<8x512xf32> to vector<8x128xf32>
    %180 = arith.negf %179 : vector<8x128xf32>
    %181 = math.exp %180 : vector<8x128xf32>
    %cst_56 = arith.constant 1.000000e+00 : f32
    %182 = vector.broadcast %cst_56 : f32 to vector<8x128xf32>
    %183 = arith.addf %182, %181 : vector<8x128xf32>
    %184 = arith.divf %182, %183 : vector<8x128xf32>
    %185 = vector.extract_strided_slice %172 {offsets = [0, 256], sizes = [8, 128], strides = [1, 1]} : vector<8x512xf32> to vector<8x128xf32>
    %186 = math.tanh %185 : vector<8x128xf32>
    %187 = vector.extract_strided_slice %172 {offsets = [0, 384], sizes = [8, 128], strides = [1, 1]} : vector<8x512xf32> to vector<8x128xf32>
    %188 = arith.negf %187 : vector<8x128xf32>
    %189 = math.exp %188 : vector<8x128xf32>
    %cst_57 = arith.constant 1.000000e+00 : f32
    %190 = vector.broadcast %cst_57 : f32 to vector<8x128xf32>
    %191 = arith.addf %190, %189 : vector<8x128xf32>
    %192 = arith.divf %190, %191 : vector<8x128xf32>
    %193 = arith.mulf %184, %130 : vector<8x128xf32>
    %194 = arith.mulf %178, %186 : vector<8x128xf32>
    %195 = arith.addf %193, %194 : vector<8x128xf32>
    %196 = math.tanh %195 : vector<8x128xf32>
    %197 = arith.mulf %192, %196 : vector<8x128xf32>
    %198 = tpu.concatenate %132, %163 in 1 : vector<8x128xf32>, vector<8x128xf32> -> vector<8x256xf32>
    %199 = arith.truncf %198 : vector<8x256xf32> to vector<8x256xbf16>
    %c0_58 = arith.constant 0 : index
    %c0_59 = arith.constant 0 : index
    %200 = vector.load %arg3[%c0_58, %c0_59] : memref<256x512xbf16, #tpu.memory_space<vmem>>, vector<256x512xbf16>
    %cst_60 = arith.constant dense<0.000000e+00> : vector<8x512xf32>
    %201 = tpu.matmul %199, %200, %cst_60 {dimension_numbers = #tpu.dot_dimension_numbers<[1], [0], [0], [1], [0, 0, 1, 1], [], []>} : vector<8x256xbf16>, vector<256x512xbf16>, vector<8x512xf32> -> vector<8x512xf32>
    %202 = vector.broadcast %9 : vector<1x512xf32> to vector<8x512xf32>
    %203 = arith.addf %201, %202 : vector<8x512xf32>
    %204 = vector.extract_strided_slice %203 {offsets = [0, 0], sizes = [8, 128], strides = [1, 1]} : vector<8x512xf32> to vector<8x128xf32>
    %205 = arith.negf %204 : vector<8x128xf32>
    %206 = math.exp %205 : vector<8x128xf32>
    %cst_61 = arith.constant 1.000000e+00 : f32
    %207 = vector.broadcast %cst_61 : f32 to vector<8x128xf32>
    %208 = arith.addf %207, %206 : vector<8x128xf32>
    %209 = arith.divf %207, %208 : vector<8x128xf32>
    %210 = vector.extract_strided_slice %203 {offsets = [0, 128], sizes = [8, 128], strides = [1, 1]} : vector<8x512xf32> to vector<8x128xf32>
    %211 = arith.negf %210 : vector<8x128xf32>
    %212 = math.exp %211 : vector<8x128xf32>
    %cst_62 = arith.constant 1.000000e+00 : f32
    %213 = vector.broadcast %cst_62 : f32 to vector<8x128xf32>
    %214 = arith.addf %213, %212 : vector<8x128xf32>
    %215 = arith.divf %213, %214 : vector<8x128xf32>
    %216 = vector.extract_strided_slice %203 {offsets = [0, 256], sizes = [8, 128], strides = [1, 1]} : vector<8x512xf32> to vector<8x128xf32>
    %217 = math.tanh %216 : vector<8x128xf32>
    %218 = vector.extract_strided_slice %203 {offsets = [0, 384], sizes = [8, 128], strides = [1, 1]} : vector<8x512xf32> to vector<8x128xf32>
    %219 = arith.negf %218 : vector<8x128xf32>
    %220 = math.exp %219 : vector<8x128xf32>
    %cst_63 = arith.constant 1.000000e+00 : f32
    %221 = vector.broadcast %cst_63 : f32 to vector<8x128xf32>
    %222 = arith.addf %221, %220 : vector<8x128xf32>
    %223 = arith.divf %221, %222 : vector<8x128xf32>
    %224 = arith.mulf %215, %161 : vector<8x128xf32>
    %225 = arith.mulf %209, %217 : vector<8x128xf32>
    %226 = arith.addf %224, %225 : vector<8x128xf32>
    %227 = math.tanh %226 : vector<8x128xf32>
    %228 = arith.mulf %223, %227 : vector<8x128xf32>
    %c2_64 = arith.constant 2 : index
    %c0_65 = arith.constant 0 : index
    %c0_66 = arith.constant 0 : index
    %229 = vector.load %arg10[%c2_64, %c0_65, %c0_66] : memref<8x8x128xf32, #tpu.memory_space<vmem>>, vector<1x8x128xf32>
    %230 = vector.shape_cast %229 : vector<1x8x128xf32> to vector<8x128xf32>
    %231 = vector.shape_cast %228 : vector<8x128xf32> to vector<1x8x128xf32>
    tpu.vector_store %arg10[%c2_64, %c0_65, %c0_66], %231 {strides = array<i32>} : memref<8x8x128xf32, #tpu.memory_space<vmem>>, vector<1x8x128xf32>,
    %c4 = arith.constant 4 : index
    %c0_67 = arith.constant 0 : index
    %c0_68 = arith.constant 0 : index
    %232 = vector.load %arg9[%c4, %c0_67, %c0_68] : memref<8x8x512xf32, #tpu.memory_space<vmem>>, vector<1x8x512xf32>
    %233 = vector.shape_cast %232 : vector<1x8x512xf32> to vector<8x512xf32>
    %234 = arith.truncf %197 : vector<8x128xf32> to vector<8x128xbf16>
    %c0_69 = arith.constant 0 : index
    %c0_70 = arith.constant 0 : index
    %235 = vector.load %arg2[%c0_69, %c0_70] : memref<128x512xbf16, #tpu.memory_space<vmem>>, vector<128x512xbf16>
    %cst_71 = arith.constant dense<0.000000e+00> : vector<8x512xf32>
    %236 = tpu.matmul %234, %235, %cst_71 {dimension_numbers = #tpu.dot_dimension_numbers<[1], [0], [0], [1], [0, 0, 1, 1], [], []>} : vector<8x128xbf16>, vector<128x512xbf16>, vector<8x512xf32> -> vector<8x512xf32>
    %237 = arith.addf %233, %236 : vector<8x512xf32>
    %238 = vector.extract_strided_slice %237 {offsets = [0, 0], sizes = [8, 128], strides = [1, 1]} : vector<8x512xf32> to vector<8x128xf32>
    %239 = arith.negf %238 : vector<8x128xf32>
    %240 = math.exp %239 : vector<8x128xf32>
    %cst_72 = arith.constant 1.000000e+00 : f32
    %241 = vector.broadcast %cst_72 : f32 to vector<8x128xf32>
    %242 = arith.addf %241, %240 : vector<8x128xf32>
    %243 = arith.divf %241, %242 : vector<8x128xf32>
    %244 = vector.extract_strided_slice %237 {offsets = [0, 128], sizes = [8, 128], strides = [1, 1]} : vector<8x512xf32> to vector<8x128xf32>
    %245 = arith.negf %244 : vector<8x128xf32>
    %246 = math.exp %245 : vector<8x128xf32>
    %cst_73 = arith.constant 1.000000e+00 : f32
    %247 = vector.broadcast %cst_73 : f32 to vector<8x128xf32>
    %248 = arith.addf %247, %246 : vector<8x128xf32>
    %249 = arith.divf %247, %248 : vector<8x128xf32>
    %250 = vector.extract_strided_slice %237 {offsets = [0, 256], sizes = [8, 128], strides = [1, 1]} : vector<8x512xf32> to vector<8x128xf32>
    %251 = math.tanh %250 : vector<8x128xf32>
    %252 = vector.extract_strided_slice %237 {offsets = [0, 384], sizes = [8, 128], strides = [1, 1]} : vector<8x512xf32> to vector<8x128xf32>
    %253 = arith.negf %252 : vector<8x128xf32>
    %254 = math.exp %253 : vector<8x128xf32>
    %cst_74 = arith.constant 1.000000e+00 : f32
    %255 = vector.broadcast %cst_74 : f32 to vector<8x128xf32>
    %256 = arith.addf %255, %254 : vector<8x128xf32>
    %257 = arith.divf %255, %256 : vector<8x128xf32>
    %258 = arith.mulf %249, %195 : vector<8x128xf32>
    %259 = arith.mulf %243, %251 : vector<8x128xf32>
    %260 = arith.addf %258, %259 : vector<8x128xf32>
    %261 = math.tanh %260 : vector<8x128xf32>
    %262 = arith.mulf %257, %261 : vector<8x128xf32>
    %263 = tpu.concatenate %197, %228 in 1 : vector<8x128xf32>, vector<8x128xf32> -> vector<8x256xf32>
    %264 = arith.truncf %263 : vector<8x256xf32> to vector<8x256xbf16>
    %c0_75 = arith.constant 0 : index
    %c0_76 = arith.constant 0 : index
    %265 = vector.load %arg3[%c0_75, %c0_76] : memref<256x512xbf16, #tpu.memory_space<vmem>>, vector<256x512xbf16>
    %cst_77 = arith.constant dense<0.000000e+00> : vector<8x512xf32>
    %266 = tpu.matmul %264, %265, %cst_77 {dimension_numbers = #tpu.dot_dimension_numbers<[1], [0], [0], [1], [0, 0, 1, 1], [], []>} : vector<8x256xbf16>, vector<256x512xbf16>, vector<8x512xf32> -> vector<8x512xf32>
    %267 = vector.broadcast %9 : vector<1x512xf32> to vector<8x512xf32>
    %268 = arith.addf %266, %267 : vector<8x512xf32>
    %269 = vector.extract_strided_slice %268 {offsets = [0, 0], sizes = [8, 128], strides = [1, 1]} : vector<8x512xf32> to vector<8x128xf32>
    %270 = arith.negf %269 : vector<8x128xf32>
    %271 = math.exp %270 : vector<8x128xf32>
    %cst_78 = arith.constant 1.000000e+00 : f32
    %272 = vector.broadcast %cst_78 : f32 to vector<8x128xf32>
    %273 = arith.addf %272, %271 : vector<8x128xf32>
    %274 = arith.divf %272, %273 : vector<8x128xf32>
    %275 = vector.extract_strided_slice %268 {offsets = [0, 128], sizes = [8, 128], strides = [1, 1]} : vector<8x512xf32> to vector<8x128xf32>
    %276 = arith.negf %275 : vector<8x128xf32>
    %277 = math.exp %276 : vector<8x128xf32>
    %cst_79 = arith.constant 1.000000e+00 : f32
    %278 = vector.broadcast %cst_79 : f32 to vector<8x128xf32>
    %279 = arith.addf %278, %277 : vector<8x128xf32>
    %280 = arith.divf %278, %279 : vector<8x128xf32>
    %281 = vector.extract_strided_slice %268 {offsets = [0, 256], sizes = [8, 128], strides = [1, 1]} : vector<8x512xf32> to vector<8x128xf32>
    %282 = math.tanh %281 : vector<8x128xf32>
    %283 = vector.extract_strided_slice %268 {offsets = [0, 384], sizes = [8, 128], strides = [1, 1]} : vector<8x512xf32> to vector<8x128xf32>
    %284 = arith.negf %283 : vector<8x128xf32>
    %285 = math.exp %284 : vector<8x128xf32>
    %cst_80 = arith.constant 1.000000e+00 : f32
    %286 = vector.broadcast %cst_80 : f32 to vector<8x128xf32>
    %287 = arith.addf %286, %285 : vector<8x128xf32>
    %288 = arith.divf %286, %287 : vector<8x128xf32>
    %289 = arith.mulf %280, %226 : vector<8x128xf32>
    %290 = arith.mulf %274, %282 : vector<8x128xf32>
    %291 = arith.addf %289, %290 : vector<8x128xf32>
    %292 = math.tanh %291 : vector<8x128xf32>
    %293 = arith.mulf %288, %292 : vector<8x128xf32>
    %c3_81 = arith.constant 3 : index
    %c0_82 = arith.constant 0 : index
    %c0_83 = arith.constant 0 : index
    %294 = vector.load %arg10[%c3_81, %c0_82, %c0_83] : memref<8x8x128xf32, #tpu.memory_space<vmem>>, vector<1x8x128xf32>
    %295 = vector.shape_cast %294 : vector<1x8x128xf32> to vector<8x128xf32>
    %296 = vector.shape_cast %293 : vector<8x128xf32> to vector<1x8x128xf32>
    tpu.vector_store %arg10[%c3_81, %c0_82, %c0_83], %296 {strides = array<i32>} : memref<8x8x128xf32, #tpu.memory_space<vmem>>, vector<1x8x128xf32>,
    %c5 = arith.constant 5 : index
    %c0_84 = arith.constant 0 : index
    %c0_85 = arith.constant 0 : index
    %297 = vector.load %arg9[%c5, %c0_84, %c0_85] : memref<8x8x512xf32, #tpu.memory_space<vmem>>, vector<1x8x512xf32>
    %298 = vector.shape_cast %297 : vector<1x8x512xf32> to vector<8x512xf32>
    %299 = arith.truncf %262 : vector<8x128xf32> to vector<8x128xbf16>
    %c0_86 = arith.constant 0 : index
    %c0_87 = arith.constant 0 : index
    %300 = vector.load %arg2[%c0_86, %c0_87] : memref<128x512xbf16, #tpu.memory_space<vmem>>, vector<128x512xbf16>
    %cst_88 = arith.constant dense<0.000000e+00> : vector<8x512xf32>
    %301 = tpu.matmul %299, %300, %cst_88 {dimension_numbers = #tpu.dot_dimension_numbers<[1], [0], [0], [1], [0, 0, 1, 1], [], []>} : vector<8x128xbf16>, vector<128x512xbf16>, vector<8x512xf32> -> vector<8x512xf32>
    %302 = arith.addf %298, %301 : vector<8x512xf32>
    %303 = vector.extract_strided_slice %302 {offsets = [0, 0], sizes = [8, 128], strides = [1, 1]} : vector<8x512xf32> to vector<8x128xf32>
    %304 = arith.negf %303 : vector<8x128xf32>
    %305 = math.exp %304 : vector<8x128xf32>
    %cst_89 = arith.constant 1.000000e+00 : f32
    %306 = vector.broadcast %cst_89 : f32 to vector<8x128xf32>
    %307 = arith.addf %306, %305 : vector<8x128xf32>
    %308 = arith.divf %306, %307 : vector<8x128xf32>
    %309 = vector.extract_strided_slice %302 {offsets = [0, 128], sizes = [8, 128], strides = [1, 1]} : vector<8x512xf32> to vector<8x128xf32>
    %310 = arith.negf %309 : vector<8x128xf32>
    %311 = math.exp %310 : vector<8x128xf32>
    %cst_90 = arith.constant 1.000000e+00 : f32
    %312 = vector.broadcast %cst_90 : f32 to vector<8x128xf32>
    %313 = arith.addf %312, %311 : vector<8x128xf32>
    %314 = arith.divf %312, %313 : vector<8x128xf32>
    %315 = vector.extract_strided_slice %302 {offsets = [0, 256], sizes = [8, 128], strides = [1, 1]} : vector<8x512xf32> to vector<8x128xf32>
    %316 = math.tanh %315 : vector<8x128xf32>
    %317 = vector.extract_strided_slice %302 {offsets = [0, 384], sizes = [8, 128], strides = [1, 1]} : vector<8x512xf32> to vector<8x128xf32>
    %318 = arith.negf %317 : vector<8x128xf32>
    %319 = math.exp %318 : vector<8x128xf32>
    %cst_91 = arith.constant 1.000000e+00 : f32
    %320 = vector.broadcast %cst_91 : f32 to vector<8x128xf32>
    %321 = arith.addf %320, %319 : vector<8x128xf32>
    %322 = arith.divf %320, %321 : vector<8x128xf32>
    %323 = arith.mulf %314, %260 : vector<8x128xf32>
    %324 = arith.mulf %308, %316 : vector<8x128xf32>
    %325 = arith.addf %323, %324 : vector<8x128xf32>
    %326 = math.tanh %325 : vector<8x128xf32>
    %327 = arith.mulf %322, %326 : vector<8x128xf32>
    %328 = tpu.concatenate %262, %293 in 1 : vector<8x128xf32>, vector<8x128xf32> -> vector<8x256xf32>
    %329 = arith.truncf %328 : vector<8x256xf32> to vector<8x256xbf16>
    %c0_92 = arith.constant 0 : index
    %c0_93 = arith.constant 0 : index
    %330 = vector.load %arg3[%c0_92, %c0_93] : memref<256x512xbf16, #tpu.memory_space<vmem>>, vector<256x512xbf16>
    %cst_94 = arith.constant dense<0.000000e+00> : vector<8x512xf32>
    %331 = tpu.matmul %329, %330, %cst_94 {dimension_numbers = #tpu.dot_dimension_numbers<[1], [0], [0], [1], [0, 0, 1, 1], [], []>} : vector<8x256xbf16>, vector<256x512xbf16>, vector<8x512xf32> -> vector<8x512xf32>
    %332 = vector.broadcast %9 : vector<1x512xf32> to vector<8x512xf32>
    %333 = arith.addf %331, %332 : vector<8x512xf32>
    %334 = vector.extract_strided_slice %333 {offsets = [0, 0], sizes = [8, 128], strides = [1, 1]} : vector<8x512xf32> to vector<8x128xf32>
    %335 = arith.negf %334 : vector<8x128xf32>
    %336 = math.exp %335 : vector<8x128xf32>
    %cst_95 = arith.constant 1.000000e+00 : f32
    %337 = vector.broadcast %cst_95 : f32 to vector<8x128xf32>
    %338 = arith.addf %337, %336 : vector<8x128xf32>
    %339 = arith.divf %337, %338 : vector<8x128xf32>
    %340 = vector.extract_strided_slice %333 {offsets = [0, 128], sizes = [8, 128], strides = [1, 1]} : vector<8x512xf32> to vector<8x128xf32>
    %341 = arith.negf %340 : vector<8x128xf32>
    %342 = math.exp %341 : vector<8x128xf32>
    %cst_96 = arith.constant 1.000000e+00 : f32
    %343 = vector.broadcast %cst_96 : f32 to vector<8x128xf32>
    %344 = arith.addf %343, %342 : vector<8x128xf32>
    %345 = arith.divf %343, %344 : vector<8x128xf32>
    %346 = vector.extract_strided_slice %333 {offsets = [0, 256], sizes = [8, 128], strides = [1, 1]} : vector<8x512xf32> to vector<8x128xf32>
    %347 = math.tanh %346 : vector<8x128xf32>
    %348 = vector.extract_strided_slice %333 {offsets = [0, 384], sizes = [8, 128], strides = [1, 1]} : vector<8x512xf32> to vector<8x128xf32>
    %349 = arith.negf %348 : vector<8x128xf32>
    %350 = math.exp %349 : vector<8x128xf32>
    %cst_97 = arith.constant 1.000000e+00 : f32
    %351 = vector.broadcast %cst_97 : f32 to vector<8x128xf32>
    %352 = arith.addf %351, %350 : vector<8x128xf32>
    %353 = arith.divf %351, %352 : vector<8x128xf32>
    %354 = arith.mulf %345, %291 : vector<8x128xf32>
    %355 = arith.mulf %339, %347 : vector<8x128xf32>
    %356 = arith.addf %354, %355 : vector<8x128xf32>
    %357 = math.tanh %356 : vector<8x128xf32>
    %358 = arith.mulf %353, %357 : vector<8x128xf32>
    %c4_98 = arith.constant 4 : index
    %c0_99 = arith.constant 0 : index
    %c0_100 = arith.constant 0 : index
    %359 = vector.load %arg10[%c4_98, %c0_99, %c0_100] : memref<8x8x128xf32, #tpu.memory_space<vmem>>, vector<1x8x128xf32>
    %360 = vector.shape_cast %359 : vector<1x8x128xf32> to vector<8x128xf32>
    %361 = vector.shape_cast %358 : vector<8x128xf32> to vector<1x8x128xf32>
    tpu.vector_store %arg10[%c4_98, %c0_99, %c0_100], %361 {strides = array<i32>} : memref<8x8x128xf32, #tpu.memory_space<vmem>>, vector<1x8x128xf32>,
    %c6 = arith.constant 6 : index
    %c0_101 = arith.constant 0 : index
    %c0_102 = arith.constant 0 : index
    %362 = vector.load %arg9[%c6, %c0_101, %c0_102] : memref<8x8x512xf32, #tpu.memory_space<vmem>>, vector<1x8x512xf32>
    %363 = vector.shape_cast %362 : vector<1x8x512xf32> to vector<8x512xf32>
    %364 = arith.truncf %327 : vector<8x128xf32> to vector<8x128xbf16>
    %c0_103 = arith.constant 0 : index
    %c0_104 = arith.constant 0 : index
    %365 = vector.load %arg2[%c0_103, %c0_104] : memref<128x512xbf16, #tpu.memory_space<vmem>>, vector<128x512xbf16>
    %cst_105 = arith.constant dense<0.000000e+00> : vector<8x512xf32>
    %366 = tpu.matmul %364, %365, %cst_105 {dimension_numbers = #tpu.dot_dimension_numbers<[1], [0], [0], [1], [0, 0, 1, 1], [], []>} : vector<8x128xbf16>, vector<128x512xbf16>, vector<8x512xf32> -> vector<8x512xf32>
    %367 = arith.addf %363, %366 : vector<8x512xf32>
    %368 = vector.extract_strided_slice %367 {offsets = [0, 0], sizes = [8, 128], strides = [1, 1]} : vector<8x512xf32> to vector<8x128xf32>
    %369 = arith.negf %368 : vector<8x128xf32>
    %370 = math.exp %369 : vector<8x128xf32>
    %cst_106 = arith.constant 1.000000e+00 : f32
    %371 = vector.broadcast %cst_106 : f32 to vector<8x128xf32>
    %372 = arith.addf %371, %370 : vector<8x128xf32>
    %373 = arith.divf %371, %372 : vector<8x128xf32>
    %374 = vector.extract_strided_slice %367 {offsets = [0, 128], sizes = [8, 128], strides = [1, 1]} : vector<8x512xf32> to vector<8x128xf32>
    %375 = arith.negf %374 : vector<8x128xf32>
    %376 = math.exp %375 : vector<8x128xf32>
    %cst_107 = arith.constant 1.000000e+00 : f32
    %377 = vector.broadcast %cst_107 : f32 to vector<8x128xf32>
    %378 = arith.addf %377, %376 : vector<8x128xf32>
    %379 = arith.divf %377, %378 : vector<8x128xf32>
    %380 = vector.extract_strided_slice %367 {offsets = [0, 256], sizes = [8, 128], strides = [1, 1]} : vector<8x512xf32> to vector<8x128xf32>
    %381 = math.tanh %380 : vector<8x128xf32>
    %382 = vector.extract_strided_slice %367 {offsets = [0, 384], sizes = [8, 128], strides = [1, 1]} : vector<8x512xf32> to vector<8x128xf32>
    %383 = arith.negf %382 : vector<8x128xf32>
    %384 = math.exp %383 : vector<8x128xf32>
    %cst_108 = arith.constant 1.000000e+00 : f32
    %385 = vector.broadcast %cst_108 : f32 to vector<8x128xf32>
    %386 = arith.addf %385, %384 : vector<8x128xf32>
    %387 = arith.divf %385, %386 : vector<8x128xf32>
    %388 = arith.mulf %379, %325 : vector<8x128xf32>
    %389 = arith.mulf %373, %381 : vector<8x128xf32>
    %390 = arith.addf %388, %389 : vector<8x128xf32>
    %391 = math.tanh %390 : vector<8x128xf32>
    %392 = arith.mulf %387, %391 : vector<8x128xf32>
    %393 = tpu.concatenate %327, %358 in 1 : vector<8x128xf32>, vector<8x128xf32> -> vector<8x256xf32>
    %394 = arith.truncf %393 : vector<8x256xf32> to vector<8x256xbf16>
    %c0_109 = arith.constant 0 : index
    %c0_110 = arith.constant 0 : index
    %395 = vector.load %arg3[%c0_109, %c0_110] : memref<256x512xbf16, #tpu.memory_space<vmem>>, vector<256x512xbf16>
    %cst_111 = arith.constant dense<0.000000e+00> : vector<8x512xf32>
    %396 = tpu.matmul %394, %395, %cst_111 {dimension_numbers = #tpu.dot_dimension_numbers<[1], [0], [0], [1], [0, 0, 1, 1], [], []>} : vector<8x256xbf16>, vector<256x512xbf16>, vector<8x512xf32> -> vector<8x512xf32>
    %397 = vector.broadcast %9 : vector<1x512xf32> to vector<8x512xf32>
    %398 = arith.addf %396, %397 : vector<8x512xf32>
    %399 = vector.extract_strided_slice %398 {offsets = [0, 0], sizes = [8, 128], strides = [1, 1]} : vector<8x512xf32> to vector<8x128xf32>
    %400 = arith.negf %399 : vector<8x128xf32>
    %401 = math.exp %400 : vector<8x128xf32>
    %cst_112 = arith.constant 1.000000e+00 : f32
    %402 = vector.broadcast %cst_112 : f32 to vector<8x128xf32>
    %403 = arith.addf %402, %401 : vector<8x128xf32>
    %404 = arith.divf %402, %403 : vector<8x128xf32>
    %405 = vector.extract_strided_slice %398 {offsets = [0, 128], sizes = [8, 128], strides = [1, 1]} : vector<8x512xf32> to vector<8x128xf32>
    %406 = arith.negf %405 : vector<8x128xf32>
    %407 = math.exp %406 : vector<8x128xf32>
    %cst_113 = arith.constant 1.000000e+00 : f32
    %408 = vector.broadcast %cst_113 : f32 to vector<8x128xf32>
    %409 = arith.addf %408, %407 : vector<8x128xf32>
    %410 = arith.divf %408, %409 : vector<8x128xf32>
    %411 = vector.extract_strided_slice %398 {offsets = [0, 256], sizes = [8, 128], strides = [1, 1]} : vector<8x512xf32> to vector<8x128xf32>
    %412 = math.tanh %411 : vector<8x128xf32>
    %413 = vector.extract_strided_slice %398 {offsets = [0, 384], sizes = [8, 128], strides = [1, 1]} : vector<8x512xf32> to vector<8x128xf32>
    %414 = arith.negf %413 : vector<8x128xf32>
    %415 = math.exp %414 : vector<8x128xf32>
    %cst_114 = arith.constant 1.000000e+00 : f32
    %416 = vector.broadcast %cst_114 : f32 to vector<8x128xf32>
    %417 = arith.addf %416, %415 : vector<8x128xf32>
    %418 = arith.divf %416, %417 : vector<8x128xf32>
    %419 = arith.mulf %410, %356 : vector<8x128xf32>
    %420 = arith.mulf %404, %412 : vector<8x128xf32>
    %421 = arith.addf %419, %420 : vector<8x128xf32>
    %422 = math.tanh %421 : vector<8x128xf32>
    %423 = arith.mulf %418, %422 : vector<8x128xf32>
    %c5_115 = arith.constant 5 : index
    %c0_116 = arith.constant 0 : index
    %c0_117 = arith.constant 0 : index
    %424 = vector.load %arg10[%c5_115, %c0_116, %c0_117] : memref<8x8x128xf32, #tpu.memory_space<vmem>>, vector<1x8x128xf32>
    %425 = vector.shape_cast %424 : vector<1x8x128xf32> to vector<8x128xf32>
    %426 = vector.shape_cast %423 : vector<8x128xf32> to vector<1x8x128xf32>
    tpu.vector_store %arg10[%c5_115, %c0_116, %c0_117], %426 {strides = array<i32>} : memref<8x8x128xf32, #tpu.memory_space<vmem>>, vector<1x8x128xf32>,
    %c7 = arith.constant 7 : index
    %c0_118 = arith.constant 0 : index
    %c0_119 = arith.constant 0 : index
    %427 = vector.load %arg9[%c7, %c0_118, %c0_119] : memref<8x8x512xf32, #tpu.memory_space<vmem>>, vector<1x8x512xf32>
    %428 = vector.shape_cast %427 : vector<1x8x512xf32> to vector<8x512xf32>
    %429 = arith.truncf %392 : vector<8x128xf32> to vector<8x128xbf16>
    %c0_120 = arith.constant 0 : index
    %c0_121 = arith.constant 0 : index
    %430 = vector.load %arg2[%c0_120, %c0_121] : memref<128x512xbf16, #tpu.memory_space<vmem>>, vector<128x512xbf16>
    %cst_122 = arith.constant dense<0.000000e+00> : vector<8x512xf32>
    %431 = tpu.matmul %429, %430, %cst_122 {dimension_numbers = #tpu.dot_dimension_numbers<[1], [0], [0], [1], [0, 0, 1, 1], [], []>} : vector<8x128xbf16>, vector<128x512xbf16>, vector<8x512xf32> -> vector<8x512xf32>
    %432 = arith.addf %428, %431 : vector<8x512xf32>
    %433 = vector.extract_strided_slice %432 {offsets = [0, 0], sizes = [8, 128], strides = [1, 1]} : vector<8x512xf32> to vector<8x128xf32>
    %434 = arith.negf %433 : vector<8x128xf32>
    %435 = math.exp %434 : vector<8x128xf32>
    %cst_123 = arith.constant 1.000000e+00 : f32
    %436 = vector.broadcast %cst_123 : f32 to vector<8x128xf32>
    %437 = arith.addf %436, %435 : vector<8x128xf32>
    %438 = arith.divf %436, %437 : vector<8x128xf32>
    %439 = vector.extract_strided_slice %432 {offsets = [0, 128], sizes = [8, 128], strides = [1, 1]} : vector<8x512xf32> to vector<8x128xf32>
    %440 = arith.negf %439 : vector<8x128xf32>
    %441 = math.exp %440 : vector<8x128xf32>
    %cst_124 = arith.constant 1.000000e+00 : f32
    %442 = vector.broadcast %cst_124 : f32 to vector<8x128xf32>
    %443 = arith.addf %442, %441 : vector<8x128xf32>
    %444 = arith.divf %442, %443 : vector<8x128xf32>
    %445 = vector.extract_strided_slice %432 {offsets = [0, 256], sizes = [8, 128], strides = [1, 1]} : vector<8x512xf32> to vector<8x128xf32>
    %446 = math.tanh %445 : vector<8x128xf32>
    %447 = vector.extract_strided_slice %432 {offsets = [0, 384], sizes = [8, 128], strides = [1, 1]} : vector<8x512xf32> to vector<8x128xf32>
    %448 = arith.negf %447 : vector<8x128xf32>
    %449 = math.exp %448 : vector<8x128xf32>
    %cst_125 = arith.constant 1.000000e+00 : f32
    %450 = vector.broadcast %cst_125 : f32 to vector<8x128xf32>
    %451 = arith.addf %450, %449 : vector<8x128xf32>
    %452 = arith.divf %450, %451 : vector<8x128xf32>
    %453 = arith.mulf %444, %390 : vector<8x128xf32>
    %454 = arith.mulf %438, %446 : vector<8x128xf32>
    %455 = arith.addf %453, %454 : vector<8x128xf32>
    %456 = math.tanh %455 : vector<8x128xf32>
    %457 = arith.mulf %452, %456 : vector<8x128xf32>
    %458 = tpu.concatenate %392, %423 in 1 : vector<8x128xf32>, vector<8x128xf32> -> vector<8x256xf32>
    %459 = arith.truncf %458 : vector<8x256xf32> to vector<8x256xbf16>
    %c0_126 = arith.constant 0 : index
    %c0_127 = arith.constant 0 : index
    %460 = vector.load %arg3[%c0_126, %c0_127] : memref<256x512xbf16, #tpu.memory_space<vmem>>, vector<256x512xbf16>
    %cst_128 = arith.constant dense<0.000000e+00> : vector<8x512xf32>
    %461 = tpu.matmul %459, %460, %cst_128 {dimension_numbers = #tpu.dot_dimension_numbers<[1], [0], [0], [1], [0, 0, 1, 1], [], []>} : vector<8x256xbf16>, vector<256x512xbf16>, vector<8x512xf32> -> vector<8x512xf32>
    %462 = vector.broadcast %9 : vector<1x512xf32> to vector<8x512xf32>
    %463 = arith.addf %461, %462 : vector<8x512xf32>
    %464 = vector.extract_strided_slice %463 {offsets = [0, 0], sizes = [8, 128], strides = [1, 1]} : vector<8x512xf32> to vector<8x128xf32>
    %465 = arith.negf %464 : vector<8x128xf32>
    %466 = math.exp %465 : vector<8x128xf32>
    %cst_129 = arith.constant 1.000000e+00 : f32
    %467 = vector.broadcast %cst_129 : f32 to vector<8x128xf32>
    %468 = arith.addf %467, %466 : vector<8x128xf32>
    %469 = arith.divf %467, %468 : vector<8x128xf32>
    %470 = vector.extract_strided_slice %463 {offsets = [0, 128], sizes = [8, 128], strides = [1, 1]} : vector<8x512xf32> to vector<8x128xf32>
    %471 = arith.negf %470 : vector<8x128xf32>
    %472 = math.exp %471 : vector<8x128xf32>
    %cst_130 = arith.constant 1.000000e+00 : f32
    %473 = vector.broadcast %cst_130 : f32 to vector<8x128xf32>
    %474 = arith.addf %473, %472 : vector<8x128xf32>
    %475 = arith.divf %473, %474 : vector<8x128xf32>
    %476 = vector.extract_strided_slice %463 {offsets = [0, 256], sizes = [8, 128], strides = [1, 1]} : vector<8x512xf32> to vector<8x128xf32>
    %477 = math.tanh %476 : vector<8x128xf32>
    %478 = vector.extract_strided_slice %463 {offsets = [0, 384], sizes = [8, 128], strides = [1, 1]} : vector<8x512xf32> to vector<8x128xf32>
    %479 = arith.negf %478 : vector<8x128xf32>
    %480 = math.exp %479 : vector<8x128xf32>
    %cst_131 = arith.constant 1.000000e+00 : f32
    %481 = vector.broadcast %cst_131 : f32 to vector<8x128xf32>
    %482 = arith.addf %481, %480 : vector<8x128xf32>
    %483 = arith.divf %481, %482 : vector<8x128xf32>
    %484 = arith.mulf %475, %421 : vector<8x128xf32>
    %485 = arith.mulf %469, %477 : vector<8x128xf32>
    %486 = arith.addf %484, %485 : vector<8x128xf32>
    %487 = math.tanh %486 : vector<8x128xf32>
    %488 = arith.mulf %483, %487 : vector<8x128xf32>
    %c6_132 = arith.constant 6 : index
    %c0_133 = arith.constant 0 : index
    %c0_134 = arith.constant 0 : index
    %489 = vector.load %arg10[%c6_132, %c0_133, %c0_134] : memref<8x8x128xf32, #tpu.memory_space<vmem>>, vector<1x8x128xf32>
    %490 = vector.shape_cast %489 : vector<1x8x128xf32> to vector<8x128xf32>
    %491 = vector.shape_cast %488 : vector<8x128xf32> to vector<1x8x128xf32>
    tpu.vector_store %arg10[%c6_132, %c0_133, %c0_134], %491 {strides = array<i32>} : memref<8x8x128xf32, #tpu.memory_space<vmem>>, vector<1x8x128xf32>,
    %492 = tpu.concatenate %457, %488 in 1 : vector<8x128xf32>, vector<8x128xf32> -> vector<8x256xf32>
    %493 = arith.truncf %492 : vector<8x256xf32> to vector<8x256xbf16>
    %c0_135 = arith.constant 0 : index
    %c0_136 = arith.constant 0 : index
    %494 = vector.load %arg3[%c0_135, %c0_136] : memref<256x512xbf16, #tpu.memory_space<vmem>>, vector<256x512xbf16>
    %cst_137 = arith.constant dense<0.000000e+00> : vector<8x512xf32>
    %495 = tpu.matmul %493, %494, %cst_137 {dimension_numbers = #tpu.dot_dimension_numbers<[1], [0], [0], [1], [0, 0, 1, 1], [], []>} : vector<8x256xbf16>, vector<256x512xbf16>, vector<8x512xf32> -> vector<8x512xf32>
    %496 = vector.broadcast %9 : vector<1x512xf32> to vector<8x512xf32>
    %497 = arith.addf %495, %496 : vector<8x512xf32>
    %498 = vector.extract_strided_slice %497 {offsets = [0, 0], sizes = [8, 128], strides = [1, 1]} : vector<8x512xf32> to vector<8x128xf32>
    %499 = arith.negf %498 : vector<8x128xf32>
    %500 = math.exp %499 : vector<8x128xf32>
    %cst_138 = arith.constant 1.000000e+00 : f32
    %501 = vector.broadcast %cst_138 : f32 to vector<8x128xf32>
    %502 = arith.addf %501, %500 : vector<8x128xf32>
    %503 = arith.divf %501, %502 : vector<8x128xf32>
    %504 = vector.extract_strided_slice %497 {offsets = [0, 128], sizes = [8, 128], strides = [1, 1]} : vector<8x512xf32> to vector<8x128xf32>
    %505 = arith.negf %504 : vector<8x128xf32>
    %506 = math.exp %505 : vector<8x128xf32>
    %cst_139 = arith.constant 1.000000e+00 : f32
    %507 = vector.broadcast %cst_139 : f32 to vector<8x128xf32>
    %508 = arith.addf %507, %506 : vector<8x128xf32>
    %509 = arith.divf %507, %508 : vector<8x128xf32>
    %510 = vector.extract_strided_slice %497 {offsets = [0, 256], sizes = [8, 128], strides = [1, 1]} : vector<8x512xf32> to vector<8x128xf32>
    %511 = math.tanh %510 : vector<8x128xf32>
    %512 = vector.extract_strided_slice %497 {offsets = [0, 384], sizes = [8, 128], strides = [1, 1]} : vector<8x512xf32> to vector<8x128xf32>
    %513 = arith.negf %512 : vector<8x128xf32>
    %514 = math.exp %513 : vector<8x128xf32>
    %cst_140 = arith.constant 1.000000e+00 : f32
    %515 = vector.broadcast %cst_140 : f32 to vector<8x128xf32>
    %516 = arith.addf %515, %514 : vector<8x128xf32>
    %517 = arith.divf %515, %516 : vector<8x128xf32>
    %518 = arith.mulf %509, %486 : vector<8x128xf32>
    %519 = arith.mulf %503, %511 : vector<8x128xf32>
    %520 = arith.addf %518, %519 : vector<8x128xf32>
    %521 = math.tanh %520 : vector<8x128xf32>
    %522 = arith.mulf %517, %521 : vector<8x128xf32>
    %c7_141 = arith.constant 7 : index
    %c0_142 = arith.constant 0 : index
    %c0_143 = arith.constant 0 : index
    %523 = vector.load %arg10[%c7_141, %c0_142, %c0_143] : memref<8x8x128xf32, #tpu.memory_space<vmem>>, vector<1x8x128xf32>
    %524 = vector.shape_cast %523 : vector<1x8x128xf32> to vector<8x128xf32>
    %525 = vector.shape_cast %522 : vector<8x128xf32> to vector<1x8x128xf32>
    tpu.vector_store %arg10[%c7_141, %c0_142, %c0_143], %525 {strides = array<i32>} : memref<8x8x128xf32, #tpu.memory_space<vmem>>, vector<1x8x128xf32>,
    %c0_144 = arith.constant 0 : index
    %c0_145 = arith.constant 0 : index
    %c0_146 = arith.constant 0 : index
    %526 = vector.load %arg10[%c0_144, %c0_145, %c0_146] : memref<8x8x128xf32, #tpu.memory_space<vmem>>, vector<8x8x128xf32>
    %527 = vector.shape_cast %526 : vector<8x8x128xf32> to vector<64x128xf32>
    %528 = arith.truncf %527 : vector<64x128xf32> to vector<64x128xbf16>
    %c0_147 = arith.constant 0 : index
    %c0_148 = arith.constant 0 : index
    %529 = vector.load %arg4[%c0_147, %c0_148] : memref<128x128xbf16, #tpu.memory_space<vmem>>, vector<128x128xbf16>
    %cst_149 = arith.constant dense<0.000000e+00> : vector<64x128xf32>
    %530 = tpu.matmul %528, %529, %cst_149 {dimension_numbers = #tpu.dot_dimension_numbers<[1], [0], [0], [1], [0, 0, 1, 1], [], []>} : vector<64x128xbf16>, vector<128x128xbf16>, vector<64x128xf32> -> vector<64x128xf32>
    %c0_150 = arith.constant 0 : index
    %c1024 = arith.constant 1024 : index
    %531 = vector.load %arg7[%c0_150, %c1024] : memref<1x1920xf32, #tpu.memory_space<vmem>>, vector<1x128xf32>
    %532 = vector.broadcast %531 : vector<1x128xf32> to vector<64x128xf32>
    %533 = arith.addf %530, %532 : vector<64x128xf32>
    %534 = math.tanh %533 : vector<64x128xf32>
    %c0_151 = arith.constant 0 : index
    %c1152 = arith.constant 1152 : index
    %535 = vector.load %arg7[%c0_151, %c1152] : memref<1x1920xf32, #tpu.memory_space<vmem>>, vector<1x128xf32>
    %536 = vector.broadcast %535 : vector<1x128xf32> to vector<64x128xf32>
    %537 = arith.mulf %534, %536 : vector<64x128xf32>
    %cst_152 = arith.constant dense<0.000000e+00> : vector<64xf32>
    %538 = vector.multi_reduction <add>, %537, %cst_152 [1] : vector<64x128xf32> to vector<64xf32>
    %539 = vector.shape_cast %538 : vector<64xf32> to vector<64x1xf32>
    %c0_153 = arith.constant 0 : index
    %c1664 = arith.constant 1664 : index
    %540 = vector.load %arg7[%c0_153, %c1664] : memref<1x1920xf32, #tpu.memory_space<vmem>>, vector<1x1xf32>
    %541 = vector.broadcast %540 : vector<1x1xf32> to vector<64x1xf32>
    %542 = arith.addf %539, %541 : vector<64x1xf32>
    %543 = vector.shape_cast %542 : vector<64x1xf32> to vector<8x8x1xf32>
    %cst_154 = arith.constant dense<0xFF800000> : vector<8x1xf32>
    %544 = vector.multi_reduction <maximumf>, %543, %cst_154 [0] : vector<8x8x1xf32> to vector<8x1xf32>
    %545 = vector.shape_cast %544 : vector<8x1xf32> to vector<1x8x1xf32>
    %546 = vector.broadcast %545 : vector<1x8x1xf32> to vector<8x8x1xf32>
    %547 = arith.subf %543, %546 : vector<8x8x1xf32>
    %548 = math.exp %547 : vector<8x8x1xf32>
    %cst_155 = arith.constant dense<0.000000e+00> : vector<8x1xf32>
    %549 = vector.multi_reduction <add>, %548, %cst_155 [0] : vector<8x8x1xf32> to vector<8x1xf32>
    %550 = vector.shape_cast %549 : vector<8x1xf32> to vector<1x8x1xf32>
    %551 = tpu.reciprocal %550 {approx = true} : vector<1x8x1xf32> -> vector<1x8x1xf32>
    %552 = vector.broadcast %551 : vector<1x8x1xf32> to vector<8x8x1xf32>
    %553 = arith.mulf %548, %552 : vector<8x8x1xf32>
    %554 = vector.broadcast %553 : vector<8x8x1xf32> to vector<8x8x128xf32>
    %555 = arith.mulf %554, %526 : vector<8x8x128xf32>
    %cst_156 = arith.constant dense<0.000000e+00> : vector<8x128xf32>
    %556 = vector.multi_reduction <add>, %555, %cst_156 [0] : vector<8x8x128xf32> to vector<8x128xf32>
    %557 = arith.truncf %556 : vector<8x128xf32> to vector<8x128xbf16>
    %c0_157 = arith.constant 0 : index
    %c0_158 = arith.constant 0 : index
    %558 = vector.load %arg5[%c0_157, %c0_158] : memref<128x128xbf16, #tpu.memory_space<vmem>>, vector<128x128xbf16>
    %cst_159 = arith.constant dense<0.000000e+00> : vector<8x128xf32>
    %559 = tpu.matmul %557, %558, %cst_159 {dimension_numbers = #tpu.dot_dimension_numbers<[1], [0], [0], [1], [0, 0, 1, 1], [], []>} : vector<8x128xbf16>, vector<128x128xbf16>, vector<8x128xf32> -> vector<8x128xf32>
    %c0_160 = arith.constant 0 : index
    %c1280 = arith.constant 1280 : index
    %560 = vector.load %arg7[%c0_160, %c1280] : memref<1x1920xf32, #tpu.memory_space<vmem>>, vector<1x128xf32>
    %561 = vector.broadcast %560 : vector<1x128xf32> to vector<8x128xf32>
    %562 = arith.addf %559, %561 : vector<8x128xf32>
    %cst_161 = arith.constant 0.000000e+00 : f32
    %563 = vector.broadcast %cst_161 : f32 to vector<8x128xf32>
    %564 = arith.maximumf %562, %563 : vector<8x128xf32>
    %565 = arith.truncf %564 : vector<8x128xf32> to vector<8x128xbf16>
    %c0_162 = arith.constant 0 : index
    %c0_163 = arith.constant 0 : index
    %566 = vector.load %arg6[%c0_162, %c0_163] : memref<128x64xbf16, #tpu.memory_space<vmem>>, vector<128x64xbf16>
    %cst_164 = arith.constant dense<0.000000e+00> : vector<8x64xf32>
    %567 = tpu.matmul %565, %566, %cst_164 {dimension_numbers = #tpu.dot_dimension_numbers<[1], [0], [0], [1], [0, 0, 1, 1], [], []>} : vector<8x128xbf16>, vector<128x64xbf16>, vector<8x64xf32> -> vector<8x64xf32>
    %c0_165 = arith.constant 0 : index
    %c1408 = arith.constant 1408 : index
    %568 = vector.load %arg7[%c0_165, %c1408] : memref<1x1920xf32, #tpu.memory_space<vmem>>, vector<1x64xf32>
    %569 = vector.broadcast %568 : vector<1x64xf32> to vector<8x64xf32>
    %570 = arith.addf %567, %569 : vector<8x64xf32>
    %cst_166 = arith.constant 0.000000e+00 : f32
    %571 = vector.broadcast %cst_166 : f32 to vector<8x64xf32>
    %572 = arith.maximumf %570, %571 : vector<8x64xf32>
    %c0_167 = arith.constant 0 : index
    %c1536 = arith.constant 1536 : index
    %573 = vector.load %arg7[%c0_167, %c1536] : memref<1x1920xf32, #tpu.memory_space<vmem>>, vector<1x64xf32>
    %574 = vector.broadcast %573 : vector<1x64xf32> to vector<8x64xf32>
    %575 = arith.mulf %572, %574 : vector<8x64xf32>
    %cst_168 = arith.constant dense<0.000000e+00> : vector<8xf32>
    %576 = vector.multi_reduction <add>, %575, %cst_168 [1] : vector<8x64xf32> to vector<8xf32>
    %577 = vector.shape_cast %576 : vector<8xf32> to vector<8x1xf32>
    %c0_169 = arith.constant 0 : index
    %c1792 = arith.constant 1792 : index
    %578 = vector.load %arg7[%c0_169, %c1792] : memref<1x1920xf32, #tpu.memory_space<vmem>>, vector<1x1xf32>
    %579 = vector.broadcast %578 : vector<1x1xf32> to vector<8x1xf32>
    %580 = arith.addf %577, %579 : vector<8x1xf32>
    %581 = arith.negf %580 : vector<8x1xf32>
    %582 = math.exp %581 : vector<8x1xf32>
    %cst_170 = arith.constant 1.000000e+00 : f32
    %583 = vector.broadcast %cst_170 : f32 to vector<8x1xf32>
    %584 = arith.addf %583, %582 : vector<8x1xf32>
    %585 = arith.divf %583, %584 : vector<8x1xf32>
    %c0_171 = arith.constant 0 : index
    %c0_172 = arith.constant 0 : index
    %586 = vector.load %arg8[%c0_171, %c0_172] : memref<8x1xf32, #tpu.memory_space<vmem>>, vector<8x1xf32>
    tpu.vector_store %arg8[%c0_171, %c0_172], %585 {strides = array<i32>} : memref<8x1xf32, #tpu.memory_space<vmem>>, vector<8x1xf32>,
    return
  }
}

</mosaic_0001>

<bundles_post_ra>
// kernel: tpu_custom_call.1
= control target key start
LH: loop header
LB: loop body
LE: loop exit
PB: predicated region body
PF: predicated region fallthrough
CT: control target
= control target key end

     0   :  { %13 = vsyncpa [#allocation5], 0  ;;  %s10655_s0 = inlined_call_operand.vmem [shape: f32[64,9], index: 0, kind: input, shape index: {}]   ;;  %s10656_s1 = inlined_call_operand.hbm [shape: bf16[9,512], index: 1, kind: input, shape index: {}]   ;;  %s10657_s2 = inlined_call_operand.hbm [shape: bf16[128,512], index: 2, kind: input, shape index: {}]   ;;  %s10658_s3 = inlined_call_operand.hbm [shape: bf16[256,512], index: 3, kind: input, shape index: {}]   ;;  %s10659_s4 = inlined_call_operand.vmem [shape: bf16[128,128], index: 4, kind: input, shape index: {}]   ;;  %s10660_s5 = inlined_call_operand.vmem [shape: bf16[128,128], index: 5, kind: input, shape index: {}]   ;;  %s10661_s6 = inlined_call_operand.vmem [shape: bf16[128,64], index: 6, kind: input, shape index: {}]   ;;  %s10662_s7 = inlined_call_operand.vmem [shape: f32[1,1920], index: 7, kind: input, shape index: {}]   ;;  %s10663_s8 = inlined_call_operand.vmem [shape: f32[8,1], index: 8, kind: output, shape index: {}]  }
   0x1   :  { %14 = vsyncpa [#allocation7], 0  ;;  %s8740_s27 = smov [#allocation6]   ;;  %s8741_s29 = smov [#allocation4]  }
   0x2   :  { %s34_s28 = sshll.u32 %s8740_s27, 4  ;;  %s22_s30 = sshll.u32 %s8741_s29, 4  ;;  %s35_s28 = int_to_ptr.vmem [resolvable:$true] %s34_s28  ;;  %s8794_s30 = int_to_ptr.vmem [resolvable:$true] %s22_s30 }
   0x3   :  { %s8670_s11 = scalar_lea.hbm %s10657_s2, 4096 }
   0x4   :  { %p8671_p0 = scmp.ne.s32.totalorder %s10657_s2, %s8670_s11  ;;  %p8674_p1 = scmp.lt.u32.totalorder %s8670_s11, %s10657_s2 }
   0x6   :  { %p8676_p2 = pnand %p8674_p1, %p8671_p0 }
   0x8   :  { %8679 = shalt.err (!%p8676_p2)
}
   0x9   :  { %s8680_s16 = scalar_lea.vmem %s35_s28, 4096  ;;  %p8685_p4 = scmp.lt.s32.totalorder %s35_s28, %s35_s28 }
   0xa   :  { %p8681_p3 = scmp.ne.s32.totalorder %s35_s28, %s8680_s16  ;;  %p8686_p5 = scmp.lt.s32.totalorder %s8680_s16, %s8680_s16 }
   0xc   :  { %p8687_p6 = por %p8686_p5, %p8685_p4 }
   0xe   :  { %p8688_p7 = pnand %p8687_p6, %p8681_p3 }
  0x10   :  { %8691 = shalt.err (!%p8688_p7)
}
  0x11   :  { %s8742_s17 = smov 256   ;;  %s8743_s18 = smov 16  }
  0x12   :  { %40 = dma.hbm_to_vmem [thread:$0]  %s10657_s2, 4096, %s35_s28, [#allocation7], %s8742_s17, %s8742_s17, %s8743_s18  }
  0x13   :  { %s8692_s23 = scalar_lea.hbm %s10656_s1, 512 }
  0x14   :  { %p8693_p8 = scmp.ne.s32.totalorder %s10656_s1, %s8692_s23  ;;  %p8696_p9 = scmp.lt.u32.totalorder %s8692_s23, %s10656_s1 }
  0x16   :  { %p8698_p10 = pnand %p8696_p9, %p8693_p8 }
  0x18   :  { %8701 = shalt.err (!%p8698_p10)
}
  0x19   :  { %s8702_s29 = scalar_lea.vmem %s8794_s30, 512  ;;  %p8707_p12 = scmp.lt.s32.totalorder %s8794_s30, %s8794_s30 }
  0x1a   :  { %p8703_p11 = scmp.ne.s32.totalorder %s8794_s30, %s8702_s29  ;;  %p8708_p13 = scmp.lt.s32.totalorder %s8702_s29, %s8702_s29 }
  0x1c   :  { %p8709_p0 = por %p8708_p13, %p8707_p12 }
  0x1e   :  { %p8710_p1 = pnand %p8709_p0, %p8703_p11 }
  0x20   :  { %8713 = shalt.err (!%p8710_p1)
}
  0x21   :  { %28 = dma.hbm_to_vmem [thread:$0]  %s10656_s1, 512, %s8794_s30, [#allocation5], %s8742_s17, %s8742_s17, %s8743_s18  }
  0x22   :  { %s8744_s9 = smov [#allocation8]   ;;  %s8714_s13 = scalar_lea.hbm %s10658_s3, 8192 }
  0x23   :  { %s46_s10 = sshll.u32 %s8744_s9, 4  ;;  %p8715_p2 = scmp.ne.s32.totalorder %s10658_s3, %s8714_s13  ;;  %s47_s10 = int_to_ptr.vmem [resolvable:$true] %s46_s10 }
  0x24   :  { %p8718_p3 = scmp.lt.u32.totalorder %s8714_s13, %s10658_s3 }
  0x26   :  { %p8720_p4 = pnand %p8718_p3, %p8715_p2 }
  0x28   :  { %8723 = shalt.err (!%p8720_p4)
}
  0x29   :  { %s8724_s20 = scalar_lea.vmem %s47_s10, 8192  ;;  %p8729_p6 = scmp.lt.s32.totalorder %s47_s10, %s47_s10 }
  0x2a   :  { %p8725_p5 = scmp.ne.s32.totalorder %s47_s10, %s8724_s20  ;;  %p8730_p7 = scmp.lt.s32.totalorder %s8724_s20, %s8724_s20 }
  0x2c   :  { %p8731_p8 = por %p8730_p7, %p8729_p6 }
  0x2e   :  { %p8732_p9 = pnand %p8731_p8, %p8725_p5 }
  0x30   :  { %8735 = shalt.err (!%p8732_p9)
}
  0x31   :  { %52 = dma.hbm_to_vmem [thread:$0]  %s10658_s3, 8192, %s47_s10, [#allocation7], %s8742_s17, %s8742_s17, %s8743_s18  }
  0x32   :  { %8736 = dma.done.wait [#allocation5], 512  }
  0x33   :  { %8737 = vsyncadd [#allocation5], 4294966784 }
  0x34   :  { %8738 = dma.done.wait [#allocation7], 12288  }
  0x35   :  { %8739 = vsyncadd [#allocation7], 4294955008  ;;  %vm138_vm0 = vcmask 1043456   ;;  %v10668_v0 = vmov 0   ;;  %vm139_vm1 = vcmask 1044480   ;;  %v8746_v1 = vmov 65535  }
  0x36   :  { %186 = vmatprep.mubr.bf16.mxu0 %v10668_v0  ;;  %259 = vmatprep.mubr.bf16.mxu1 %v10668_v0  ;;  %v140_v2 = vsel %vm138_vm0, 4294967295, %v8746_v1  ;;  %v7770_v4 = vld [vmem:[#allocation4 + $0x4] ss:$16 sps:$4 sm:$0x1f]   ;;  %v72_v7 = vld [vmem:[%s10655_s0 + $0x8] sm:$0xff]  ;;  %vm125_vm2 = vcmask 72704   ;;  %v89_v58 = vlaneseq }
  0x37   :  { %7769 = vset.pattern.permute.xlu1 %v10668_v0  ;;  %7768 = vset.pattern.permute.xlu0 %v10668_v0  ;;  %v141_v3 = vsel %vm139_vm1, %v140_v2, 0  ;;  %v7772_v5 = vld [vmem:[#allocation4] ss:$16 sps:$4 sm:$0x1f]   ;;  %v8860_v15 = vld [vmem:[#allocation6 + $0x4] ss:$16 sps:$4 sm:$0xff]  }
  0x38   :  { %v71_v6 = vld [vmem:[%s10655_s0] sm:$0xff]  ;;  %v146_v8 = vand.u32 %v7770_v4, %v141_v3  ;;  %v7773_v9 = vld [vmem:[#allocation4 + $0xc] ss:$16 sps:$4 sm:$0x1f]   ;;  %v143_v10 = vand.u32 %v7772_v5, %v141_v3  ;;  %v8866_v18 = vld [vmem:[#allocation6 + $0x8] ss:$16 sps:$4 sm:$0xff]  }
  0x39   :  { %v7775_v11 = vld [vmem:[#allocation4 + $0x8] ss:$16 sps:$4 sm:$0x1f]   ;;  %v79_v12 = vpack.c.bf16 %v72_v7, %v71_v6  ;;  %v152_v13 = vand.u32 %v7773_v9, %v141_v3  ;;  %v8862_v16 = vld [vmem:[#allocation6 + $0xc] ss:$16 sps:$4 sm:$0xff]   ;;  %v73_v23 = vld [vmem:[%s10655_s0 + $0x10] sm:$0xff] }
  0x3a   :  { %154 = vmatprep.subr.bf16.mxu0 %v146_v8  ;;  %v149_v14 = vand.u32 %v7775_v11, %v141_v3  ;;  %v8864_v17 = vld [vmem:[#allocation6] ss:$16 sps:$4 sm:$0xff]   ;;  %v8872_v19 = vld [vmem:[#allocation6 + $0x24] ss:$16 sps:$4 sm:$0xff]   ;;  %v8874_v20 = vld [vmem:[#allocation6 + $0x2c] ss:$16 sps:$4 sm:$0xff]  }
  0x3b   :  { %155 = vmatpush1.bf16.msra.mxu0 %v143_v10  ;;  %227 = vmatprep.subr.bf16.mxu1 %v152_v13  ;;  %v8876_v21 = vld [vmem:[#allocation6 + $0x20] ss:$16 sps:$4 sm:$0xff]   ;;  %v8878_v22 = vld [vmem:[#allocation6 + $0x28] ss:$16 sps:$4 sm:$0xff]   ;;  %v8890_v26 = vld [vmem:[#allocation6 + $0x44] ss:$16 sps:$4 sm:$0xff]  }
  0x3c   :  { %228 = vmatpush1.bf16.msra.mxu1 %v149_v14  ;;  %559 = vmatprep.subr.bf16.mxu0 %v8860_v15  ;;  %v74_v24 = vld [vmem:[%s10655_s0 + $0x18] sm:$0xff]  ;;  %v8895_v28 = vld [vmem:[#allocation6 + $0x40] ss:$16 sps:$4 sm:$0xff]   ;;  %v8904_v30 = vld [vmem:[#allocation6 + $0x64] ss:$16 sps:$4 sm:$0xff]   ;;  %v8992_v59 = vshrl.u32 %v89_v58, 7 }
  0x3d   :  { %600 = vmatprep.subr.bf16.mxu1 %v8862_v16  ;;  %v80_v25 = vpack.c.bf16 %v74_v24, %v73_v23  ;;  %v8892_v27 = vld [vmem:[#allocation6 + $0x4c] ss:$16 sps:$4 sm:$0xff]   ;;  %v8897_v29 = vld [vmem:[#allocation6 + $0x48] ss:$16 sps:$4 sm:$0xff]   ;;  %v8910_v32 = vld [vmem:[#allocation6 + $0x60] ss:$16 sps:$4 sm:$0xff]  }
  0x3e   :  { %6873 = vmatmul.mubr.msk.bf16.vlgmr.msra.gmra.mrb[0].mxu0 %vm125_vm2, %v79_v12  ;;  %v8906_v31 = vld [vmem:[#allocation6 + $0x6c] ss:$16 sps:$4 sm:$0xff]   ;;  %v8912_v33 = vld [vmem:[#allocation6 + $0x68] ss:$16 sps:$4 sm:$0xff]   ;;  %v75_v34 = vld [vmem:[%s10655_s0 + $0x20] sm:$0xff]  ;;  %v10667_v60 = vsub.s32 0, %v8992_v59 }
  0x3f   :  { %196 = vmatprep.mubr.bf16.mxu0 %v10668_v0  ;;  %6877 = vmatmul.mubr.msk.bf16.vlgmr.msra.gmra.mrb[0].mxu1 %vm125_vm2, %v79_v12  ;;  %v76_v35 = vld [vmem:[%s10655_s0 + $0x28] sm:$0xff]  ;;  %v8924_v37 = vld [vmem:[#allocation6 + $0x84] ss:$16 sps:$4 sm:$0xff]   ;;  %v8929_v39 = vld [vmem:[#allocation6 + $0x80] ss:$16 sps:$4 sm:$0xff]   ;;  %v10666_v62 = vsub.s32 1, %v8992_v59 }
  0x40   :  { %269 = vmatprep.mubr.bf16.mxu1 %v10668_v0  ;;  %560 = vmatpush1.bf16.msra.mxu0 %v8864_v17  ;;  %v81_v36 = vpack.c.bf16 %v76_v35, %v75_v34  ;;  %v8926_v38 = vld [vmem:[#allocation6 + $0x8c] ss:$16 sps:$4 sm:$0xff]   ;;  %v8931_v40 = vld [vmem:[#allocation6 + $0x88] ss:$16 sps:$4 sm:$0xff]   ;;  %v8938_v41 = vld [vmem:[#allocation6 + $0xa0] ss:$16 sps:$4 sm:$0xff]  }
  0x41   :  { %601 = vmatpush1.bf16.msra.mxu1 %v8866_v18  ;;  %561 = vmatprep.subr.bf16.mxu0 %v8872_v19  ;;  %v8940_v42 = vld [vmem:[#allocation6 + $0xa4] ss:$16 sps:$4 sm:$0xff]   ;;  %v8942_v43 = vld [vmem:[#allocation6 + $0xa8] ss:$16 sps:$4 sm:$0xff]   ;;  %v8946_v44 = vld [vmem:[#allocation6 + $0xac] ss:$16 sps:$4 sm:$0xff]  }
  0x42   :  { %602 = vmatprep.subr.bf16.mxu1 %v8874_v20  ;;  %v77_v45 = vld [vmem:[%s10655_s0 + $0x30] sm:$0xff]  ;;  %v78_v46 = vld [vmem:[%s10655_s0 + $0x38] sm:$0xff]  ;;  %v87_v61 = vld [vmem:[%s10662_s7] sm:$0xf]  ;;  %v10665_v2 = vsub.s32 3, %v8992_v59  ;;  %v10664_v14 = vsub.s32 2, %v8992_v59 }
  0x43   :  { %v82_v47 = vpack.c.bf16 %v78_v46, %v77_v45  ;;  %v8955_v48 = vld [vmem:[#allocation6 + $0xc4] ss:$16 sps:$4 sm:$0xff]   ;;  %v8959_v49 = vld [vmem:[#allocation6 + $0xc0] ss:$16 sps:$4 sm:$0xff]   ;;  %v8961_v50 = vld [vmem:[#allocation6 + $0xcc] ss:$16 sps:$4 sm:$0xff]   ;;  %v9001_v63 = vrot.slane %v87_v61, %v10667_v60  ;;  %v9005_v1 = vrot.slane %v87_v61, %v10666_v62 }
  0x44   :  { %562 = vmatpush1.bf16.msra.mxu0 %v8876_v21  ;;  %v8965_v51 = vld [vmem:[#allocation6 + $0xc8] ss:$16 sps:$4 sm:$0xff]   ;;  %v8967_v52 = vld [vmem:[#allocation6 + $0xe4] ss:$16 sps:$4 sm:$0xff]   ;;  %v8971_v53 = vld [vmem:[#allocation6 + $0xe0] ss:$16 sps:$4 sm:$0xff]   ;;  %v9016_v11 = vrot.slane %v87_v61, %v10665_v2  ;;  %v9026_v34 = vrot.slane %v87_v61, %v10664_v14 }
  0x45   :  { %603 = vmatpush1.bf16.msra.mxu1 %v8878_v22  ;;  %563 = vmatprep.subr.bf16.mxu0 %v8890_v26  ;;  %v8973_v54 = vld [vmem:[#allocation6 + $0xec] ss:$16 sps:$4 sm:$0xff]   ;;  %v8976_v55 = vld [vmem:[#allocation6 + $0xe8] ss:$16 sps:$4 sm:$0xff]   ;;  %v8979_v56 = vld [vmem:[#allocation8 + $0x4] ss:$16 sps:$4 sm:$0xff]  }
  0x46   :  { %6874 = vmatmul.mubr.msk.bf16.gmra.mrb[4].mxu0 %vm125_vm2, %v80_v25  ;;  %604 = vmatprep.subr.bf16.mxu1 %v8892_v27  ;;  %v8983_v57 = vld [vmem:[#allocation8 + $0xc] ss:$16 sps:$4 sm:$0xff]   ;;  %10819 = vst [vmem:[#allocation11_spill] sm:$0xff] %v9001_v63  ;;  %10820 = vst [vmem:[#allocation12_spill] sm:$0xff] %v9005_v1  ;;  %v9078_v14 = vld [vmem:[#allocation8 + $0x84] ss:$16 sps:$4 sm:$0xff]  }
  0x47   :  { %6878 = vmatmul.mubr.msk.bf16.gmra.mrb[4].mxu1 %vm125_vm2, %v80_v25  ;;  %206 = vmatprep.mubr.bf16.mxu0 %v10668_v0  ;;  %10821 = vst [vmem:[#allocation13_spill] sm:$0xff] %v9016_v11  ;;  %10822 = vst [vmem:[#allocation14_spill] sm:$0xff] %v9026_v34  ;;  %v9080_v2 = vld [vmem:[#allocation8 + $0x8c] ss:$16 sps:$4 sm:$0xff]   ;;  %v9084_v62 = vld [vmem:[#allocation8 + $0x80] ss:$16 sps:$4 sm:$0xff]  }
  0x48   :  { %564 = vmatpush1.bf16.msra.mxu0 %v8895_v28  ;;  %279 = vmatprep.mubr.bf16.mxu1 %v10668_v0  ;;  %10827 = vst [vmem:[#allocation19_spill] sm:$0xff] %v9078_v14  ;;  %10828 = vst [vmem:[#allocation20_spill] sm:$0xff] %v9080_v2  ;;  %v9086_v60 = vld [vmem:[#allocation8 + $0x88] ss:$16 sps:$4 sm:$0xff]   ;;  %vm6491_vm3 = vcmask 7168   ;;  %vm8748_vm4 = vmmov 0  }
  0x49   :  { %605 = vmatpush1.bf16.msra.mxu1 %v8897_v29  ;;  %565 = vmatprep.subr.bf16.mxu0 %v8904_v30  ;;  %10829 = vst [vmem:[#allocation21_spill] sm:$0xff] %v9084_v62  ;;  %10830 = vst [vmem:[#allocation22_spill] sm:$0xff] %v9086_v60  ;;  %vm6844_vm5 = vcmask 523264  }
  0x4a   :  { %606 = vmatprep.subr.bf16.mxu1 %v8906_v31 }
  0x4c   :  { %566 = vmatpush1.bf16.msra.mxu0 %v8910_v32 }
  0x4d   :  { %607 = vmatpush1.bf16.msra.mxu1 %v8912_v33  ;;  %567 = vmatprep.subr.bf16.mxu0 %v8924_v37 }
  0x4e   :  { %6875 = vmatmul.mubr.msk.bf16.gmra.mrb[8].mxu0 %vm125_vm2, %v81_v36  ;;  %608 = vmatprep.subr.bf16.mxu1 %v8926_v38 }
  0x4f   :  { %6879 = vmatmul.mubr.msk.bf16.gmra.mrb[8].mxu1 %vm125_vm2, %v81_v36  ;;  %216 = vmatprep.mubr.bf16.mxu0 %v10668_v0 }
  0x50   :  { %568 = vmatpush1.bf16.msra.mxu0 %v8929_v39  ;;  %289 = vmatprep.mubr.bf16.mxu1 %v10668_v0 }
  0x51   :  { %609 = vmatpush1.bf16.msra.mxu1 %v8931_v40  ;;  %569 = vmatprep.subr.bf16.mxu0 %v8940_v42 }
  0x52   :  { %610 = vmatprep.subr.bf16.mxu1 %v8946_v44 }
  0x54   :  { %570 = vmatpush1.bf16.msra.mxu0 %v8938_v41 }
  0x55   :  { %611 = vmatpush1.bf16.msra.mxu1 %v8942_v43  ;;  %571 = vmatprep.subr.bf16.mxu0 %v8955_v48 }
  0x56   :  { %6876 = vmatmul.mubr.msk.bf16.gmra.mrb[12].mxu0 %vm125_vm2, %v82_v47  ;;  %612 = vmatprep.subr.bf16.mxu1 %v8961_v50 }
  0x57   :  { %6880 = vmatmul.mubr.msk.bf16.gmra.mrb[12].mxu1 %vm125_vm2, %v82_v47  ;;  %591 = vmatprep.mubr.bf16.mxu0 %v10668_v0 }
  0x58   :  { %572 = vmatpush1.bf16.msra.mxu0 %v8959_v49  ;;  %632 = vmatprep.mubr.bf16.mxu1 %v10668_v0 }
  0x59   :  { %613 = vmatpush1.bf16.msra.mxu1 %v8965_v51  ;;  %573 = vmatprep.subr.bf16.mxu0 %v8967_v52 }
  0x5a   :  { %614 = vmatprep.subr.bf16.mxu1 %v8973_v54 }
  0x5c   :  { %574 = vmatpush1.bf16.msra.mxu0 %v8971_v53 }
  0x5d   :  { %615 = vmatpush1.bf16.msra.mxu1 %v8976_v55  ;;  %882 = vmatprep.subr.bf16.mxu0 %v8979_v56 }
  0x5e   :  { %923 = vmatprep.subr.bf16.mxu1 %v8983_v57 }
 0x111   :  { %v188_v3 = vpop.f32.mrb[0].mxu0 }
 0x112   :  { %v189_v4 = vadd.f32 %v188_v3, %v9001_v63  ;;  %v190_v5 = vpop.f32.mrb[1].mxu0  ;;  %v261_v8 = vpop.f32.mrb[0].mxu1 }
 0x113   :  { %v191_v6 = vadd.f32 %v190_v5, %v9005_v1  ;;  %v9010_v7 = vpop.f32.mrb[2].mxu0  ;;  %v263_v12 = vpop.f32.mrb[1].mxu1  ;;  %v262_v36 = vadd.f32 %v261_v8, %v9026_v34 }
 0x114   :  { %v6881_v9 = vmul.f32 -1.442695, %v189_v4  ;;  %v9012_v10 = vpop.f32.mrb[3].mxu0  ;;  %v9019_v23 = vpop.f32.mrb[2].mxu1  ;;  %v264_v25 = vadd.f32 %v263_v12, %v9016_v11 }
 0x115   :  { %v6882_v13 = vmul.f32 -1.442695, %v191_v6  ;;  %v9021_v24 = vpop.f32.mrb[3].mxu1 }
 0x116   :  { %8376 = vpow2.f32 %v6881_v9  ;;  %v6883_v35 = vmul.f32 -1.442695, %v264_v25 }
 0x117   :  { %8378 = vpow2.f32 %v6882_v13 }
 0x118   :  { %8380 = vpow2.f32 %v6883_v35 }
 0x119   :  { %8382 = vtanh.f32 %v262_v36  ;;  %v9034_v36 = vld [vmem:[#allocation8 + $0x8] ss:$16 sps:$4 sm:$0xff]  }
 0x120   :  { %v8377_v45 = vpop.eup %8376 }
 0x121   :  { %v8379_v46 = vpop.eup %8378  ;;  %v340_v47 = vadd.f32 1.0, %v8377_v45  ;;  %v9032_v45 = vld [vmem:[#allocation8] ss:$16 sps:$4 sm:$0xff]  }
 0x122   :  { %v346_v58 = vadd.f32 1.0, %v8379_v46  ;;  %v8381_v3 = vpop.eup %8380 }
 0x123   :  { %8384 = vrcp.f32 %v340_v47  ;;  %v8383_v4 = vpop.eup %8382  ;;  %v353_v6 = vadd.f32 1.0, %v8381_v3  ;;  %v9038_v47 = vld [vmem:[#allocation8 + $0x24] ss:$16 sps:$4 sm:$0xff]   ;;  %v9046_v3 = vld [vmem:[#allocation8 + $0x20] ss:$16 sps:$4 sm:$0xff]  }
 0x124   :  { %8386 = vrcp.f32 %v346_v58  ;;  %v9040_v58 = vld [vmem:[#allocation8 + $0x2c] ss:$16 sps:$4 sm:$0xff]  }
 0x125   :  { %8388 = vrcp.f32 %v353_v6  ;;  %v9054_v6 = vld [vmem:[#allocation8 + $0x4c] ss:$16 sps:$4 sm:$0xff]  }
 0x12d   :  { %v8385_v5 = vpop.eup %8384 }
 0x12e   :  { %v8387_v9 = vpop.eup %8386  ;;  %v357_v12 = vmul.f32 %v8385_v5, %v8383_v4  ;;  %v9048_v4 = vld [vmem:[#allocation8 + $0x28] ss:$16 sps:$4 sm:$0xff]   ;;  %v9052_v5 = vld [vmem:[#allocation8 + $0x44] ss:$16 sps:$4 sm:$0xff]  }
 0x12f   :  { %v356_v13 = vmul.f32 0.0, %v8387_v9  ;;  %v8389_v8 = vpop.eup %8388  ;;  %v9060_v9 = vld [vmem:[#allocation8 + $0x40] ss:$16 sps:$4 sm:$0xff]  }
 0x131   :  { %v9029_v61 = vadd.f32 %v357_v12, %v356_v13  ;;  %v9062_v12 = vld [vmem:[#allocation8 + $0x48] ss:$16 sps:$4 sm:$0xff]   ;;  %v9066_v13 = vld [vmem:[#allocation8 + $0x64] ss:$16 sps:$4 sm:$0xff]  }
 0x132   :  { %10823 = vst [vmem:[#allocation15_spill] sm:$0xff] %v9066_v13 }
 0x133   :  { %8390 = vtanh.f32 %v9029_v61 }
 0x13d   :  { %v8391_v25 = vpop.eup %8390 }
 0x13e   :  { %v360_v35 = vmul.f32 %v8391_v25, %v8389_v8  ;;  %v9068_v8 = vld [vmem:[#allocation8 + $0x6c] ss:$16 sps:$4 sm:$0xff]   ;;  %v9072_v25 = vld [vmem:[#allocation8 + $0x60] ss:$16 sps:$4 sm:$0xff]  }
 0x13f   :  { %10824 = vst [vmem:[#allocation16_spill] sm:$0xff] %v9068_v8  ;;  %10825 = vst [vmem:[#allocation17_spill] sm:$0xff] %v9072_v25 }
 0x140   :  { %v9036_v46 = vpack.c.bf16 %v360_v35, %v360_v35  ;;  %v9074_v35 = vld [vmem:[#allocation8 + $0x68] ss:$16 sps:$4 sm:$0xff]  }
 0x141   :  { %10826 = vst [vmem:[#allocation18_spill] sm:$0xff] %v9074_v35 }
 0x142   :  { %592 = vmatmul.mubr.bf16.vlgmr.msra.gmra.mrb[16].mxu0 %v9036_v46  ;;  %633 = vmatmul.mubr.bf16.vlgmr.msra.gmra.mrb[16].mxu1 %v9036_v46 }
 0x143   :  { %883 = vmatpush1.bf16.msra.mxu0 %v9032_v45  ;;  %924 = vmatpush1.bf16.msra.mxu1 %v9034_v36 }
 0x144   :  { %884 = vmatprep.subr.bf16.mxu0 %v9038_v47  ;;  %925 = vmatprep.subr.bf16.mxu1 %v9040_v58 }
 0x145   :  { %914 = vmatprep.mubr.bf16.mxu0 %v10668_v0  ;;  %955 = vmatprep.mubr.bf16.mxu1 %v10668_v0  ;;  %v9090_v0 = vld [vmem:[#allocation8 + $0xa4] ss:$16 sps:$4 sm:$0xff]  }
 0x146   :  { %10831 = vst [vmem:[#allocation23_spill] sm:$0xff] %v9090_v0 }
 0x147   :  { %885 = vmatpush1.bf16.msra.mxu0 %v9046_v3  ;;  %926 = vmatpush1.bf16.msra.mxu1 %v9048_v4 }
 0x148   :  { %886 = vmatprep.subr.bf16.mxu0 %v9052_v5  ;;  %927 = vmatprep.subr.bf16.mxu1 %v9054_v6 }
 0x14b   :  { %887 = vmatpush1.bf16.msra.mxu0 %v9060_v9  ;;  %928 = vmatpush1.bf16.msra.mxu1 %v9062_v12 }
 0x14c   :  { %888 = vmatprep.subr.bf16.mxu0 %v9066_v13  ;;  %929 = vmatprep.subr.bf16.mxu1 %v9068_v8  ;;  %v9092_v13 = vld [vmem:[#allocation8 + $0xac] ss:$16 sps:$4 sm:$0xff]   ;;  %v9096_v8 = vld [vmem:[#allocation8 + $0xa0] ss:$16 sps:$4 sm:$0xff]  }
 0x14d   :  { %10832 = vst [vmem:[#allocation24_spill] sm:$0xff] %v9092_v13  ;;  %10833 = vst [vmem:[#allocation25_spill] sm:$0xff] %v9096_v8 }
 0x14f   :  { %889 = vmatpush1.bf16.msra.mxu0 %v9072_v25  ;;  %930 = vmatpush1.bf16.msra.mxu1 %v9074_v35  ;;  %v9098_v25 = vld [vmem:[#allocation8 + $0xa8] ss:$16 sps:$4 sm:$0xff]   ;;  %v9102_v35 = vld [vmem:[#allocation8 + $0xc4] ss:$16 sps:$4 sm:$0xff]  }
 0x150   :  { %890 = vmatprep.subr.bf16.mxu0 %v9078_v14  ;;  %931 = vmatprep.subr.bf16.mxu1 %v9080_v2  ;;  %v9104_v14 = vld [vmem:[#allocation8 + $0xcc] ss:$16 sps:$4 sm:$0xff]   ;;  %v9108_v2 = vld [vmem:[#allocation8 + $0xc0] ss:$16 sps:$4 sm:$0xff]  }
 0x153   :  { %891 = vmatpush1.bf16.msra.mxu0 %v9084_v62  ;;  %932 = vmatpush1.bf16.msra.mxu1 %v9086_v60  ;;  %v9110_v62 = vld [vmem:[#allocation8 + $0xc8] ss:$16 sps:$4 sm:$0xff]   ;;  %v9114_v60 = vld [vmem:[#allocation8 + $0xe4] ss:$16 sps:$4 sm:$0xff]  }
 0x154   :  { %892 = vmatprep.subr.bf16.mxu0 %v9090_v0  ;;  %933 = vmatprep.subr.bf16.mxu1 %v9092_v13  ;;  %v9116_v0 = vld [vmem:[#allocation8 + $0xec] ss:$16 sps:$4 sm:$0xff]   ;;  %v9120_v13 = vld [vmem:[#allocation8 + $0xe0] ss:$16 sps:$4 sm:$0xff]  }
 0x155   :  { %10834 = vst [vmem:[#allocation26_spill] sm:$0xff] %v9116_v0 }
 0x157   :  { %893 = vmatpush1.bf16.msra.mxu0 %v9096_v8  ;;  %934 = vmatpush1.bf16.msra.mxu1 %v9098_v25  ;;  %v9122_v8 = vld [vmem:[#allocation8 + $0xe8] ss:$16 sps:$4 sm:$0xff]  }
 0x158   :  { %894 = vmatprep.subr.bf16.mxu0 %v9102_v35  ;;  %935 = vmatprep.subr.bf16.mxu1 %v9104_v14 }
 0x15b   :  { %895 = vmatpush1.bf16.msra.mxu0 %v9108_v2  ;;  %936 = vmatpush1.bf16.msra.mxu1 %v9110_v62 }
 0x15c   :  { %896 = vmatprep.subr.bf16.mxu0 %v9114_v60  ;;  %937 = vmatprep.subr.bf16.mxu1 %v9116_v0  ;;  %v10835_v0 = vmov 0  }
 0x15f   :  { %897 = vmatpush1.bf16.msra.mxu0 %v9120_v13  ;;  %938 = vmatpush1.bf16.msra.mxu1 %v9122_v8 }
 0x160   :  { %1187 = vmatprep.subr.bf16.mxu0 %v8860_v15  ;;  %1228 = vmatprep.subr.bf16.mxu1 %v8862_v16  ;;  %v9158_v15 = vpop.f32.mrb[4].mxu0  ;;  %v9160_v16 = vpop.f32.mrb[4].mxu1 }
 0x162   :  { %915 = vmatmul.mubr.bf16.vlgmr.msra.gmra.mrb[20].mxu0 %v9036_v46  ;;  %956 = vmatmul.mubr.bf16.vlgmr.msra.gmra.mrb[20].mxu1 %v9036_v46 }
 0x163   :  { %1188 = vmatpush1.bf16.msra.mxu0 %v8864_v17  ;;  %1229 = vmatpush1.bf16.msra.mxu1 %v8866_v18  ;;  %v9164_v17 = vpop.f32.mrb[5].mxu0  ;;  %v9166_v18 = vpop.f32.mrb[5].mxu1 }
 0x164   :  { %1189 = vmatprep.subr.bf16.mxu0 %v8872_v19  ;;  %1230 = vmatprep.subr.bf16.mxu1 %v8874_v20  ;;  %v9170_v19 = vpop.f32.mrb[6].mxu0  ;;  %v9172_v20 = vpop.f32.mrb[6].mxu1 }
 0x165   :  { %1219 = vmatprep.mubr.bf16.mxu0 %v10835_v0  ;;  %1260 = vmatprep.mubr.bf16.mxu1 %v10835_v0  ;;  %10836 = vst [vmem:[#allocation27_spill] sm:$0xff] %v9170_v19  ;;  %10837 = vst [vmem:[#allocation28_spill] sm:$0xff] %v9172_v20  ;;  %v9432_v20 = vld [vmem:[#allocation6 + $0x68] ss:$16 sps:$4 sm:$0xff]   ;;  %v9438_v19 = vld [vmem:[#allocation6 + $0x80] ss:$16 sps:$4 sm:$0xff]  }
 0x166   :  { %10887 = vst [vmem:[#allocation50_spill] sm:$0xff] %v9432_v20  ;;  %10888 = vst [vmem:[#allocation51_spill] sm:$0xff] %v9438_v19 }
 0x167   :  { %1190 = vmatpush1.bf16.msra.mxu0 %v8876_v21  ;;  %1231 = vmatpush1.bf16.msra.mxu1 %v8878_v22  ;;  %v9174_v21 = vpop.f32.mrb[7].mxu0  ;;  %v9176_v22 = vpop.f32.mrb[7].mxu1 }
 0x168   :  { %1191 = vmatprep.subr.bf16.mxu0 %v8890_v26  ;;  %1232 = vmatprep.subr.bf16.mxu1 %v8892_v27  ;;  %10838 = vst [vmem:[#allocation29_spill] sm:$0xff] %v9174_v21  ;;  %10839 = vst [vmem:[#allocation30_spill] sm:$0xff] %v9176_v22  ;;  %v9182_v26 = vpop.f32.mrb[8].mxu0  ;;  %v9184_v27 = vpop.f32.mrb[8].mxu1  ;;  %v9428_v22 = vld [vmem:[#allocation6 + $0x6c] ss:$16 sps:$4 sm:$0xff]  }
 0x169   :  { %10840 = vst [vmem:[#allocation31_spill] sm:$0xff] %v9182_v26  ;;  %10841 = vst [vmem:[#allocation32_spill] sm:$0xff] %v9184_v27  ;;  %v9420_v27 = vld [vmem:[#allocation6 + $0x48] ss:$16 sps:$4 sm:$0xff]   ;;  %v9426_v26 = vld [vmem:[#allocation6 + $0x64] ss:$16 sps:$4 sm:$0xff]  }
 0x16a   :  { %v9430_v21 = vld [vmem:[#allocation6 + $0x60] ss:$16 sps:$4 sm:$0xff]  }
 0x16b   :  { %1192 = vmatpush1.bf16.msra.mxu0 %v8895_v28  ;;  %1233 = vmatpush1.bf16.msra.mxu1 %v8897_v29  ;;  %v9186_v28 = vpop.f32.mrb[9].mxu0  ;;  %v9188_v29 = vpop.f32.mrb[9].mxu1  ;;  %10886 = vst [vmem:[#allocation49_spill] sm:$0xff] %v9430_v21 }
 0x16c   :  { %1193 = vmatprep.subr.bf16.mxu0 %v8904_v30  ;;  %1234 = vmatprep.subr.bf16.mxu1 %v8906_v31  ;;  %10842 = vst [vmem:[#allocation33_spill] sm:$0xff] %v9186_v28  ;;  %10843 = vst [vmem:[#allocation34_spill] sm:$0xff] %v9188_v29  ;;  %v9190_v30 = vpop.f32.mrb[10].mxu0  ;;  %v9192_v31 = vpop.f32.mrb[10].mxu1  ;;  %v9416_v29 = vld [vmem:[#allocation6 + $0x4c] ss:$16 sps:$4 sm:$0xff]  }
 0x16d   :  { %10844 = vst [vmem:[#allocation35_spill] sm:$0xff] %v9190_v30  ;;  %10845 = vst [vmem:[#allocation36_spill] sm:$0xff] %v9192_v31  ;;  %v9408_v31 = vld [vmem:[#allocation6 + $0x28] ss:$16 sps:$4 sm:$0xff]   ;;  %v9414_v30 = vld [vmem:[#allocation6 + $0x44] ss:$16 sps:$4 sm:$0xff]  }
 0x16e   :  { %v9418_v28 = vld [vmem:[#allocation6 + $0x40] ss:$16 sps:$4 sm:$0xff]  }
 0x16f   :  { %1194 = vmatpush1.bf16.msra.mxu0 %v8910_v32  ;;  %1235 = vmatpush1.bf16.msra.mxu1 %v8912_v33  ;;  %v9194_v32 = vpop.f32.mrb[11].mxu0  ;;  %v9196_v33 = vpop.f32.mrb[11].mxu1 }
 0x170   :  { %1195 = vmatprep.subr.bf16.mxu0 %v8924_v37  ;;  %1236 = vmatprep.subr.bf16.mxu1 %v8926_v38  ;;  %10846 = vst [vmem:[#allocation37_spill] sm:$0xff] %v9194_v32  ;;  %10847 = vst [vmem:[#allocation38_spill] sm:$0xff] %v9196_v33  ;;  %v9198_v37 = vpop.f32.mrb[12].mxu0  ;;  %v9404_v33 = vld [vmem:[#allocation6 + $0x2c] ss:$16 sps:$4 sm:$0xff]  }
 0x171   :  { %10848 = vst [vmem:[#allocation39_spill] sm:$0xff] %v9198_v37  ;;  %v9200_v38 = vpop.f32.mrb[13].mxu0  ;;  %v9396_v37 = vld [vmem:[#allocation6 + $0x8] ss:$16 sps:$4 sm:$0xff]   ;;  %v9406_v32 = vld [vmem:[#allocation6 + $0x20] ss:$16 sps:$4 sm:$0xff]  }
 0x172   :  { %10849 = vst [vmem:[#allocation40_spill] sm:$0xff] %v9200_v38 }
 0x173   :  { %1196 = vmatpush1.bf16.msra.mxu0 %v8929_v39  ;;  %1237 = vmatpush1.bf16.msra.mxu1 %v8931_v40  ;;  %v9202_v39 = vpop.f32.mrb[12].mxu1  ;;  %v9204_v40 = vpop.f32.mrb[14].mxu0 }
 0x174   :  { %1197 = vmatprep.subr.bf16.mxu0 %v8940_v42  ;;  %1238 = vmatprep.subr.bf16.mxu1 %v8946_v44  ;;  %10850 = vst [vmem:[#allocation41_spill] sm:$0xff] %v9202_v39  ;;  %10851 = vst [vmem:[#allocation42_spill] sm:$0xff] %v9204_v40  ;;  %v9208_v42 = vpop.f32.mrb[15].mxu0 }
 0x175   :  { %10853 = vst [vmem:[#allocation44_spill] sm:$0xff] %v9208_v42 }
 0x177   :  { %1198 = vmatpush1.bf16.msra.mxu0 %v8938_v41  ;;  %1239 = vmatpush1.bf16.msra.mxu1 %v8942_v43  ;;  %v9206_v41 = vpop.f32.mrb[13].mxu1 }
 0x178   :  { %1199 = vmatprep.subr.bf16.mxu0 %v8955_v48  ;;  %1240 = vmatprep.subr.bf16.mxu1 %v8961_v50  ;;  %10852 = vst [vmem:[#allocation43_spill] sm:$0xff] %v9206_v41  ;;  %v9210_v43 = vpop.f32.mrb[14].mxu1  ;;  %v193_v48 = vadd.f32 %v9010_v7, %v9001_v63  ;;  %v195_v50 = vadd.f32 %v9012_v10, %v9005_v1 }
 0x179   :  { %10854 = vst [vmem:[#allocation45_spill] sm:$0xff] %v9210_v43  ;;  %v9212_v44 = vpop.f32.mrb[15].mxu1 }
 0x17a   :  { %10855 = vst [vmem:[#allocation46_spill] sm:$0xff] %v9212_v44 }
 0x17b   :  { %1200 = vmatpush1.bf16.msra.mxu0 %v8959_v49  ;;  %1241 = vmatpush1.bf16.msra.mxu1 %v8965_v51  ;;  %v266_v49 = vadd.f32 %v9019_v23, %v9026_v34  ;;  %v268_v51 = vadd.f32 %v9021_v24, %v9016_v11 }
 0x17c   :  { %1201 = vmatprep.subr.bf16.mxu0 %v8967_v52  ;;  %1242 = vmatprep.subr.bf16.mxu1 %v8973_v54 }
 0x17f   :  { %1202 = vmatpush1.bf16.msra.mxu0 %v8971_v53  ;;  %1243 = vmatpush1.bf16.msra.mxu1 %v8976_v55 }
 0x180   :  { %1682 = vmatprep.subr.bf16.mxu0 %v8979_v56  ;;  %1723 = vmatprep.subr.bf16.mxu1 %v8983_v57 }
 0x215   :  { %v593_v52 = vpop.f32.mrb[16].mxu0  ;;  %v634_v53 = vpop.f32.mrb[16].mxu1 }
 0x216   :  { %v641_v54 = vadd.f32 %v593_v52, %v193_v48  ;;  %v643_v55 = vadd.f32 %v634_v53, %v266_v49  ;;  %v595_v56 = vpop.f32.mrb[17].mxu0  ;;  %v636_v57 = vpop.f32.mrb[17].mxu1 }
 0x217   :  { %v642_v46 = vadd.f32 %v595_v56, %v195_v50  ;;  %v644_v44 = vadd.f32 %v636_v57, %v268_v51  ;;  %v597_v42 = vpop.f32.mrb[18].mxu0  ;;  %v638_v43 = vpop.f32.mrb[18].mxu1 }
 0x218   :  { %v6916_v7 = vmul.f32 -1.442695, %v641_v54  ;;  %v598_v40 = vpop.f32.mrb[19].mxu0  ;;  %v639_v41 = vpop.f32.mrb[19].mxu1  ;;  %v332_v42 = vld [vmem:[%s10662_s7 + $0x4] sm:$0xf] }
 0x219   :  { %v6917_v23 = vmul.f32 -1.442695, %v642_v46  ;;  %v6918_v10 = vmul.f32 -1.442695, %v644_v44  ;;  %v10856_v44 = vsub.s32 0, %v8992_v59 }
 0x21a   :  { %8392 = vpow2.f32 %v6916_v7 }
 0x21b   :  { %8394 = vpow2.f32 %v6917_v23  ;;  %v9227_v52 = vrot.slane %v332_v42, %v10856_v44 }
 0x21c   :  { %8396 = vpow2.f32 %v6918_v10 }
 0x21d   :  { %8398 = vtanh.f32 %v643_v55  ;;  %10857 = vst [vmem:[#allocation47_spill] sm:$0xff] %v9227_v52 }
 0x224   :  { %v8393_v38 = vpop.eup %8392 }
 0x225   :  { %v8395_v39 = vpop.eup %8394  ;;  %v648_v24 = vadd.f32 1.0, %v8393_v38 }
 0x226   :  { %v654_v48 = vadd.f32 1.0, %v8395_v39  ;;  %v8397_v49 = vpop.eup %8396  ;;  %v10858_v39 = vsub.s32 1, %v8992_v59 }
 0x227   :  { %8400 = vrcp.f32 %v648_v24  ;;  %v8399_v43 = vpop.eup %8398  ;;  %v661_v51 = vadd.f32 1.0, %v8397_v49 }
 0x228   :  { %8402 = vrcp.f32 %v654_v48  ;;  %v9232_v53 = vrot.slane %v332_v42, %v10858_v39 }
 0x229   :  { %8404 = vrcp.f32 %v661_v51  ;;  %v10861_v51 = vsub.s32 2, %v8992_v59 }
 0x22b   :  { %v9246_v44 = vrot.slane %v332_v42, %v10861_v51  ;;  %v10872_v51 = vld [vmem:[#allocation25_spill] sm:$0xff] }
 0x22c   :  { %10884 = vst [vmem:[#allocation25_spill] sm:$0xff] %v9426_v26 }
 0x231   :  { %v8401_v40 = vpop.eup %8400 }
 0x232   :  { %v8403_v41 = vpop.eup %8402  ;;  %v665_v50 = vmul.f32 %v8401_v40, %v8399_v43  ;;  %v10859_v40 = vsub.s32 3, %v8992_v59 }
 0x233   :  { %v664_v38 = vmul.f32 %v8403_v41, %v9029_v61 }
 0x234   :  { %v9241_v41 = vrot.slane %v332_v42, %v10859_v40  ;;  %v10863_v42 = vld [vmem:[#allocation16_spill] sm:$0xff]  ;;  %v10870_v40 = vld [vmem:[#allocation23_spill] sm:$0xff] }
 0x235   :  { %v9234_v54 = vadd.f32 %v665_v50, %v664_v38  ;;  %v916_v55 = vpop.f32.mrb[20].mxu0  ;;  %v957_v56 = vpop.f32.mrb[20].mxu1  ;;  %10875 = vst [vmem:[#allocation16_spill] sm:$0xff] %v9396_v37  ;;  %10882 = vst [vmem:[#allocation23_spill] sm:$0xff] %v9418_v28 }
 0x236   :  { %v917_v57 = vadd.f32 %v916_v55, %v9227_v52  ;;  %v918_v46 = vpop.f32.mrb[21].mxu0  ;;  %v959_v7 = vpop.f32.mrb[21].mxu1  ;;  %10860 = vst [vmem:[#allocation48_spill] sm:$0xff] %v9241_v41 }
 0x237   :  { %v919_v23 = vadd.f32 %v918_v46, %v9232_v53  ;;  %v920_v10 = vpop.f32.mrb[22].mxu0  ;;  %v961_v24 = vpop.f32.mrb[22].mxu1  ;;  %8406 = vtanh.f32 %v9234_v54  ;;  %v960_v50 = vadd.f32 %v959_v7, %v9241_v41 }
 0x238   :  { %v6951_v61 = vmul.f32 -1.442695, %v917_v57  ;;  %v921_v48 = vpop.f32.mrb[23].mxu0  ;;  %v962_v49 = vpop.f32.mrb[23].mxu1  ;;  %v958_v57 = vadd.f32 %v957_v56, %v9246_v44 }
 0x239   :  { %v6952_v43 = vmul.f32 -1.442695, %v919_v23  ;;  %v8405_v38 = vpop.eup %8404  ;;  %v6953_v55 = vmul.f32 -1.442695, %v960_v50  ;;  %v10867_v49 = vld [vmem:[#allocation20_spill] sm:$0xff] }
 0x23a   :  { %8408 = vpow2.f32 %v6951_v61  ;;  %v10871_v50 = vld [vmem:[#allocation24_spill] sm:$0xff]  ;;  %10879 = vst [vmem:[#allocation20_spill] sm:$0xff] %v9408_v31 }
 0x23b   :  { %8410 = vpow2.f32 %v6952_v43  ;;  %v10869_v43 = vld [vmem:[#allocation22_spill] sm:$0xff]  ;;  %10883 = vst [vmem:[#allocation24_spill] sm:$0xff] %v9420_v27 }
 0x23c   :  { %8412 = vpow2.f32 %v6953_v55  ;;  %v9284_v55 = vld [vmem:[#allocation8 + $0x104] ss:$16 sps:$4 sm:$0xff]   ;;  %10881 = vst [vmem:[#allocation22_spill] sm:$0xff] %v9416_v29 }
 0x23d   :  { %8414 = vtanh.f32 %v958_v57  ;;  %v9286_v57 = vld [vmem:[#allocation8 + $0x10c] ss:$16 sps:$4 sm:$0xff]  }
 0x241   :  { %v8407_v39 = vpop.eup %8406 }
 0x242   :  { %v668_v46 = vmul.f32 %v8407_v39, %v8405_v38  ;;  %v10873_v39 = vld [vmem:[#allocation26_spill] sm:$0xff] }
 0x243   :  { %10885 = vst [vmem:[#allocation26_spill] sm:$0xff] %v9428_v22 }
 0x244   :  { %v8409_v10 = vpop.eup %8408  ;;  %v9249_v23 = vpack.c.bf16 %v668_v46, %v668_v46 }
 0x245   :  { %v8411_v24 = vpop.eup %8410  ;;  %v967_v48 = vadd.f32 1.0, %v8409_v10 }
 0x246   :  { %v973_v61 = vadd.f32 1.0, %v8411_v24  ;;  %1220 = vmatmul.mubr.bf16.vlgmr.msra.gmra.mrb[24].mxu0 %v9249_v23  ;;  %1261 = vmatmul.mubr.bf16.vlgmr.msra.gmra.mrb[24].mxu1 %v9249_v23  ;;  %v8413_v59 = vpop.eup %8412  ;;  %v9314_v24 = vld [vmem:[#allocation8 + $0x14c] ss:$16 sps:$4 sm:$0xff]  }
 0x247   :  { %8416 = vrcp.f32 %v967_v48  ;;  %1683 = vmatpush1.bf16.msra.mxu0 %v9032_v45  ;;  %1724 = vmatpush1.bf16.msra.mxu1 %v9034_v36  ;;  %v8415_v45 = vpop.eup %8414  ;;  %v10862_v36 = vld [vmem:[#allocation15_spill] sm:$0xff] }
 0x248   :  { %8418 = vrcp.f32 %v973_v61  ;;  %1684 = vmatprep.subr.bf16.mxu0 %v9038_v47  ;;  %1725 = vmatprep.subr.bf16.mxu1 %v9040_v58  ;;  %v9318_v48 = vld [vmem:[#allocation8 + $0x140] ss:$16 sps:$4 sm:$0xff]   ;;  %v9320_v61 = vld [vmem:[#allocation8 + $0x148] ss:$16 sps:$4 sm:$0xff]  }
 0x24b   :  { %1685 = vmatpush1.bf16.msra.mxu0 %v9046_v3  ;;  %1726 = vmatpush1.bf16.msra.mxu1 %v9048_v4  ;;  %v980_v3 = vadd.f32 1.0, %v8413_v59  ;;  %v10864_v4 = vld [vmem:[#allocation17_spill] sm:$0xff] }
 0x24c   :  { %1686 = vmatprep.subr.bf16.mxu0 %v9052_v5  ;;  %1727 = vmatprep.subr.bf16.mxu1 %v9054_v6  ;;  %v10865_v5 = vld [vmem:[#allocation18_spill] sm:$0xff]  ;;  %v10866_v6 = vld [vmem:[#allocation19_spill] sm:$0xff] }
 0x24d   :  { %8420 = vrcp.f32 %v980_v3  ;;  %v9324_v59 = vld [vmem:[#allocation8 + $0x164] ss:$16 sps:$4 sm:$0xff]   ;;  %v9344_v3 = vld [vmem:[#allocation8 + $0x188] ss:$16 sps:$4 sm:$0xff]   ;;  %10877 = vst [vmem:[#allocation18_spill] sm:$0xff] %v9404_v33  ;;  %10878 = vst [vmem:[#allocation19_spill] sm:$0xff] %v9406_v32 }
 0x24f   :  { %1687 = vmatpush1.bf16.msra.mxu0 %v9060_v9  ;;  %1728 = vmatpush1.bf16.msra.mxu1 %v9062_v12  ;;  %v10868_v12 = vld [vmem:[#allocation21_spill] sm:$0xff] }
 0x250   :  { %1688 = vmatprep.subr.bf16.mxu0 %v10862_v36  ;;  %1729 = vmatprep.subr.bf16.mxu1 %v10863_v42  ;;  %v9330_v36 = vld [vmem:[#allocation8 + $0x160] ss:$16 sps:$4 sm:$0xff]   ;;  %v9332_v42 = vld [vmem:[#allocation8 + $0x168] ss:$16 sps:$4 sm:$0xff]   ;;  %10880 = vst [vmem:[#allocation21_spill] sm:$0xff] %v9414_v30 }
 0x251   :  { %v8417_v47 = vpop.eup %8416 }
 0x252   :  { %v8419_v58 = vpop.eup %8418  ;;  %v984_v56 = vmul.f32 %v8417_v47, %v8415_v45  ;;  %v9326_v45 = vld [vmem:[#allocation8 + $0x16c] ss:$16 sps:$4 sm:$0xff]   ;;  %v9336_v47 = vld [vmem:[#allocation8 + $0x184] ss:$16 sps:$4 sm:$0xff]  }
 0x253   :  { %v983_v7 = vmul.f32 0.0, %v8419_v58  ;;  %1689 = vmatpush1.bf16.msra.mxu0 %v10864_v4  ;;  %1730 = vmatpush1.bf16.msra.mxu1 %v10865_v5  ;;  %v9338_v58 = vld [vmem:[#allocation8 + $0x18c] ss:$16 sps:$4 sm:$0xff]   ;;  %v9354_v5 = vld [vmem:[#allocation8 + $0x1a0] ss:$16 sps:$4 sm:$0xff]  }
 0x254   :  { %1690 = vmatprep.subr.bf16.mxu0 %v10866_v6  ;;  %1731 = vmatprep.subr.bf16.mxu1 %v10867_v49  ;;  %v9350_v4 = vld [vmem:[#allocation8 + $0x1ac] ss:$16 sps:$4 sm:$0xff]   ;;  %v9356_v6 = vld [vmem:[#allocation8 + $0x1a8] ss:$16 sps:$4 sm:$0xff]   ;;  %v9360_v49 = vld [vmem:[#allocation8 + $0x1c4] ss:$16 sps:$4 sm:$0xff]  }
 0x255   :  { %v9269_v9 = vadd.f32 %v984_v56, %v983_v7  ;;  %v9342_v56 = vld [vmem:[#allocation8 + $0x180] ss:$16 sps:$4 sm:$0xff]   ;;  %v9348_v7 = vld [vmem:[#allocation8 + $0x1a4] ss:$16 sps:$4 sm:$0xff]  }
 0x257   :  { %8422 = vtanh.f32 %v9269_v9  ;;  %1691 = vmatpush1.bf16.msra.mxu0 %v10868_v12  ;;  %1732 = vmatpush1.bf16.msra.mxu1 %v10869_v43  ;;  %v8421_v38 = vpop.eup %8420  ;;  %v9362_v12 = vld [vmem:[#allocation8 + $0x1cc] ss:$16 sps:$4 sm:$0xff]   ;;  %v9366_v43 = vld [vmem:[#allocation8 + $0x1c0] ss:$16 sps:$4 sm:$0xff]  }
 0x258   :  { %1692 = vmatprep.subr.bf16.mxu0 %v10870_v40  ;;  %1733 = vmatprep.subr.bf16.mxu1 %v10871_v50  ;;  %v9368_v40 = vld [vmem:[#allocation8 + $0x1c8] ss:$16 sps:$4 sm:$0xff]   ;;  %v9372_v50 = vld [vmem:[#allocation8 + $0x1e4] ss:$16 sps:$4 sm:$0xff]  }
 0x25b   :  { %1693 = vmatpush1.bf16.msra.mxu0 %v10872_v51  ;;  %1734 = vmatpush1.bf16.msra.mxu1 %v9098_v25  ;;  %v9302_v25 = vld [vmem:[#allocation8 + $0x12c] ss:$16 sps:$4 sm:$0xff]  }
 0x25c   :  { %1694 = vmatprep.subr.bf16.mxu0 %v9102_v35  ;;  %1735 = vmatprep.subr.bf16.mxu1 %v9104_v14  ;;  %v9292_v14 = vld [vmem:[#allocation8 + $0x100] ss:$16 sps:$4 sm:$0xff]   ;;  %v9312_v35 = vld [vmem:[#allocation8 + $0x144] ss:$16 sps:$4 sm:$0xff]   ;;  %v9374_v51 = vld [vmem:[#allocation8 + $0x1ec] ss:$16 sps:$4 sm:$0xff]  }
 0x25f   :  { %1695 = vmatpush1.bf16.msra.mxu0 %v9108_v2  ;;  %1736 = vmatpush1.bf16.msra.mxu1 %v9110_v62  ;;  %v9294_v2 = vld [vmem:[#allocation8 + $0x108] ss:$16 sps:$4 sm:$0xff]   ;;  %v9300_v62 = vld [vmem:[#allocation8 + $0x124] ss:$16 sps:$4 sm:$0xff]  }
 0x260   :  { %1696 = vmatprep.subr.bf16.mxu0 %v9114_v60  ;;  %1737 = vmatprep.subr.bf16.mxu1 %v10873_v39  ;;  %v9380_v39 = vld [vmem:[#allocation8 + $0x1e8] ss:$16 sps:$4 sm:$0xff]  }
 0x261   :  { %v8423_v46 = vpop.eup %8422 }
 0x262   :  { %v9288_v10 = vmul.f32 %v8423_v46, %v8421_v38  ;;  %v9378_v38 = vld [vmem:[#allocation8 + $0x1e0] ss:$16 sps:$4 sm:$0xff]   ;;  %v9390_v46 = vld [vmem:[#allocation6 + $0x4] ss:$16 sps:$4 sm:$0xff]  }
 0x263   :  { %1697 = vmatpush1.bf16.msra.mxu0 %v9120_v13  ;;  %1738 = vmatpush1.bf16.msra.mxu1 %v9122_v8  ;;  %v9306_v13 = vld [vmem:[#allocation8 + $0x120] ss:$16 sps:$4 sm:$0xff]   ;;  %v9308_v8 = vld [vmem:[#allocation8 + $0x128] ss:$16 sps:$4 sm:$0xff]  }
 0x264   :  { %10874 = vst [vmem:[#allocation15_spill] sm:$0xff] %v9288_v10  ;;  %1698 = vmatprep.subr.bf16.mxu0 %v9284_v55  ;;  %v1297_v60 = vpack.c.bf16 %v9288_v10, %v9288_v10  ;;  %1739 = vmatprep.subr.bf16.mxu1 %v9286_v57  ;;  %v9394_v10 = vld [vmem:[#allocation6] ss:$16 sps:$4 sm:$0xff]  }
 0x266   :  { %1714 = vmatprep.mubr.bf16.mxu0 %v1297_v60  ;;  %1755 = vmatprep.mubr.bf16.mxu1 %v1297_v60  ;;  %v9392_v60 = vld [vmem:[#allocation6 + $0xc] ss:$16 sps:$4 sm:$0xff]  }
 0x267   :  { %1699 = vmatpush1.bf16.msra.mxu0 %v9292_v14  ;;  %1740 = vmatpush1.bf16.msra.mxu1 %v9294_v2 }
 0x268   :  { %1700 = vmatprep.subr.bf16.mxu0 %v9300_v62  ;;  %1741 = vmatprep.subr.bf16.mxu1 %v9302_v25 }
 0x26b   :  { %1701 = vmatpush1.bf16.msra.mxu0 %v9306_v13  ;;  %1742 = vmatpush1.bf16.msra.mxu1 %v9308_v8 }
 0x26c   :  { %1702 = vmatprep.subr.bf16.mxu0 %v9312_v35  ;;  %1743 = vmatprep.subr.bf16.mxu1 %v9314_v24 }
 0x26f   :  { %1703 = vmatpush1.bf16.msra.mxu0 %v9318_v48  ;;  %1744 = vmatpush1.bf16.msra.mxu1 %v9320_v61 }
 0x270   :  { %1704 = vmatprep.subr.bf16.mxu0 %v9324_v59  ;;  %1745 = vmatprep.subr.bf16.mxu1 %v9326_v45 }
 0x273   :  { %1705 = vmatpush1.bf16.msra.mxu0 %v9330_v36  ;;  %1746 = vmatpush1.bf16.msra.mxu1 %v9332_v42 }
 0x274   :  { %1706 = vmatprep.subr.bf16.mxu0 %v9336_v47  ;;  %1747 = vmatprep.subr.bf16.mxu1 %v9338_v58 }
 0x277   :  { %1707 = vmatpush1.bf16.msra.mxu0 %v9342_v56  ;;  %1748 = vmatpush1.bf16.msra.mxu1 %v9344_v3 }
 0x278   :  { %1708 = vmatprep.subr.bf16.mxu0 %v9348_v7  ;;  %1749 = vmatprep.subr.bf16.mxu1 %v9350_v4 }
 0x27b   :  { %1709 = vmatpush1.bf16.msra.mxu0 %v9354_v5  ;;  %1750 = vmatpush1.bf16.msra.mxu1 %v9356_v6 }
 0x27c   :  { %1710 = vmatprep.subr.bf16.mxu0 %v9360_v49  ;;  %1751 = vmatprep.subr.bf16.mxu1 %v9362_v12 }
 0x27f   :  { %1711 = vmatpush1.bf16.msra.mxu0 %v9366_v43  ;;  %1752 = vmatpush1.bf16.msra.mxu1 %v9368_v40 }
 0x280   :  { %1712 = vmatprep.subr.bf16.mxu0 %v9372_v50  ;;  %1753 = vmatprep.subr.bf16.mxu1 %v9374_v51 }
 0x283   :  { %1713 = vmatpush1.bf16.msra.mxu0 %v9378_v38  ;;  %1754 = vmatpush1.bf16.msra.mxu1 %v9380_v39 }
 0x284   :  { %1988 = vmatprep.subr.bf16.mxu0 %v9390_v46  ;;  %2029 = vmatprep.subr.bf16.mxu1 %v9392_v60 }
 0x286   :  { %1715 = vmatmul.mubr.bf16.vlgmr.msra.gmra.mrb[28].mxu0 %v9249_v23  ;;  %1756 = vmatmul.mubr.bf16.vlgmr.msra.gmra.mrb[28].mxu1 %v9249_v23  ;;  %v9402_v23 = vld [vmem:[#allocation6 + $0x24] ss:$16 sps:$4 sm:$0xff]  }
 0x287   :  { %2020 = vmatprep.mubr.bf16.mxu0 %v10835_v0  ;;  %2061 = vmatprep.mubr.bf16.mxu1 %v10835_v0  ;;  %10876 = vst [vmem:[#allocation17_spill] sm:$0xff] %v9402_v23 }
 0x288   :  { %1989 = vmatpush1.bf16.msra.mxu0 %v9394_v10  ;;  %2030 = vmatpush1.bf16.msra.mxu1 %v9396_v37 }
 0x289   :  { %1990 = vmatprep.subr.bf16.mxu0 %v9402_v23  ;;  %2031 = vmatprep.subr.bf16.mxu1 %v9404_v33 }
 0x28c   :  { %1991 = vmatpush1.bf16.msra.mxu0 %v9406_v32  ;;  %2032 = vmatpush1.bf16.msra.mxu1 %v9408_v31  ;;  %v9449_v31 = vld [vmem:[#allocation6 + $0xac] ss:$16 sps:$4 sm:$0xff]  }
 0x28d   :  { %1992 = vmatprep.subr.bf16.mxu0 %v9414_v30  ;;  %2033 = vmatprep.subr.bf16.mxu1 %v9416_v29  ;;  %v9444_v29 = vld [vmem:[#allocation6 + $0x8c] ss:$16 sps:$4 sm:$0xff]   ;;  %v9446_v30 = vld [vmem:[#allocation6 + $0xa4] ss:$16 sps:$4 sm:$0xff]   ;;  %10893 = vst [vmem:[#allocation56_spill] sm:$0xff] %v9449_v31 }
 0x28e   :  { %10891 = vst [vmem:[#allocation54_spill] sm:$0xff] %v9444_v29  ;;  %10892 = vst [vmem:[#allocation55_spill] sm:$0xff] %v9446_v30 }
 0x290   :  { %1993 = vmatpush1.bf16.msra.mxu0 %v9418_v28  ;;  %2034 = vmatpush1.bf16.msra.mxu1 %v9420_v27  ;;  %v9440_v28 = vld [vmem:[#allocation6 + $0x84] ss:$16 sps:$4 sm:$0xff]   ;;  %v9442_v27 = vld [vmem:[#allocation6 + $0x88] ss:$16 sps:$4 sm:$0xff]  }
 0x291   :  { %1994 = vmatprep.subr.bf16.mxu0 %v9426_v26  ;;  %2035 = vmatprep.subr.bf16.mxu1 %v9428_v22  ;;  %10889 = vst [vmem:[#allocation52_spill] sm:$0xff] %v9440_v28  ;;  %10890 = vst [vmem:[#allocation53_spill] sm:$0xff] %v9442_v27  ;;  %v9460_v22 = vld [vmem:[#allocation6 + $0xc4] ss:$16 sps:$4 sm:$0xff]   ;;  %v9462_v26 = vld [vmem:[#allocation6 + $0xcc] ss:$16 sps:$4 sm:$0xff]  }
 0x292   :  { %10896 = vst [vmem:[#allocation59_spill] sm:$0xff] %v9460_v22  ;;  %10897 = vst [vmem:[#allocation60_spill] sm:$0xff] %v9462_v26 }
 0x294   :  { %1995 = vmatpush1.bf16.msra.mxu0 %v9430_v21  ;;  %2036 = vmatpush1.bf16.msra.mxu1 %v9432_v20  ;;  %v9454_v20 = vld [vmem:[#allocation6 + $0xa0] ss:$16 sps:$4 sm:$0xff]   ;;  %v9456_v21 = vld [vmem:[#allocation6 + $0xa8] ss:$16 sps:$4 sm:$0xff]  }
 0x295   :  { %1996 = vmatprep.subr.bf16.mxu0 %v9440_v28  ;;  %2037 = vmatprep.subr.bf16.mxu1 %v9444_v29  ;;  %10894 = vst [vmem:[#allocation57_spill] sm:$0xff] %v9454_v20  ;;  %10895 = vst [vmem:[#allocation58_spill] sm:$0xff] %v9456_v21  ;;  %v9466_v29 = vld [vmem:[#allocation6 + $0xc0] ss:$16 sps:$4 sm:$0xff]  }
 0x296   :  { %10898 = vst [vmem:[#allocation61_spill] sm:$0xff] %v9466_v29 }
 0x298   :  { %1997 = vmatpush1.bf16.msra.mxu0 %v9438_v19  ;;  %2038 = vmatpush1.bf16.msra.mxu1 %v9442_v27  ;;  %v9468_v19 = vld [vmem:[#allocation6 + $0xc8] ss:$16 sps:$4 sm:$0xff]   ;;  %v9472_v27 = vld [vmem:[#allocation6 + $0xe4] ss:$16 sps:$4 sm:$0xff]  }
 0x299   :  { %1998 = vmatprep.subr.bf16.mxu0 %v9446_v30  ;;  %2039 = vmatprep.subr.bf16.mxu1 %v9449_v31  ;;  %10899 = vst [vmem:[#allocation62_spill] sm:$0xff] %v9468_v19  ;;  %10900 = vst [vmem:[#allocation63_spill] sm:$0xff] %v9472_v27  ;;  %v9474_v30 = vld [vmem:[#allocation6 + $0xec] ss:$16 sps:$4 sm:$0xff]   ;;  %v9478_v31 = vld [vmem:[#allocation6 + $0xe0] ss:$16 sps:$4 sm:$0xff]  }
 0x29a   :  { %10901 = vst [vmem:[#allocation64_spill] sm:$0xff] %v9474_v30  ;;  %10902 = vst [vmem:[#allocation65_spill] sm:$0xff] %v9478_v31 }
 0x29c   :  { %1999 = vmatpush1.bf16.msra.mxu0 %v9454_v20  ;;  %2040 = vmatpush1.bf16.msra.mxu1 %v9456_v21  ;;  %v9480_v20 = vld [vmem:[#allocation6 + $0xe8] ss:$16 sps:$4 sm:$0xff]  }
 0x29d   :  { %2000 = vmatprep.subr.bf16.mxu0 %v9460_v22  ;;  %2041 = vmatprep.subr.bf16.mxu1 %v9462_v26  ;;  %10903 = vst [vmem:[#allocation66_spill] sm:$0xff] %v9480_v20  ;;  %v9486_v26 = vld [vmem:[#allocation8 + $0x4] ss:$16 sps:$4 sm:$0xff]   ;;  %v9488_v22 = vld [vmem:[#allocation8 + $0xc] ss:$16 sps:$4 sm:$0xff]  }
 0x29e   :  { %10904 = vst [vmem:[#allocation67_spill] sm:$0xff] %v9486_v26  ;;  %10905 = vst [vmem:[#allocation68_spill] sm:$0xff] %v9488_v22 }
 0x2a0   :  { %2001 = vmatpush1.bf16.msra.mxu0 %v9466_v29  ;;  %2042 = vmatpush1.bf16.msra.mxu1 %v9468_v19  ;;  %v199_v19 = vadd.f32 %v9158_v15, %v9001_v63 }
 0x2a1   :  { %2002 = vmatprep.subr.bf16.mxu0 %v9472_v27  ;;  %2043 = vmatprep.subr.bf16.mxu1 %v9474_v30  ;;  %v272_v27 = vadd.f32 %v9160_v16, %v9026_v34  ;;  %v201_v30 = vadd.f32 %v9164_v17, %v9005_v1 }
 0x2a4   :  { %2003 = vmatpush1.bf16.msra.mxu0 %v9478_v31  ;;  %2044 = vmatpush1.bf16.msra.mxu1 %v9480_v20  ;;  %v274_v20 = vadd.f32 %v9166_v18, %v9016_v11 }
 0x2a5   :  { %2483 = vmatprep.subr.bf16.mxu0 %v9486_v26  ;;  %2524 = vmatprep.subr.bf16.mxu1 %v9488_v22 }
 0x319   :  { %v1221_v31 = vpop.f32.mrb[24].mxu0  ;;  %v1262_v29 = vpop.f32.mrb[24].mxu1 }
 0x31a   :  { %v1269_v21 = vadd.f32 %v1221_v31, %v199_v19  ;;  %v1271_v28 = vadd.f32 %v1262_v29, %v272_v27  ;;  %v1223_v32 = vpop.f32.mrb[25].mxu0  ;;  %v1264_v26 = vpop.f32.mrb[25].mxu1 }
 0x31b   :  { %v1270_v0 = vadd.f32 %v1223_v32, %v201_v30  ;;  %v1272_v22 = vadd.f32 %v1264_v26, %v274_v20  ;;  %v1225_v33 = vpop.f32.mrb[26].mxu0  ;;  %v1266_v23 = vpop.f32.mrb[26].mxu1 }
 0x31c   :  { %v6986_v15 = vmul.f32 -1.442695, %v1269_v21  ;;  %v1226_v63 = vpop.f32.mrb[27].mxu0  ;;  %v1267_v37 = vpop.f32.mrb[27].mxu1  ;;  %v9510_v33 = vld [vmem:[#allocation8 + $0x24] ss:$16 sps:$4 sm:$0xff]  }
 0x31d   :  { %v6987_v16 = vmul.f32 -1.442695, %v1270_v0  ;;  %v6988_v17 = vmul.f32 -1.442695, %v1272_v22  ;;  %v9512_v37 = vld [vmem:[#allocation8 + $0x2c] ss:$16 sps:$4 sm:$0xff]  }
 0x31e   :  { %8424 = vpow2.f32 %v6986_v15  ;;  %10906 = vst [vmem:[#allocation69_spill] sm:$0xff] %v9512_v37  ;;  %v9520_v23 = vld [vmem:[#allocation8 + $0x28] ss:$16 sps:$4 sm:$0xff]   ;;  %v9524_v15 = vld [vmem:[#allocation8 + $0x44] ss:$16 sps:$4 sm:$0xff]  }
 0x31f   :  { %8426 = vpow2.f32 %v6987_v16  ;;  %10908 = vst [vmem:[#allocation71_spill] sm:$0xff] %v9520_v23  ;;  %10909 = vst [vmem:[#allocation72_spill] sm:$0xff] %v9524_v15  ;;  %v9526_v16 = vld [vmem:[#allocation8 + $0x4c] ss:$16 sps:$4 sm:$0xff]  }
 0x320   :  { %8428 = vpow2.f32 %v6988_v17  ;;  %10910 = vst [vmem:[#allocation73_spill] sm:$0xff] %v9526_v16  ;;  %v9530_v17 = vld [vmem:[#allocation8 + $0x40] ss:$16 sps:$4 sm:$0xff]  }
 0x321   :  { %8430 = vtanh.f32 %v1271_v28  ;;  %v9504_v28 = vld [vmem:[#allocation8] ss:$16 sps:$4 sm:$0xff]   ;;  %10911 = vst [vmem:[#allocation74_spill] sm:$0xff] %v9530_v17 }
 0x328   :  { %v8425_v1 = vpop.eup %8424 }
 0x329   :  { %v8427_v34 = vpop.eup %8426  ;;  %v1276_v18 = vadd.f32 1.0, %v8425_v1 }
 0x32a   :  { %v1282_v19 = vadd.f32 1.0, %v8427_v34  ;;  %v8429_v27 = vpop.eup %8428  ;;  %v9506_v34 = vld [vmem:[#allocation8 + $0x8] ss:$16 sps:$4 sm:$0xff]  }
 0x32b   :  { %8432 = vrcp.f32 %v1276_v18  ;;  %v8431_v29 = vpop.eup %8430  ;;  %v1289_v21 = vadd.f32 1.0, %v8429_v27  ;;  %v9532_v18 = vld [vmem:[#allocation8 + $0x48] ss:$16 sps:$4 sm:$0xff]   ;;  %v9538_v27 = vld [vmem:[#allocation8 + $0x6c] ss:$16 sps:$4 sm:$0xff]  }
 0x32c   :  { %8434 = vrcp.f32 %v1282_v19  ;;  %10912 = vst [vmem:[#allocation75_spill] sm:$0xff] %v9532_v18  ;;  %v9536_v19 = vld [vmem:[#allocation8 + $0x64] ss:$16 sps:$4 sm:$0xff]   ;;  %10914 = vst [vmem:[#allocation77_spill] sm:$0xff] %v9538_v27 }
 0x32d   :  { %8436 = vrcp.f32 %v1289_v21  ;;  %10913 = vst [vmem:[#allocation76_spill] sm:$0xff] %v9536_v19  ;;  %v9554_v21 = vld [vmem:[#allocation8 + $0x80] ss:$16 sps:$4 sm:$0xff]  }
 0x335   :  { %v8433_v20 = vpop.eup %8432 }
 0x336   :  { %v8435_v26 = vpop.eup %8434  ;;  %v1293_v30 = vmul.f32 %v8433_v20, %v8431_v29  ;;  %v9542_v29 = vld [vmem:[#allocation8 + $0x60] ss:$16 sps:$4 sm:$0xff]   ;;  %v9544_v20 = vld [vmem:[#allocation8 + $0x68] ss:$16 sps:$4 sm:$0xff]  }
 0x337   :  { %v1292_v63 = vmul.f32 %v8435_v26, %v9234_v54  ;;  %v8437_v22 = vpop.eup %8436  ;;  %v9518_v54 = vld [vmem:[#allocation8 + $0x20] ss:$16 sps:$4 sm:$0xff]   ;;  %10915 = vst [vmem:[#allocation78_spill] sm:$0xff] %v9542_v29  ;;  %10916 = vst [vmem:[#allocation79_spill] sm:$0xff] %v9544_v20  ;;  %v9548_v26 = vld [vmem:[#allocation8 + $0x84] ss:$16 sps:$4 sm:$0xff]  }
 0x338   :  { %10907 = vst [vmem:[#allocation70_spill] sm:$0xff] %v9518_v54  ;;  %10917 = vst [vmem:[#allocation80_spill] sm:$0xff] %v9548_v26 }
 0x339   :  { %v9501_v0 = vadd.f32 %v1293_v30, %v1292_v63  ;;  %v9550_v30 = vld [vmem:[#allocation8 + $0x8c] ss:$16 sps:$4 sm:$0xff]   ;;  %v9556_v63 = vld [vmem:[#allocation8 + $0x88] ss:$16 sps:$4 sm:$0xff]  }
 0x33a   :  { %10918 = vst [vmem:[#allocation81_spill] sm:$0xff] %v9550_v30 }
 0x33b   :  { %8438 = vtanh.f32 %v9501_v0 }
 0x345   :  { %v8439_v1 = vpop.eup %8438 }
 0x346   :  { %v1296_v31 = vmul.f32 %v8439_v1, %v8437_v22  ;;  %v9560_v22 = vld [vmem:[#allocation8 + $0xa4] ss:$16 sps:$4 sm:$0xff]   ;;  %v9562_v1 = vld [vmem:[#allocation8 + $0xac] ss:$16 sps:$4 sm:$0xff]  }
 0x348   :  { %v9508_v32 = vpack.c.bf16 %v1296_v31, %v1296_v31 }
 0x34a   :  { %2021 = vmatmul.mubr.bf16.vlgmr.msra.gmra.mrb[32].mxu0 %v9508_v32  ;;  %2062 = vmatmul.mubr.bf16.vlgmr.msra.gmra.mrb[32].mxu1 %v9508_v32 }
 0x34b   :  { %2484 = vmatpush1.bf16.msra.mxu0 %v9504_v28  ;;  %2525 = vmatpush1.bf16.msra.mxu1 %v9506_v34 }
 0x34c   :  { %2485 = vmatprep.subr.bf16.mxu0 %v9510_v33  ;;  %2526 = vmatprep.subr.bf16.mxu1 %v9512_v37 }
 0x34f   :  { %2486 = vmatpush1.bf16.msra.mxu0 %v9518_v54  ;;  %2527 = vmatpush1.bf16.msra.mxu1 %v9520_v23 }
 0x350   :  { %2487 = vmatprep.subr.bf16.mxu0 %v9524_v15  ;;  %2528 = vmatprep.subr.bf16.mxu1 %v9526_v16 }
 0x353   :  { %2488 = vmatpush1.bf16.msra.mxu0 %v9530_v17  ;;  %2529 = vmatpush1.bf16.msra.mxu1 %v9532_v18  ;;  %v9565_v17 = vld [vmem:[#allocation8 + $0xa0] ss:$16 sps:$4 sm:$0xff]  }
 0x354   :  { %2489 = vmatprep.subr.bf16.mxu0 %v9536_v19  ;;  %2530 = vmatprep.subr.bf16.mxu1 %v9538_v27 }
 0x357   :  { %2490 = vmatpush1.bf16.msra.mxu0 %v9542_v29  ;;  %2531 = vmatpush1.bf16.msra.mxu1 %v9544_v20 }
 0x358   :  { %2491 = vmatprep.subr.bf16.mxu0 %v9548_v26  ;;  %2532 = vmatprep.subr.bf16.mxu1 %v9550_v30  ;;  %v9570_v30 = vld [vmem:[#allocation8 + $0xa8] ss:$16 sps:$4 sm:$0xff]   ;;  %v9572_v26 = vld [vmem:[#allocation8 + $0xc4] ss:$16 sps:$4 sm:$0xff]  }
 0x359   :  { %v1716_v31 = vpop.f32.mrb[28].mxu0  ;;  %v1757_v27 = vpop.f32.mrb[28].mxu1 }
 0x35a   :  { %v1717_v19 = vadd.f32 %v1716_v31, %v9227_v52  ;;  %v1718_v18 = vpop.f32.mrb[29].mxu0  ;;  %v1759_v29 = vpop.f32.mrb[29].mxu1  ;;  %v9576_v31 = vld [vmem:[#allocation8 + $0xcc] ss:$16 sps:$4 sm:$0xff]  }
 0x35b   :  { %v1719_v20 = vadd.f32 %v1718_v18, %v9232_v53  ;;  %v1720_v16 = vpop.f32.mrb[30].mxu0  ;;  %v1761_v15 = vpop.f32.mrb[30].mxu1  ;;  %2492 = vmatpush1.bf16.msra.mxu0 %v9554_v21  ;;  %2533 = vmatpush1.bf16.msra.mxu1 %v9556_v63  ;;  %10919 = vst [vmem:[#allocation82_spill] sm:$0xff] %v9576_v31 }
 0x35c   :  { %v7053_v23 = vmul.f32 -1.442695, %v1717_v19  ;;  %v1721_v54 = vpop.f32.mrb[31].mxu0  ;;  %v1762_v37 = vpop.f32.mrb[31].mxu1  ;;  %2493 = vmatprep.subr.bf16.mxu0 %v9560_v22  ;;  %2534 = vmatprep.subr.bf16.mxu1 %v9562_v1  ;;  %v9580_v15 = vld [vmem:[#allocation8 + $0xc0] ss:$16 sps:$4 sm:$0xff]   ;;  %v1760_v19 = vadd.f32 %v1759_v29, %v9241_v41 }
 0x35d   :  { %v7054_v18 = vmul.f32 -1.442695, %v1719_v20  ;;  %10920 = vst [vmem:[#allocation83_spill] sm:$0xff] %v9580_v15  ;;  %v9582_v16 = vld [vmem:[#allocation8 + $0xc8] ss:$16 sps:$4 sm:$0xff]  }
 0x35e   :  { %8440 = vpow2.f32 %v7053_v23  ;;  %10921 = vst [vmem:[#allocation84_spill] sm:$0xff] %v9582_v16  ;;  %v9586_v37 = vld [vmem:[#allocation8 + $0xe4] ss:$16 sps:$4 sm:$0xff]   ;;  %v9588_v54 = vld [vmem:[#allocation8 + $0xec] ss:$16 sps:$4 sm:$0xff]  }
 0x35f   :  { %8442 = vpow2.f32 %v7054_v18  ;;  %2494 = vmatpush1.bf16.msra.mxu0 %v9565_v17  ;;  %2535 = vmatpush1.bf16.msra.mxu1 %v9570_v30  ;;  %v9593_v23 = vld [vmem:[#allocation8 + $0xe0] ss:$16 sps:$4 sm:$0xff]   ;;  %v9595_v20 = vld [vmem:[#allocation8 + $0xe8] ss:$16 sps:$4 sm:$0xff]   ;;  %v7055_v18 = vmul.f32 -1.442695, %v1760_v19 }
 0x360   :  { %2495 = vmatprep.subr.bf16.mxu0 %v9572_v26  ;;  %2536 = vmatprep.subr.bf16.mxu1 %v9576_v31  ;;  %v1758_v31 = vadd.f32 %v1757_v27, %v9246_v44  ;;  %v10949_v27 = vld [vmem:[#allocation63_spill] sm:$0xff] }
 0x361   :  { %8444 = vpow2.f32 %v7055_v18  ;;  %v10953_v19 = vld [vmem:[#allocation67_spill] sm:$0xff]  ;;  %v10954_v18 = vld [vmem:[#allocation68_spill] sm:$0xff] }
 0x362   :  { %8446 = vtanh.f32 %v1758_v31  ;;  %v10950_v31 = vld [vmem:[#allocation64_spill] sm:$0xff] }
 0x363   :  { %2496 = vmatpush1.bf16.msra.mxu0 %v9580_v15  ;;  %2537 = vmatpush1.bf16.msra.mxu1 %v9582_v16 }
 0x364   :  { %2497 = vmatprep.subr.bf16.mxu0 %v9586_v37  ;;  %2538 = vmatprep.subr.bf16.mxu1 %v9588_v54 }
 0x367   :  { %2498 = vmatpush1.bf16.msra.mxu0 %v9593_v23  ;;  %2539 = vmatpush1.bf16.msra.mxu1 %v9595_v20 }
 0x368   :  { %v8441_v29 = vpop.eup %8440  ;;  %2499 = vmatprep.subr.bf16.mxu0 %v9284_v55  ;;  %2540 = vmatprep.subr.bf16.mxu1 %v9286_v57 }
 0x369   :  { %v8443_v16 = vpop.eup %8442  ;;  %v1767_v15 = vadd.f32 1.0, %v8441_v29  ;;  %v10955_v29 = vld [vmem:[#allocation11_spill] sm:$0xff] }
 0x36a   :  { %v1773_v41 = vadd.f32 1.0, %v8443_v16  ;;  %v10952_v16 = vld [vmem:[#allocation66_spill] sm:$0xff] }
 0x36b   :  { %8448 = vrcp.f32 %v1767_v15  ;;  %2500 = vmatpush1.bf16.msra.mxu0 %v9292_v14  ;;  %2541 = vmatpush1.bf16.msra.mxu1 %v9294_v2  ;;  %v8445_v55 = vpop.eup %8444  ;;  %v10951_v15 = vld [vmem:[#allocation65_spill] sm:$0xff] }
 0x36c   :  { %8450 = vrcp.f32 %v1773_v41  ;;  %2501 = vmatprep.subr.bf16.mxu0 %v9300_v62  ;;  %2542 = vmatprep.subr.bf16.mxu1 %v9302_v25  ;;  %v8447_v57 = vpop.eup %8446  ;;  %v1780_v62 = vadd.f32 1.0, %v8445_v55  ;;  %v10956_v55 = vld [vmem:[#allocation27_spill] sm:$0xff] }
 0x36e   :  { %8452 = vrcp.f32 %v1780_v62  ;;  %v10959_v62 = vld [vmem:[#allocation12_spill] sm:$0xff] }
 0x36f   :  { %2502 = vmatpush1.bf16.msra.mxu0 %v9306_v13  ;;  %2543 = vmatpush1.bf16.msra.mxu1 %v9308_v8 }
 0x370   :  { %2503 = vmatprep.subr.bf16.mxu0 %v9312_v35  ;;  %2544 = vmatprep.subr.bf16.mxu1 %v9314_v24 }
 0x373   :  { %2504 = vmatpush1.bf16.msra.mxu0 %v9318_v48  ;;  %2545 = vmatpush1.bf16.msra.mxu1 %v9320_v61  ;;  %v10923_v48 = vld [vmem:[#allocation16_spill] sm:$0xff]  ;;  %v10924_v61 = vld [vmem:[#allocation17_spill] sm:$0xff] }
 0x374   :  { %2505 = vmatprep.subr.bf16.mxu0 %v9324_v59  ;;  %2546 = vmatprep.subr.bf16.mxu1 %v9326_v45  ;;  %v10925_v59 = vld [vmem:[#allocation18_spill] sm:$0xff]  ;;  %v10926_v45 = vmov 0  }
 0x375   :  { %v8449_v41 = vpop.eup %8448 }
 0x376   :  { %v8451_v14 = vpop.eup %8450  ;;  %v1784_v2 = vmul.f32 %v8449_v41, %v8447_v57  ;;  %v203_v57 = vadd.f32 %v10956_v55, %v10955_v29  ;;  %v10957_v41 = vld [vmem:[#allocation14_spill] sm:$0xff] }
 0x377   :  { %v1783_v25 = vmul.f32 %v8451_v14, %v9269_v9  ;;  %2506 = vmatpush1.bf16.msra.mxu0 %v9330_v36  ;;  %2547 = vmatpush1.bf16.msra.mxu1 %v9332_v42  ;;  %v10927_v36 = vld [vmem:[#allocation19_spill] sm:$0xff]  ;;  %v10928_v42 = vld [vmem:[#allocation20_spill] sm:$0xff]  ;;  %v10963_v55 = vld [vmem:[#allocation70_spill] sm:$0xff] }
 0x378   :  { %2507 = vmatprep.subr.bf16.mxu0 %v9336_v47  ;;  %2548 = vmatprep.subr.bf16.mxu1 %v9338_v58  ;;  %v8453_v9 = vpop.eup %8452  ;;  %v10929_v47 = vld [vmem:[#allocation21_spill] sm:$0xff]  ;;  %v10930_v58 = vld [vmem:[#allocation22_spill] sm:$0xff]  ;;  %v10958_v14 = vld [vmem:[#allocation28_spill] sm:$0xff] }
 0x379   :  { %v9621_v13 = vadd.f32 %v1784_v2, %v1783_v25  ;;  %v276_v2 = vadd.f32 %v10958_v14, %v10957_v41  ;;  %v10960_v25 = vld [vmem:[#allocation29_spill] sm:$0xff]  ;;  %v10965_v14 = vld [vmem:[#allocation72_spill] sm:$0xff] }
 0x37b   :  { %2508 = vmatpush1.bf16.msra.mxu0 %v9342_v56  ;;  %2549 = vmatpush1.bf16.msra.mxu1 %v9344_v3  ;;  %8454 = vtanh.f32 %v9621_v13  ;;  %v10931_v56 = vld [vmem:[#allocation23_spill] sm:$0xff]  ;;  %v10933_v3 = vld [vmem:[#allocation25_spill] sm:$0xff] }
 0x37c   :  { %2509 = vmatprep.subr.bf16.mxu0 %v9348_v7  ;;  %2550 = vmatprep.subr.bf16.mxu1 %v9350_v4  ;;  %v10934_v7 = vld [vmem:[#allocation26_spill] sm:$0xff]  ;;  %v10935_v4 = vld [vmem:[#allocation49_spill] sm:$0xff] }
 0x37f   :  { %2510 = vmatpush1.bf16.msra.mxu0 %v9354_v5  ;;  %2551 = vmatpush1.bf16.msra.mxu1 %v9356_v6  ;;  %v10936_v5 = vld [vmem:[#allocation50_spill] sm:$0xff]  ;;  %v10937_v6 = vld [vmem:[#allocation52_spill] sm:$0xff] }
 0x380   :  { %2511 = vmatprep.subr.bf16.mxu0 %v9360_v49  ;;  %2552 = vmatprep.subr.bf16.mxu1 %v9362_v12  ;;  %v10938_v49 = vld [vmem:[#allocation54_spill] sm:$0xff]  ;;  %v10939_v12 = vld [vmem:[#allocation51_spill] sm:$0xff] }
 0x383   :  { %2512 = vmatpush1.bf16.msra.mxu0 %v9366_v43  ;;  %2553 = vmatpush1.bf16.msra.mxu1 %v9368_v40  ;;  %v10940_v43 = vld [vmem:[#allocation53_spill] sm:$0xff]  ;;  %v10941_v40 = vld [vmem:[#allocation55_spill] sm:$0xff] }
 0x384   :  { %2513 = vmatprep.subr.bf16.mxu0 %v9372_v50  ;;  %2554 = vmatprep.subr.bf16.mxu1 %v9374_v51  ;;  %v10942_v50 = vld [vmem:[#allocation56_spill] sm:$0xff]  ;;  %v10943_v51 = vld [vmem:[#allocation57_spill] sm:$0xff] }
 0x385   :  { %v8455_v8 = vpop.eup %8454 }
 0x386   :  { %v9636_v35 = vmul.f32 %v8455_v8, %v8453_v9  ;;  %v205_v9 = vadd.f32 %v10960_v25, %v10959_v62  ;;  %v10961_v8 = vld [vmem:[#allocation30_spill] sm:$0xff] }
 0x387   :  { %2514 = vmatpush1.bf16.msra.mxu0 %v9378_v38  ;;  %2555 = vmatpush1.bf16.msra.mxu1 %v9380_v39  ;;  %v10944_v38 = vld [vmem:[#allocation58_spill] sm:$0xff]  ;;  %v10945_v39 = vld [vmem:[#allocation59_spill] sm:$0xff] }
 0x388   :  { %10922 = vst [vmem:[#allocation85_spill] sm:$0xff] %v9636_v35  ;;  %v2098_v24 = vpack.c.bf16 %v9636_v35, %v9636_v35  ;;  %2789 = vmatprep.subr.bf16.mxu0 %v9390_v46  ;;  %2830 = vmatprep.subr.bf16.mxu1 %v9392_v60  ;;  %v10946_v46 = vld [vmem:[#allocation60_spill] sm:$0xff]  ;;  %v10947_v60 = vld [vmem:[#allocation61_spill] sm:$0xff]  ;;  %v10967_v25 = vld [vmem:[#allocation74_spill] sm:$0xff] }
 0x389   :  { %v9894_v35 = vld [vmem:[#allocation6 + $0xa4] ss:$16 sps:$4 sm:$0xff]  }
 0x38a   :  { %2515 = vmatprep.mubr.bf16.mxu0 %v2098_v24  ;;  %2556 = vmatprep.mubr.bf16.mxu1 %v2098_v24  ;;  %v278_v24 = vadd.f32 %v10961_v8, %v9016_v11  ;;  %v10969_v8 = vld [vmem:[#allocation76_spill] sm:$0xff]  ;;  %10997 = vst [vmem:[#allocation56_spill] sm:$0xff] %v9894_v35 }
 0x38b   :  { %2516 = vmatmul.mubr.bf16.vlgmr.msra.gmra.mrb[36].mxu0 %v9508_v32  ;;  %2557 = vmatmul.mubr.bf16.vlgmr.msra.gmra.mrb[36].mxu1 %v9508_v32  ;;  %v10948_v32 = vld [vmem:[#allocation62_spill] sm:$0xff] }
 0x38c   :  { %2790 = vmatpush1.bf16.msra.mxu0 %v9394_v10  ;;  %2831 = vmatpush1.bf16.msra.mxu1 %v10923_v48  ;;  %v10932_v10 = vld [vmem:[#allocation24_spill] sm:$0xff] }
 0x38d   :  { %2791 = vmatprep.subr.bf16.mxu0 %v10924_v61  ;;  %2832 = vmatprep.subr.bf16.mxu1 %v10925_v59 }
 0x38e   :  { %2821 = vmatprep.mubr.bf16.mxu0 %v10926_v45  ;;  %2862 = vmatprep.mubr.bf16.mxu1 %v10926_v45 }
 0x390   :  { %2792 = vmatpush1.bf16.msra.mxu0 %v10927_v36  ;;  %2833 = vmatpush1.bf16.msra.mxu1 %v10928_v42 }
 0x391   :  { %2793 = vmatprep.subr.bf16.mxu0 %v10929_v47  ;;  %2834 = vmatprep.subr.bf16.mxu1 %v10930_v58 }
 0x394   :  { %2794 = vmatpush1.bf16.msra.mxu0 %v10931_v56  ;;  %2835 = vmatpush1.bf16.msra.mxu1 %v10932_v10 }
 0x395   :  { %2795 = vmatprep.subr.bf16.mxu0 %v10933_v3  ;;  %2836 = vmatprep.subr.bf16.mxu1 %v10934_v7 }
 0x398   :  { %2796 = vmatpush1.bf16.msra.mxu0 %v10935_v4  ;;  %2837 = vmatpush1.bf16.msra.mxu1 %v10936_v5 }
 0x399   :  { %2797 = vmatprep.subr.bf16.mxu0 %v10937_v6  ;;  %2838 = vmatprep.subr.bf16.mxu1 %v10938_v49 }
 0x39c   :  { %2798 = vmatpush1.bf16.msra.mxu0 %v10939_v12  ;;  %2839 = vmatpush1.bf16.msra.mxu1 %v10940_v43 }
 0x39d   :  { %2799 = vmatprep.subr.bf16.mxu0 %v10941_v40  ;;  %2840 = vmatprep.subr.bf16.mxu1 %v10942_v50 }
 0x3a0   :  { %2800 = vmatpush1.bf16.msra.mxu0 %v10943_v51  ;;  %2841 = vmatpush1.bf16.msra.mxu1 %v10944_v38 }
 0x3a1   :  { %2801 = vmatprep.subr.bf16.mxu0 %v10945_v39  ;;  %2842 = vmatprep.subr.bf16.mxu1 %v10946_v46 }
 0x3a4   :  { %2802 = vmatpush1.bf16.msra.mxu0 %v10947_v60  ;;  %2843 = vmatpush1.bf16.msra.mxu1 %v10948_v32 }
 0x3a5   :  { %2803 = vmatprep.subr.bf16.mxu0 %v10949_v27  ;;  %2844 = vmatprep.subr.bf16.mxu1 %v10950_v31 }
 0x3a8   :  { %2804 = vmatpush1.bf16.msra.mxu0 %v10951_v15  ;;  %2845 = vmatpush1.bf16.msra.mxu1 %v10952_v16 }
 0x3a9   :  { %3284 = vmatprep.subr.bf16.mxu0 %v10953_v19  ;;  %3325 = vmatprep.subr.bf16.mxu1 %v10954_v18 }
 0x41d   :  { %v2022_v48 = vpop.f32.mrb[32].mxu0  ;;  %v2063_v61 = vpop.f32.mrb[32].mxu1 }
 0x41e   :  { %v2070_v59 = vadd.f32 %v2022_v48, %v203_v57  ;;  %v2072_v36 = vadd.f32 %v2063_v61, %v276_v2  ;;  %v2024_v42 = vpop.f32.mrb[33].mxu0  ;;  %v2065_v47 = vpop.f32.mrb[33].mxu1  ;;  %v10964_v57 = vld [vmem:[#allocation71_spill] sm:$0xff]  ;;  %v10966_v2 = vld [vmem:[#allocation73_spill] sm:$0xff] }
 0x41f   :  { %v2071_v58 = vadd.f32 %v2024_v42, %v205_v9  ;;  %v2073_v56 = vadd.f32 %v2065_v47, %v278_v24  ;;  %v2026_v10 = vpop.f32.mrb[34].mxu0  ;;  %v2067_v3 = vpop.f32.mrb[34].mxu1  ;;  %v10968_v9 = vld [vmem:[#allocation75_spill] sm:$0xff]  ;;  %v10973_v24 = vld [vmem:[#allocation80_spill] sm:$0xff]  ;;  %v10974_v48 = vld [vmem:[#allocation81_spill] sm:$0xff] }
 0x420   :  { %v7088_v7 = vmul.f32 -1.442695, %v2070_v59  ;;  %v2027_v4 = vpop.f32.mrb[35].mxu0  ;;  %v2068_v5 = vpop.f32.mrb[35].mxu1 }
 0x421   :  { %v7089_v6 = vmul.f32 -1.442695, %v2071_v58  ;;  %v7090_v49 = vmul.f32 -1.442695, %v2073_v56 }
 0x422   :  { %8456 = vpow2.f32 %v7088_v7 }
 0x423   :  { %8458 = vpow2.f32 %v7089_v6 }
 0x424   :  { %8460 = vpow2.f32 %v7090_v49  ;;  %v10977_v49 = vld [vmem:[#allocation83_spill] sm:$0xff] }
 0x425   :  { %8462 = vtanh.f32 %v2072_v36 }
 0x42c   :  { %v8457_v12 = vpop.eup %8456 }
 0x42d   :  { %v8459_v43 = vpop.eup %8458  ;;  %v2077_v40 = vadd.f32 1.0, %v8457_v12 }
 0x42e   :  { %v2083_v50 = vadd.f32 1.0, %v8459_v43  ;;  %v8461_v51 = vpop.eup %8460  ;;  %v9736_v43 = vld [vmem:[#allocation8 + $0x108] ss:$16 sps:$4 sm:$0xff]  }
 0x42f   :  { %8464 = vrcp.f32 %v2077_v40  ;;  %v8463_v38 = vpop.eup %8462  ;;  %v2090_v32 = vadd.f32 1.0, %v8461_v51 }
 0x430   :  { %8466 = vrcp.f32 %v2083_v50 }
 0x431   :  { %8468 = vrcp.f32 %v2090_v32  ;;  %v9760_v32 = vld [vmem:[#allocation8 + $0x148] ss:$16 sps:$4 sm:$0xff]  }
 0x439   :  { %v8465_v39 = vpop.eup %8464 }
 0x43a   :  { %v8467_v46 = vpop.eup %8466  ;;  %v2094_v60 = vmul.f32 %v8465_v39, %v8463_v38  ;;  %v9748_v38 = vld [vmem:[#allocation8 + $0x128] ss:$16 sps:$4 sm:$0xff]   ;;  %v9752_v39 = vld [vmem:[#allocation8 + $0x144] ss:$16 sps:$4 sm:$0xff]  }
 0x43b   :  { %v2093_v27 = vmul.f32 %v8467_v46, %v9501_v0  ;;  %v8469_v15 = vpop.eup %8468  ;;  %v10962_v0 = vld [vmem:[#allocation69_spill] sm:$0xff]  ;;  %v9754_v46 = vld [vmem:[#allocation8 + $0x14c] ss:$16 sps:$4 sm:$0xff]  }
 0x43d   :  { %v9689_v31 = vadd.f32 %v2094_v60, %v2093_v27  ;;  %v9758_v60 = vld [vmem:[#allocation8 + $0x140] ss:$16 sps:$4 sm:$0xff]   ;;  %v9764_v27 = vld [vmem:[#allocation8 + $0x164] ss:$16 sps:$4 sm:$0xff]  }
 0x43f   :  { %8470 = vtanh.f32 %v9689_v31 }
 0x449   :  { %v8471_v16 = vpop.eup %8470 }
 0x44a   :  { %v2097_v19 = vmul.f32 %v8471_v16, %v8469_v15  ;;  %v9766_v15 = vld [vmem:[#allocation8 + $0x16c] ss:$16 sps:$4 sm:$0xff]   ;;  %v9770_v16 = vld [vmem:[#allocation8 + $0x160] ss:$16 sps:$4 sm:$0xff]  }
 0x44c   :  { %v9692_v18 = vpack.c.bf16 %v2097_v19, %v2097_v19  ;;  %v9772_v19 = vld [vmem:[#allocation8 + $0x168] ss:$16 sps:$4 sm:$0xff]  }
 0x44e   :  { %2822 = vmatmul.mubr.bf16.vlgmr.msra.gmra.mrb[40].mxu0 %v9692_v18  ;;  %2863 = vmatmul.mubr.bf16.vlgmr.msra.gmra.mrb[40].mxu1 %v9692_v18 }
 0x44f   :  { %3285 = vmatpush1.bf16.msra.mxu0 %v9504_v28  ;;  %3326 = vmatpush1.bf16.msra.mxu1 %v9506_v34  ;;  %v10970_v28 = vld [vmem:[#allocation77_spill] sm:$0xff]  ;;  %v10971_v34 = vld [vmem:[#allocation78_spill] sm:$0xff] }
 0x450   :  { %3286 = vmatprep.subr.bf16.mxu0 %v9510_v33  ;;  %3327 = vmatprep.subr.bf16.mxu1 %v10962_v0  ;;  %v10972_v33 = vld [vmem:[#allocation79_spill] sm:$0xff] }
 0x453   :  { %3287 = vmatpush1.bf16.msra.mxu0 %v10963_v55  ;;  %3328 = vmatpush1.bf16.msra.mxu1 %v10964_v57  ;;  %v9776_v55 = vld [vmem:[#allocation8 + $0x184] ss:$16 sps:$4 sm:$0xff]   ;;  %v9778_v57 = vld [vmem:[#allocation8 + $0x18c] ss:$16 sps:$4 sm:$0xff]  }
 0x454   :  { %3288 = vmatprep.subr.bf16.mxu0 %v10965_v14  ;;  %3329 = vmatprep.subr.bf16.mxu1 %v10966_v2 }
 0x457   :  { %3289 = vmatpush1.bf16.msra.mxu0 %v10967_v25  ;;  %3330 = vmatpush1.bf16.msra.mxu1 %v10968_v9 }
 0x458   :  { %3290 = vmatprep.subr.bf16.mxu0 %v10969_v8  ;;  %3331 = vmatprep.subr.bf16.mxu1 %v10970_v28  ;;  %v9782_v28 = vld [vmem:[#allocation8 + $0x180] ss:$16 sps:$4 sm:$0xff]  }
 0x45b   :  { %3291 = vmatpush1.bf16.msra.mxu0 %v10971_v34  ;;  %3332 = vmatpush1.bf16.msra.mxu1 %v10972_v33  ;;  %v9784_v34 = vld [vmem:[#allocation8 + $0x188] ss:$16 sps:$4 sm:$0xff]  }
 0x45c   :  { %3292 = vmatprep.subr.bf16.mxu0 %v10973_v24  ;;  %3333 = vmatprep.subr.bf16.mxu1 %v10974_v48  ;;  %v9789_v24 = vld [vmem:[#allocation8 + $0x1a4] ss:$16 sps:$4 sm:$0xff]   ;;  %v9791_v48 = vld [vmem:[#allocation8 + $0x1ac] ss:$16 sps:$4 sm:$0xff]  }
 0x45e   :  { %v2517_v61 = vpop.f32.mrb[36].mxu0  ;;  %v2558_v59 = vpop.f32.mrb[36].mxu1 }
 0x45f   :  { %v2518_v36 = vadd.f32 %v2517_v61, %v9227_v52  ;;  %v2519_v42 = vpop.f32.mrb[37].mxu0  ;;  %v2560_v47 = vpop.f32.mrb[37].mxu1  ;;  %3293 = vmatpush1.bf16.msra.mxu0 %v9554_v21  ;;  %3334 = vmatpush1.bf16.msra.mxu1 %v9556_v63  ;;  %v10975_v21 = vld [vmem:[#allocation82_spill] sm:$0xff]  ;;  %v10976_v63 = vld [vmem:[#allocation48_spill] sm:$0xff]  ;;  %v2559_v12 = vadd.f32 %v2558_v59, %v9246_v44  ;;  %v9797_v59 = vld [vmem:[#allocation8 + $0x1a0] ss:$16 sps:$4 sm:$0xff]  }
 0x460   :  { %v2520_v58 = vadd.f32 %v2519_v42, %v9232_v53  ;;  %v2521_v56 = vpop.f32.mrb[38].mxu0  ;;  %v2562_v10 = vpop.f32.mrb[38].mxu1  ;;  %3294 = vmatprep.subr.bf16.mxu0 %v9560_v22  ;;  %3335 = vmatprep.subr.bf16.mxu1 %v9562_v1  ;;  %v2561_v6 = vadd.f32 %v2560_v47, %v10976_v63  ;;  %v10978_v22 = vld [vmem:[#allocation84_spill] sm:$0xff]  ;;  %v9727_v1 = vld [vmem:[#allocation8 + $0x104] ss:$16 sps:$4 sm:$0xff]  }
 0x461   :  { %v7155_v3 = vmul.f32 -1.442695, %v2518_v36  ;;  %v2522_v7 = vpop.f32.mrb[39].mxu0  ;;  %v2563_v4 = vpop.f32.mrb[39].mxu1  ;;  %v9799_v36 = vld [vmem:[#allocation8 + $0x1a8] ss:$16 sps:$4 sm:$0xff]  }
 0x462   :  { %v7156_v5 = vmul.f32 -1.442695, %v2520_v58  ;;  %v9805_v42 = vld [vmem:[#allocation8 + $0x1cc] ss:$16 sps:$4 sm:$0xff]   ;;  %v9810_v47 = vld [vmem:[#allocation8 + $0x1c0] ss:$16 sps:$4 sm:$0xff]  }
 0x463   :  { %8472 = vpow2.f32 %v7155_v3  ;;  %3295 = vmatpush1.bf16.msra.mxu0 %v9565_v17  ;;  %3336 = vmatpush1.bf16.msra.mxu1 %v9570_v30  ;;  %v9729_v17 = vld [vmem:[#allocation8 + $0x10c] ss:$16 sps:$4 sm:$0xff]   ;;  %v7157_v30 = vmul.f32 -1.442695, %v2561_v6  ;;  %v9812_v58 = vld [vmem:[#allocation8 + $0x1c8] ss:$16 sps:$4 sm:$0xff]  }
 0x464   :  { %8474 = vpow2.f32 %v7156_v5  ;;  %3296 = vmatprep.subr.bf16.mxu0 %v9572_v26  ;;  %3337 = vmatprep.subr.bf16.mxu1 %v10975_v21  ;;  %v9734_v26 = vld [vmem:[#allocation8 + $0x100] ss:$16 sps:$4 sm:$0xff]   ;;  %v9816_v56 = vld [vmem:[#allocation8 + $0x1e4] ss:$16 sps:$4 sm:$0xff]   ;;  %v9818_v10 = vld [vmem:[#allocation8 + $0x1ec] ss:$16 sps:$4 sm:$0xff]  }
 0x465   :  { %8476 = vpow2.f32 %v7157_v30  ;;  %v9822_v3 = vld [vmem:[#allocation8 + $0x1e0] ss:$16 sps:$4 sm:$0xff]   ;;  %v9824_v7 = vld [vmem:[#allocation8 + $0x1e8] ss:$16 sps:$4 sm:$0xff]  }
 0x466   :  { %8478 = vtanh.f32 %v2559_v12  ;;  %v9842_v30 = vld [vmem:[#allocation6] ss:$16 sps:$4 sm:$0xff]   ;;  %v9844_v12 = vld [vmem:[#allocation6 + $0x8] ss:$16 sps:$4 sm:$0xff]  }
 0x467   :  { %3297 = vmatpush1.bf16.msra.mxu0 %v10977_v49  ;;  %3338 = vmatpush1.bf16.msra.mxu1 %v10978_v22  ;;  %v9838_v49 = vld [vmem:[#allocation6 + $0x4] ss:$16 sps:$4 sm:$0xff]   ;;  %v9840_v22 = vld [vmem:[#allocation6 + $0xc] ss:$16 sps:$4 sm:$0xff]   ;;  %10980 = vst [vmem:[#allocation17_spill] sm:$0xff] %v9844_v12 }
 0x468   :  { %3298 = vmatprep.subr.bf16.mxu0 %v9586_v37  ;;  %3339 = vmatprep.subr.bf16.mxu1 %v9588_v54  ;;  %v9740_v37 = vld [vmem:[#allocation8 + $0x124] ss:$16 sps:$4 sm:$0xff]   ;;  %v9742_v54 = vld [vmem:[#allocation8 + $0x12c] ss:$16 sps:$4 sm:$0xff]  }
 0x46b   :  { %3299 = vmatpush1.bf16.msra.mxu0 %v9593_v23  ;;  %3340 = vmatpush1.bf16.msra.mxu1 %v9595_v20  ;;  %v9746_v20 = vld [vmem:[#allocation8 + $0x120] ss:$16 sps:$4 sm:$0xff]  }
 0x46c   :  { %3300 = vmatprep.subr.bf16.mxu0 %v9727_v1  ;;  %3341 = vmatprep.subr.bf16.mxu1 %v9729_v17 }
 0x46d   :  { %v8473_v40 = vpop.eup %8472 }
 0x46e   :  { %v8475_v50 = vpop.eup %8474  ;;  %v2568_v51 = vadd.f32 1.0, %v8473_v40  ;;  %v9852_v40 = vld [vmem:[#allocation6 + $0x2c] ss:$16 sps:$4 sm:$0xff]  }
 0x46f   :  { %v2574_v23 = vadd.f32 1.0, %v8475_v50  ;;  %3301 = vmatpush1.bf16.msra.mxu0 %v9734_v26  ;;  %3342 = vmatpush1.bf16.msra.mxu1 %v9736_v43  ;;  %v8477_v0 = vpop.eup %8476  ;;  %10982 = vst [vmem:[#allocation19_spill] sm:$0xff] %v9852_v40  ;;  %v9854_v50 = vld [vmem:[#allocation6 + $0x20] ss:$16 sps:$4 sm:$0xff]  }
 0x470   :  { %8480 = vrcp.f32 %v2568_v51  ;;  %3302 = vmatprep.subr.bf16.mxu0 %v9740_v37  ;;  %3343 = vmatprep.subr.bf16.mxu1 %v9742_v54  ;;  %v8479_v14 = vpop.eup %8478  ;;  %v2581_v8 = vadd.f32 1.0, %v8477_v0  ;;  %10983 = vst [vmem:[#allocation20_spill] sm:$0xff] %v9854_v50  ;;  %v9856_v51 = vld [vmem:[#allocation6 + $0x28] ss:$16 sps:$4 sm:$0xff]   ;;  %v9864_v0 = vld [vmem:[#allocation6 + $0x4c] ss:$16 sps:$4 sm:$0xff]  }
 0x471   :  { %8482 = vrcp.f32 %v2574_v23  ;;  %10984 = vst [vmem:[#allocation21_spill] sm:$0xff] %v9856_v51  ;;  %v9862_v23 = vld [vmem:[#allocation6 + $0x44] ss:$16 sps:$4 sm:$0xff]   ;;  %10986 = vst [vmem:[#allocation23_spill] sm:$0xff] %v9864_v0 }
 0x472   :  { %8484 = vrcp.f32 %v2581_v8  ;;  %10985 = vst [vmem:[#allocation22_spill] sm:$0xff] %v9862_v23  ;;  %v9878_v8 = vld [vmem:[#allocation6 + $0x60] ss:$16 sps:$4 sm:$0xff]  }
 0x473   :  { %3303 = vmatpush1.bf16.msra.mxu0 %v9746_v20  ;;  %3344 = vmatpush1.bf16.msra.mxu1 %v9748_v38  ;;  %10991 = vst [vmem:[#allocation50_spill] sm:$0xff] %v9878_v8 }
 0x474   :  { %3304 = vmatprep.subr.bf16.mxu0 %v9752_v39  ;;  %3345 = vmatprep.subr.bf16.mxu1 %v9754_v46 }
 0x477   :  { %3305 = vmatpush1.bf16.msra.mxu0 %v9758_v60  ;;  %3346 = vmatpush1.bf16.msra.mxu1 %v9760_v32 }
 0x478   :  { %3306 = vmatprep.subr.bf16.mxu0 %v9764_v27  ;;  %3347 = vmatprep.subr.bf16.mxu1 %v9766_v15 }
 0x47a   :  { %v8481_v2 = vpop.eup %8480 }
 0x47b   :  { %v8483_v25 = vpop.eup %8482  ;;  %v2585_v9 = vmul.f32 %v8481_v2, %v8479_v14  ;;  %3307 = vmatpush1.bf16.msra.mxu0 %v9770_v16  ;;  %3348 = vmatpush1.bf16.msra.mxu1 %v9772_v19  ;;  %v9866_v14 = vld [vmem:[#allocation6 + $0x40] ss:$16 sps:$4 sm:$0xff]   ;;  %v9868_v2 = vld [vmem:[#allocation6 + $0x48] ss:$16 sps:$4 sm:$0xff]  }
 0x47c   :  { %v2584_v33 = vmul.f32 %v8483_v25, %v9621_v13  ;;  %3308 = vmatprep.subr.bf16.mxu0 %v9776_v55  ;;  %3349 = vmatprep.subr.bf16.mxu1 %v9778_v57  ;;  %v9803_v13 = vld [vmem:[#allocation8 + $0x1c4] ss:$16 sps:$4 sm:$0xff]   ;;  %v8485_v4 = vpop.eup %8484  ;;  %10987 = vst [vmem:[#allocation24_spill] sm:$0xff] %v9866_v14  ;;  %10988 = vst [vmem:[#allocation25_spill] sm:$0xff] %v9868_v2 }
 0x47d   :  { %v9874_v25 = vld [vmem:[#allocation6 + $0x64] ss:$16 sps:$4 sm:$0xff]  }
 0x47e   :  { %v9793_v61 = vadd.f32 %v2585_v9, %v2584_v33  ;;  %10989 = vst [vmem:[#allocation26_spill] sm:$0xff] %v9874_v25  ;;  %v9876_v9 = vld [vmem:[#allocation6 + $0x6c] ss:$16 sps:$4 sm:$0xff]   ;;  %v9880_v33 = vld [vmem:[#allocation6 + $0x68] ss:$16 sps:$4 sm:$0xff]  }
 0x47f   :  { %3309 = vmatpush1.bf16.msra.mxu0 %v9782_v28  ;;  %3350 = vmatpush1.bf16.msra.mxu1 %v9784_v34  ;;  %10990 = vst [vmem:[#allocation49_spill] sm:$0xff] %v9876_v9  ;;  %10992 = vst [vmem:[#allocation52_spill] sm:$0xff] %v9880_v33 }
 0x480   :  { %3310 = vmatprep.subr.bf16.mxu0 %v9789_v24  ;;  %3351 = vmatprep.subr.bf16.mxu1 %v9791_v48  ;;  %8486 = vtanh.f32 %v9793_v61 }
 0x483   :  { %3311 = vmatpush1.bf16.msra.mxu0 %v9797_v59  ;;  %3352 = vmatpush1.bf16.msra.mxu1 %v9799_v36 }
 0x484   :  { %3312 = vmatprep.subr.bf16.mxu0 %v9803_v13  ;;  %3353 = vmatprep.subr.bf16.mxu1 %v9805_v42 }
 0x487   :  { %3313 = vmatpush1.bf16.msra.mxu0 %v9810_v47  ;;  %3354 = vmatpush1.bf16.msra.mxu1 %v9812_v58 }
 0x488   :  { %3314 = vmatprep.subr.bf16.mxu0 %v9816_v56  ;;  %3355 = vmatprep.subr.bf16.mxu1 %v9818_v10 }
 0x48a   :  { %v8487_v5 = vpop.eup %8486 }
 0x48b   :  { %3315 = vmatpush1.bf16.msra.mxu0 %v9822_v3  ;;  %3356 = vmatpush1.bf16.msra.mxu1 %v9824_v7  ;;  %v9830_v21 = vmul.f32 %v8487_v5, %v8485_v4  ;;  %v9886_v4 = vld [vmem:[#allocation6 + $0x80] ss:$16 sps:$4 sm:$0xff]   ;;  %v9888_v5 = vld [vmem:[#allocation6 + $0x84] ss:$16 sps:$4 sm:$0xff]  }
 0x48c   :  { %3590 = vmatprep.subr.bf16.mxu0 %v9838_v49  ;;  %3631 = vmatprep.subr.bf16.mxu1 %v9840_v22  ;;  %10993 = vst [vmem:[#allocation54_spill] sm:$0xff] %v9886_v4  ;;  %10994 = vst [vmem:[#allocation51_spill] sm:$0xff] %v9888_v5 }
 0x48d   :  { %10979 = vst [vmem:[#allocation16_spill] sm:$0xff] %v9830_v21  ;;  %v2899_v6 = vpack.c.bf16 %v9830_v21, %v9830_v21  ;;  %v9892_v21 = vld [vmem:[#allocation6 + $0x8c] ss:$16 sps:$4 sm:$0xff]  }
 0x48e   :  { %10996 = vst [vmem:[#allocation55_spill] sm:$0xff] %v9892_v21 }
 0x48f   :  { %3316 = vmatprep.mubr.bf16.mxu0 %v2899_v6  ;;  %3357 = vmatprep.mubr.bf16.mxu1 %v2899_v6  ;;  %v9890_v6 = vld [vmem:[#allocation6 + $0x88] ss:$16 sps:$4 sm:$0xff]  }
 0x490   :  { %3317 = vmatmul.mubr.bf16.vlgmr.msra.gmra.mrb[44].mxu0 %v9692_v18  ;;  %3358 = vmatmul.mubr.bf16.vlgmr.msra.gmra.mrb[44].mxu1 %v9692_v18  ;;  %v9850_v18 = vld [vmem:[#allocation6 + $0x24] ss:$16 sps:$4 sm:$0xff]   ;;  %10995 = vst [vmem:[#allocation53_spill] sm:$0xff] %v9890_v6 }
 0x491   :  { %3622 = vmatprep.mubr.bf16.mxu0 %v10926_v45  ;;  %3663 = vmatprep.mubr.bf16.mxu1 %v10926_v45  ;;  %10981 = vst [vmem:[#allocation18_spill] sm:$0xff] %v9850_v18 }
 0x492   :  { %3591 = vmatpush1.bf16.msra.mxu0 %v9842_v30  ;;  %3632 = vmatpush1.bf16.msra.mxu1 %v9844_v12 }
 0x493   :  { %3592 = vmatprep.subr.bf16.mxu0 %v9850_v18  ;;  %3633 = vmatprep.subr.bf16.mxu1 %v9852_v40 }
 0x496   :  { %3593 = vmatpush1.bf16.msra.mxu0 %v9854_v50  ;;  %3634 = vmatpush1.bf16.msra.mxu1 %v9856_v51 }
 0x497   :  { %3594 = vmatprep.subr.bf16.mxu0 %v9862_v23  ;;  %3635 = vmatprep.subr.bf16.mxu1 %v9864_v0 }
 0x49a   :  { %3595 = vmatpush1.bf16.msra.mxu0 %v9866_v14  ;;  %3636 = vmatpush1.bf16.msra.mxu1 %v9868_v2  ;;  %v9897_v2 = vld [vmem:[#allocation6 + $0xac] ss:$16 sps:$4 sm:$0xff]  }
 0x49b   :  { %3596 = vmatprep.subr.bf16.mxu0 %v9874_v25  ;;  %3637 = vmatprep.subr.bf16.mxu1 %v9876_v9  ;;  %10998 = vst [vmem:[#allocation57_spill] sm:$0xff] %v9897_v2  ;;  %v9908_v9 = vld [vmem:[#allocation6 + $0xc4] ss:$16 sps:$4 sm:$0xff]   ;;  %v9910_v25 = vld [vmem:[#allocation6 + $0xcc] ss:$16 sps:$4 sm:$0xff]  }
 0x49c   :  { %11001 = vst [vmem:[#allocation60_spill] sm:$0xff] %v9908_v9  ;;  %11002 = vst [vmem:[#allocation61_spill] sm:$0xff] %v9910_v25 }
 0x49e   :  { %3597 = vmatpush1.bf16.msra.mxu0 %v9878_v8  ;;  %3638 = vmatpush1.bf16.msra.mxu1 %v9880_v33  ;;  %v9902_v33 = vld [vmem:[#allocation6 + $0xa0] ss:$16 sps:$4 sm:$0xff]   ;;  %v9904_v8 = vld [vmem:[#allocation6 + $0xa8] ss:$16 sps:$4 sm:$0xff]  }
 0x49f   :  { %3598 = vmatprep.subr.bf16.mxu0 %v9888_v5  ;;  %3639 = vmatprep.subr.bf16.mxu1 %v9892_v21  ;;  %10999 = vst [vmem:[#allocation58_spill] sm:$0xff] %v9902_v33  ;;  %11000 = vst [vmem:[#allocation59_spill] sm:$0xff] %v9904_v8  ;;  %v9914_v21 = vld [vmem:[#allocation6 + $0xc0] ss:$16 sps:$4 sm:$0xff]  }
 0x4a0   :  { %11003 = vst [vmem:[#allocation62_spill] sm:$0xff] %v9914_v21 }
 0x4a2   :  { %3599 = vmatpush1.bf16.msra.mxu0 %v9886_v4  ;;  %3640 = vmatpush1.bf16.msra.mxu1 %v9890_v6  ;;  %v9916_v4 = vld [vmem:[#allocation6 + $0xc8] ss:$16 sps:$4 sm:$0xff]   ;;  %v9920_v6 = vld [vmem:[#allocation6 + $0xe4] ss:$16 sps:$4 sm:$0xff]  }
 0x4a3   :  { %3600 = vmatprep.subr.bf16.mxu0 %v9894_v35  ;;  %3641 = vmatprep.subr.bf16.mxu1 %v9897_v2  ;;  %11004 = vst [vmem:[#allocation63_spill] sm:$0xff] %v9916_v4  ;;  %11005 = vst [vmem:[#allocation64_spill] sm:$0xff] %v9920_v6  ;;  %v9922_v35 = vld [vmem:[#allocation6 + $0xec] ss:$16 sps:$4 sm:$0xff]   ;;  %v9926_v2 = vld [vmem:[#allocation6 + $0xe0] ss:$16 sps:$4 sm:$0xff]  }
 0x4a4   :  { %11006 = vst [vmem:[#allocation65_spill] sm:$0xff] %v9922_v35  ;;  %11007 = vst [vmem:[#allocation66_spill] sm:$0xff] %v9926_v2 }
 0x4a6   :  { %3601 = vmatpush1.bf16.msra.mxu0 %v9902_v33  ;;  %3642 = vmatpush1.bf16.msra.mxu1 %v9904_v8  ;;  %v9928_v33 = vld [vmem:[#allocation6 + $0xe8] ss:$16 sps:$4 sm:$0xff]  }
 0x4a7   :  { %3602 = vmatprep.subr.bf16.mxu0 %v9908_v9  ;;  %3643 = vmatprep.subr.bf16.mxu1 %v9910_v25  ;;  %11008 = vst [vmem:[#allocation67_spill] sm:$0xff] %v9928_v33  ;;  %v9934_v25 = vld [vmem:[#allocation8 + $0x4] ss:$16 sps:$4 sm:$0xff]   ;;  %v9936_v9 = vld [vmem:[#allocation8 + $0xc] ss:$16 sps:$4 sm:$0xff]  }
 0x4a8   :  { %11009 = vst [vmem:[#allocation68_spill] sm:$0xff] %v9934_v25  ;;  %11010 = vst [vmem:[#allocation27_spill] sm:$0xff] %v9936_v9  ;;  %v11012_v8 = vld [vmem:[#allocation32_spill] sm:$0xff] }
 0x4aa   :  { %3603 = vmatpush1.bf16.msra.mxu0 %v9914_v21  ;;  %3644 = vmatpush1.bf16.msra.mxu1 %v9916_v4  ;;  %v11011_v4 = vld [vmem:[#allocation31_spill] sm:$0xff] }
 0x4ab   :  { %3604 = vmatprep.subr.bf16.mxu0 %v9920_v6  ;;  %3645 = vmatprep.subr.bf16.mxu1 %v9922_v35  ;;  %v209_v21 = vadd.f32 %v11011_v4, %v10955_v29  ;;  %v282_v6 = vadd.f32 %v11012_v8, %v10957_v41  ;;  %v11013_v35 = vld [vmem:[#allocation33_spill] sm:$0xff] }
 0x4ac   :  { %v211_v5 = vadd.f32 %v11013_v35, %v10959_v62 }
 0x4ae   :  { %3605 = vmatpush1.bf16.msra.mxu0 %v9926_v2  ;;  %3646 = vmatpush1.bf16.msra.mxu1 %v9928_v33  ;;  %v11014_v2 = vld [vmem:[#allocation34_spill] sm:$0xff] }
 0x4af   :  { %4085 = vmatprep.subr.bf16.mxu0 %v9934_v25  ;;  %4126 = vmatprep.subr.bf16.mxu1 %v9936_v9  ;;  %v284_v33 = vadd.f32 %v11014_v2, %v9016_v11 }
 0x521   :  { %v2823_v14 = vpop.f32.mrb[40].mxu0  ;;  %v2864_v0 = vpop.f32.mrb[40].mxu1 }
 0x522   :  { %v2871_v23 = vadd.f32 %v2823_v14, %v209_v21  ;;  %v2873_v51 = vadd.f32 %v2864_v0, %v282_v6  ;;  %v2825_v50 = vpop.f32.mrb[41].mxu0  ;;  %v2866_v25 = vpop.f32.mrb[41].mxu1  ;;  %v9968_v6 = vld [vmem:[#allocation8 + $0x28] ss:$16 sps:$4 sm:$0xff]  }
 0x523   :  { %v2872_v45 = vadd.f32 %v2825_v50, %v211_v5  ;;  %v2874_v9 = vadd.f32 %v2866_v25, %v284_v33  ;;  %v2827_v40 = vpop.f32.mrb[42].mxu0  ;;  %v2868_v18 = vpop.f32.mrb[42].mxu1  ;;  %v9958_v33 = vld [vmem:[#allocation8 + $0x24] ss:$16 sps:$4 sm:$0xff]   ;;  %v9960_v5 = vld [vmem:[#allocation8 + $0x2c] ss:$16 sps:$4 sm:$0xff]  }
 0x524   :  { %v7190_v4 = vmul.f32 -1.442695, %v2871_v23  ;;  %v2828_v29 = vpop.f32.mrb[43].mxu0  ;;  %v2869_v12 = vpop.f32.mrb[43].mxu1  ;;  %11015 = vst [vmem:[#allocation28_spill] sm:$0xff] %v9960_v5  ;;  %11017 = vst [vmem:[#allocation30_spill] sm:$0xff] %v9968_v6 }
 0x525   :  { %v7191_v8 = vmul.f32 -1.442695, %v2872_v45  ;;  %v7192_v35 = vmul.f32 -1.442695, %v2874_v9 }
 0x526   :  { %8488 = vpow2.f32 %v7190_v4  ;;  %v9972_v4 = vld [vmem:[#allocation8 + $0x44] ss:$16 sps:$4 sm:$0xff]  }
 0x527   :  { %8490 = vpow2.f32 %v7191_v8  ;;  %11018 = vst [vmem:[#allocation69_spill] sm:$0xff] %v9972_v4  ;;  %v9974_v8 = vld [vmem:[#allocation8 + $0x4c] ss:$16 sps:$4 sm:$0xff]  }
 0x528   :  { %8492 = vpow2.f32 %v7192_v35  ;;  %11019 = vst [vmem:[#allocation70_spill] sm:$0xff] %v9974_v8  ;;  %v9978_v35 = vld [vmem:[#allocation8 + $0x40] ss:$16 sps:$4 sm:$0xff]  }
 0x529   :  { %8494 = vtanh.f32 %v2873_v51  ;;  %v9952_v51 = vld [vmem:[#allocation8] ss:$16 sps:$4 sm:$0xff]   ;;  %11020 = vst [vmem:[#allocation71_spill] sm:$0xff] %v9978_v35 }
 0x530   :  { %v8489_v62 = vpop.eup %8488 }
 0x531   :  { %v8491_v41 = vpop.eup %8490  ;;  %v2878_v2 = vadd.f32 1.0, %v8489_v62 }
 0x532   :  { %v2884_v21 = vadd.f32 1.0, %v8491_v41  ;;  %v8493_v0 = vpop.eup %8492  ;;  %v9954_v41 = vld [vmem:[#allocation8 + $0x8] ss:$16 sps:$4 sm:$0xff]  }
 0x533   :  { %8496 = vrcp.f32 %v2878_v2  ;;  %v8495_v50 = vpop.eup %8494  ;;  %v2891_v23 = vadd.f32 1.0, %v8493_v0  ;;  %v9980_v2 = vld [vmem:[#allocation8 + $0x48] ss:$16 sps:$4 sm:$0xff]   ;;  %v9986_v0 = vld [vmem:[#allocation8 + $0x6c] ss:$16 sps:$4 sm:$0xff]  }
 0x534   :  { %8498 = vrcp.f32 %v2884_v21  ;;  %11021 = vst [vmem:[#allocation72_spill] sm:$0xff] %v9980_v2  ;;  %v9984_v21 = vld [vmem:[#allocation8 + $0x64] ss:$16 sps:$4 sm:$0xff]   ;;  %11023 = vst [vmem:[#allocation74_spill] sm:$0xff] %v9986_v0 }
 0x535   :  { %8500 = vrcp.f32 %v2891_v23  ;;  %11022 = vst [vmem:[#allocation73_spill] sm:$0xff] %v9984_v21  ;;  %v10002_v23 = vld [vmem:[#allocation8 + $0x80] ss:$16 sps:$4 sm:$0xff]  }
 0x536   :  { %11028 = vst [vmem:[#allocation79_spill] sm:$0xff] %v10002_v23 }
 0x53d   :  { %v8497_v14 = vpop.eup %8496 }
 0x53e   :  { %v8499_v40 = vpop.eup %8498  ;;  %v2895_v18 = vmul.f32 %v8497_v14, %v8495_v50  ;;  %v9990_v50 = vld [vmem:[#allocation8 + $0x60] ss:$16 sps:$4 sm:$0xff]   ;;  %v9992_v14 = vld [vmem:[#allocation8 + $0x68] ss:$16 sps:$4 sm:$0xff]  }
 0x53f   :  { %v2894_v29 = vmul.f32 %v8499_v40, %v9689_v31  ;;  %v8501_v12 = vpop.eup %8500  ;;  %v9966_v31 = vld [vmem:[#allocation8 + $0x20] ss:$16 sps:$4 sm:$0xff]   ;;  %11024 = vst [vmem:[#allocation75_spill] sm:$0xff] %v9990_v50  ;;  %11025 = vst [vmem:[#allocation76_spill] sm:$0xff] %v9992_v14  ;;  %v9996_v40 = vld [vmem:[#allocation8 + $0x84] ss:$16 sps:$4 sm:$0xff]  }
 0x540   :  { %11016 = vst [vmem:[#allocation29_spill] sm:$0xff] %v9966_v31  ;;  %11026 = vst [vmem:[#allocation77_spill] sm:$0xff] %v9996_v40 }
 0x541   :  { %v9949_v45 = vadd.f32 %v2895_v18, %v2894_v29  ;;  %v9998_v18 = vld [vmem:[#allocation8 + $0x8c] ss:$16 sps:$4 sm:$0xff]   ;;  %v10004_v29 = vld [vmem:[#allocation8 + $0x88] ss:$16 sps:$4 sm:$0xff]  }
 0x542   :  { %11027 = vst [vmem:[#allocation78_spill] sm:$0xff] %v9998_v18  ;;  %11029 = vst [vmem:[#allocation80_spill] sm:$0xff] %v10004_v29 }
 0x543   :  { %8502 = vtanh.f32 %v9949_v45 }
 0x54d   :  { %v8503_v62 = vpop.eup %8502 }
 0x54e   :  { %v2898_v25 = vmul.f32 %v8503_v62, %v8501_v12  ;;  %v10008_v12 = vld [vmem:[#allocation8 + $0xa4] ss:$16 sps:$4 sm:$0xff]   ;;  %v10010_v62 = vld [vmem:[#allocation8 + $0xac] ss:$16 sps:$4 sm:$0xff]  }
 0x550   :  { %v9956_v9 = vpack.c.bf16 %v2898_v25, %v2898_v25 }
 0x552   :  { %3623 = vmatmul.mubr.bf16.vlgmr.msra.gmra.mrb[48].mxu0 %v9956_v9  ;;  %3664 = vmatmul.mubr.bf16.vlgmr.msra.gmra.mrb[48].mxu1 %v9956_v9 }
 0x553   :  { %4086 = vmatpush1.bf16.msra.mxu0 %v9952_v51  ;;  %4127 = vmatpush1.bf16.msra.mxu1 %v9954_v41 }
 0x554   :  { %4087 = vmatprep.subr.bf16.mxu0 %v9958_v33  ;;  %4128 = vmatprep.subr.bf16.mxu1 %v9960_v5 }
 0x557   :  { %4088 = vmatpush1.bf16.msra.mxu0 %v9966_v31  ;;  %4129 = vmatpush1.bf16.msra.mxu1 %v9968_v6 }
 0x558   :  { %4089 = vmatprep.subr.bf16.mxu0 %v9972_v4  ;;  %4130 = vmatprep.subr.bf16.mxu1 %v9974_v8 }
 0x55b   :  { %4090 = vmatpush1.bf16.msra.mxu0 %v9978_v35  ;;  %4131 = vmatpush1.bf16.msra.mxu1 %v9980_v2  ;;  %v10023_v35 = vld [vmem:[#allocation8 + $0xcc] ss:$16 sps:$4 sm:$0xff]  }
 0x55c   :  { %4091 = vmatprep.subr.bf16.mxu0 %v9984_v21  ;;  %4132 = vmatprep.subr.bf16.mxu1 %v9986_v0 }
 0x55f   :  { %4092 = vmatpush1.bf16.msra.mxu0 %v9990_v50  ;;  %4133 = vmatpush1.bf16.msra.mxu1 %v9992_v14  ;;  %v10014_v50 = vld [vmem:[#allocation8 + $0xa0] ss:$16 sps:$4 sm:$0xff]   ;;  %v10016_v14 = vld [vmem:[#allocation8 + $0xa8] ss:$16 sps:$4 sm:$0xff]  }
 0x560   :  { %4093 = vmatprep.subr.bf16.mxu0 %v9996_v40  ;;  %4134 = vmatprep.subr.bf16.mxu1 %v9998_v18  ;;  %v10021_v18 = vld [vmem:[#allocation8 + $0xc4] ss:$16 sps:$4 sm:$0xff]  }
 0x563   :  { %v3318_v25 = vpop.f32.mrb[44].mxu0  ;;  %v3359_v0 = vpop.f32.mrb[44].mxu1  ;;  %4094 = vmatpush1.bf16.msra.mxu0 %v10002_v23  ;;  %4135 = vmatpush1.bf16.msra.mxu1 %v10004_v29 }
 0x564   :  { %v3319_v21 = vadd.f32 %v3318_v25, %v9227_v52  ;;  %v3320_v2 = vpop.f32.mrb[45].mxu0  ;;  %v3361_v40 = vpop.f32.mrb[45].mxu1  ;;  %4095 = vmatprep.subr.bf16.mxu0 %v10008_v12  ;;  %4136 = vmatprep.subr.bf16.mxu1 %v10010_v62  ;;  %v10028_v25 = vld [vmem:[#allocation8 + $0xc0] ss:$16 sps:$4 sm:$0xff]   ;;  %v10030_v52 = vld [vmem:[#allocation8 + $0xc8] ss:$16 sps:$4 sm:$0xff]  }
 0x565   :  { %v3321_v23 = vadd.f32 %v3320_v2, %v9232_v53  ;;  %v3322_v8 = vpop.f32.mrb[46].mxu0  ;;  %v3363_v29 = vpop.f32.mrb[46].mxu1  ;;  %v10034_v2 = vld [vmem:[#allocation8 + $0xe4] ss:$16 sps:$4 sm:$0xff]  }
 0x566   :  { %v7257_v4 = vmul.f32 -1.442695, %v3319_v21  ;;  %v3323_v6 = vpop.f32.mrb[47].mxu0  ;;  %v3364_v31 = vpop.f32.mrb[47].mxu1  ;;  %v10036_v8 = vld [vmem:[#allocation8 + $0xec] ss:$16 sps:$4 sm:$0xff]  }
 0x567   :  { %v7258_v5 = vmul.f32 -1.442695, %v3321_v23  ;;  %4096 = vmatpush1.bf16.msra.mxu0 %v10014_v50  ;;  %4137 = vmatpush1.bf16.msra.mxu1 %v10016_v14  ;;  %v3362_v31 = vadd.f32 %v3361_v40, %v10976_v63  ;;  %v10041_v6 = vld [vmem:[#allocation8 + $0xe0] ss:$16 sps:$4 sm:$0xff]   ;;  %v10043_v21 = vld [vmem:[#allocation8 + $0xe8] ss:$16 sps:$4 sm:$0xff]  }
 0x568   :  { %8504 = vpow2.f32 %v7257_v4  ;;  %4097 = vmatprep.subr.bf16.mxu0 %v10021_v18  ;;  %4138 = vmatprep.subr.bf16.mxu1 %v10023_v35 }
 0x569   :  { %8506 = vpow2.f32 %v7258_v5  ;;  %v7259_v4 = vmul.f32 -1.442695, %v3362_v31  ;;  %v3360_v5 = vadd.f32 %v3359_v0, %v9246_v44  ;;  %v11056_v0 = vld [vmem:[#allocation63_spill] sm:$0xff] }
 0x56b   :  { %4098 = vmatpush1.bf16.msra.mxu0 %v10028_v25  ;;  %4139 = vmatpush1.bf16.msra.mxu1 %v10030_v52  ;;  %8508 = vpow2.f32 %v7259_v4  ;;  %v11057_v4 = vld [vmem:[#allocation64_spill] sm:$0xff] }
 0x56c   :  { %4099 = vmatprep.subr.bf16.mxu0 %v10034_v2  ;;  %4140 = vmatprep.subr.bf16.mxu1 %v10036_v8  ;;  %8510 = vtanh.f32 %v3360_v5  ;;  %v11058_v5 = vld [vmem:[#allocation65_spill] sm:$0xff] }
 0x56f   :  { %4100 = vmatpush1.bf16.msra.mxu0 %v10041_v6  ;;  %4141 = vmatpush1.bf16.msra.mxu1 %v10043_v21 }
 0x570   :  { %4101 = vmatprep.subr.bf16.mxu0 %v9727_v1  ;;  %4142 = vmatprep.subr.bf16.mxu1 %v9729_v17 }
 0x572   :  { %v8505_v40 = vpop.eup %8504 }
 0x573   :  { %v8507_v23 = vpop.eup %8506  ;;  %v3369_v29 = vadd.f32 1.0, %v8505_v40  ;;  %4102 = vmatpush1.bf16.msra.mxu0 %v9734_v26  ;;  %4143 = vmatpush1.bf16.msra.mxu1 %v9736_v43  ;;  %v11059_v40 = vld [vmem:[#allocation66_spill] sm:$0xff] }
 0x574   :  { %v3375_v31 = vadd.f32 1.0, %v8507_v23  ;;  %4103 = vmatprep.subr.bf16.mxu0 %v9740_v37  ;;  %4144 = vmatprep.subr.bf16.mxu1 %v9742_v54  ;;  %v11060_v23 = vld [vmem:[#allocation67_spill] sm:$0xff] }
 0x575   :  { %8512 = vrcp.f32 %v3369_v29  ;;  %v8509_v1 = vpop.eup %8508  ;;  %v11061_v29 = vld [vmem:[#allocation68_spill] sm:$0xff] }
 0x576   :  { %8514 = vrcp.f32 %v3375_v31  ;;  %v8511_v17 = vpop.eup %8510  ;;  %v3382_v54 = vadd.f32 1.0, %v8509_v1  ;;  %v11062_v31 = vld [vmem:[#allocation27_spill] sm:$0xff] }
 0x577   :  { %4104 = vmatpush1.bf16.msra.mxu0 %v9746_v20  ;;  %4145 = vmatpush1.bf16.msra.mxu1 %v9748_v38  ;;  %v11063_v1 = vld [vmem:[#allocation11_spill] sm:$0xff] }
 0x578   :  { %4105 = vmatprep.subr.bf16.mxu0 %v9752_v39  ;;  %4146 = vmatprep.subr.bf16.mxu1 %v9754_v46  ;;  %8516 = vrcp.f32 %v3382_v54 }
 0x57b   :  { %4106 = vmatpush1.bf16.msra.mxu0 %v9758_v60  ;;  %4147 = vmatpush1.bf16.msra.mxu1 %v9760_v32 }
 0x57c   :  { %4107 = vmatprep.subr.bf16.mxu0 %v9764_v27  ;;  %4148 = vmatprep.subr.bf16.mxu1 %v9766_v15  ;;  %v11031_v27 = vld [vmem:[#allocation17_spill] sm:$0xff]  ;;  %v11032_v15 = vld [vmem:[#allocation18_spill] sm:$0xff] }
 0x57f   :  { %v8513_v26 = vpop.eup %8512  ;;  %4108 = vmatpush1.bf16.msra.mxu0 %v9770_v16  ;;  %4149 = vmatpush1.bf16.msra.mxu1 %v9772_v19  ;;  %v11033_v16 = vld [vmem:[#allocation19_spill] sm:$0xff]  ;;  %v11034_v19 = vmov 0  }
 0x580   :  { %v8515_v43 = vpop.eup %8514  ;;  %v3386_v37 = vmul.f32 %v8513_v26, %v8511_v17  ;;  %4109 = vmatprep.subr.bf16.mxu0 %v9776_v55  ;;  %4150 = vmatprep.subr.bf16.mxu1 %v9778_v57  ;;  %v11035_v55 = vld [vmem:[#allocation20_spill] sm:$0xff]  ;;  %v11036_v57 = vld [vmem:[#allocation21_spill] sm:$0xff]  ;;  %v11064_v17 = vld [vmem:[#allocation35_spill] sm:$0xff] }
 0x581   :  { %v3385_v20 = vmul.f32 %v8515_v43, %v9793_v61  ;;  %v11041_v61 = vld [vmem:[#allocation26_spill] sm:$0xff]  ;;  %v213_v26 = vadd.f32 %v11064_v17, %v11063_v1 }
 0x582   :  { %v8517_v39 = vpop.eup %8516  ;;  %v11065_v43 = vld [vmem:[#allocation14_spill] sm:$0xff] }
 0x583   :  { %v10069_v38 = vadd.f32 %v3386_v37, %v3385_v20  ;;  %4110 = vmatpush1.bf16.msra.mxu0 %v9782_v28  ;;  %4151 = vmatpush1.bf16.msra.mxu1 %v9784_v34  ;;  %v11037_v28 = vld [vmem:[#allocation22_spill] sm:$0xff]  ;;  %v11038_v34 = vld [vmem:[#allocation23_spill] sm:$0xff]  ;;  %v11066_v37 = vld [vmem:[#allocation36_spill] sm:$0xff] }
 0x584   :  { %4111 = vmatprep.subr.bf16.mxu0 %v9789_v24  ;;  %4152 = vmatprep.subr.bf16.mxu1 %v9791_v48  ;;  %v11039_v24 = vld [vmem:[#allocation24_spill] sm:$0xff]  ;;  %v11040_v48 = vld [vmem:[#allocation25_spill] sm:$0xff]  ;;  %v286_v54 = vadd.f32 %v11066_v37, %v11065_v43  ;;  %v11072_v37 = vld [vmem:[#allocation30_spill] sm:$0xff] }
 0x585   :  { %8518 = vtanh.f32 %v10069_v38  ;;  %v11067_v20 = vld [vmem:[#allocation12_spill] sm:$0xff] }
 0x587   :  { %4112 = vmatpush1.bf16.msra.mxu0 %v9797_v59  ;;  %4153 = vmatpush1.bf16.msra.mxu1 %v9799_v36  ;;  %v11042_v59 = vld [vmem:[#allocation49_spill] sm:$0xff]  ;;  %v11043_v36 = vld [vmem:[#allocation50_spill] sm:$0xff] }
 0x588   :  { %4113 = vmatprep.subr.bf16.mxu0 %v9803_v13  ;;  %4154 = vmatprep.subr.bf16.mxu1 %v9805_v42  ;;  %v11044_v13 = vld [vmem:[#allocation52_spill] sm:$0xff]  ;;  %v11045_v42 = vld [vmem:[#allocation51_spill] sm:$0xff] }
 0x58b   :  { %4114 = vmatpush1.bf16.msra.mxu0 %v9810_v47  ;;  %4155 = vmatpush1.bf16.msra.mxu1 %v9812_v58  ;;  %v11046_v47 = vld [vmem:[#allocation55_spill] sm:$0xff]  ;;  %v11047_v58 = vld [vmem:[#allocation54_spill] sm:$0xff] }
 0x58c   :  { %4115 = vmatprep.subr.bf16.mxu0 %v9816_v56  ;;  %4156 = vmatprep.subr.bf16.mxu1 %v9818_v10  ;;  %v11048_v56 = vld [vmem:[#allocation53_spill] sm:$0xff]  ;;  %v11049_v10 = vld [vmem:[#allocation56_spill] sm:$0xff] }
 0x58f   :  { %v8519_v46 = vpop.eup %8518  ;;  %4116 = vmatpush1.bf16.msra.mxu0 %v9822_v3  ;;  %4157 = vmatpush1.bf16.msra.mxu1 %v9824_v7  ;;  %v11050_v3 = vld [vmem:[#allocation57_spill] sm:$0xff]  ;;  %v11051_v7 = vld [vmem:[#allocation58_spill] sm:$0xff] }
 0x590   :  { %v10086_v60 = vmul.f32 %v8519_v46, %v8517_v39  ;;  %4391 = vmatprep.subr.bf16.mxu0 %v9838_v49  ;;  %4432 = vmatprep.subr.bf16.mxu1 %v9840_v22  ;;  %v11052_v49 = vld [vmem:[#allocation59_spill] sm:$0xff]  ;;  %v11053_v22 = vld [vmem:[#allocation60_spill] sm:$0xff]  ;;  %v11068_v39 = vld [vmem:[#allocation37_spill] sm:$0xff] }
 0x591   :  { %v215_v46 = vadd.f32 %v11068_v39, %v11067_v20  ;;  %v11074_v39 = vld [vmem:[#allocation70_spill] sm:$0xff] }
 0x592   :  { %11030 = vst [vmem:[#allocation81_spill] sm:$0xff] %v10086_v60  ;;  %v3700_v32 = vpack.c.bf16 %v10086_v60, %v10086_v60 }
 0x594   :  { %4117 = vmatprep.mubr.bf16.mxu0 %v3700_v32  ;;  %4158 = vmatprep.mubr.bf16.mxu1 %v3700_v32  ;;  %v11069_v32 = vld [vmem:[#allocation38_spill] sm:$0xff] }
 0x595   :  { %4118 = vmatmul.mubr.bf16.vlgmr.msra.gmra.mrb[52].mxu0 %v9956_v9  ;;  %4159 = vmatmul.mubr.bf16.vlgmr.msra.gmra.mrb[52].mxu1 %v9956_v9  ;;  %v11055_v9 = vld [vmem:[#allocation62_spill] sm:$0xff] }
 0x596   :  { %4392 = vmatpush1.bf16.msra.mxu0 %v9842_v30  ;;  %4433 = vmatpush1.bf16.msra.mxu1 %v11031_v27  ;;  %v11054_v30 = vld [vmem:[#allocation61_spill] sm:$0xff]  ;;  %v288_v27 = vadd.f32 %v11069_v32, %v9016_v11  ;;  %v11076_v32 = vld [vmem:[#allocation72_spill] sm:$0xff] }
 0x597   :  { %4393 = vmatprep.subr.bf16.mxu0 %v11032_v15  ;;  %4434 = vmatprep.subr.bf16.mxu1 %v11033_v16 }
 0x598   :  { %4423 = vmatprep.mubr.bf16.mxu0 %v11034_v19  ;;  %4464 = vmatprep.mubr.bf16.mxu1 %v11034_v19 }
 0x59a   :  { %4394 = vmatpush1.bf16.msra.mxu0 %v11035_v55  ;;  %4435 = vmatpush1.bf16.msra.mxu1 %v11036_v57 }
 0x59b   :  { %4395 = vmatprep.subr.bf16.mxu0 %v11037_v28  ;;  %4436 = vmatprep.subr.bf16.mxu1 %v11038_v34 }
 0x59e   :  { %4396 = vmatpush1.bf16.msra.mxu0 %v11039_v24  ;;  %4437 = vmatpush1.bf16.msra.mxu1 %v11040_v48 }
 0x59f   :  { %4397 = vmatprep.subr.bf16.mxu0 %v11041_v61  ;;  %4438 = vmatprep.subr.bf16.mxu1 %v11042_v59 }
 0x5a2   :  { %4398 = vmatpush1.bf16.msra.mxu0 %v11043_v36  ;;  %4439 = vmatpush1.bf16.msra.mxu1 %v11044_v13 }
 0x5a3   :  { %4399 = vmatprep.subr.bf16.mxu0 %v11045_v42  ;;  %4440 = vmatprep.subr.bf16.mxu1 %v11046_v47 }
 0x5a6   :  { %4400 = vmatpush1.bf16.msra.mxu0 %v11047_v58  ;;  %4441 = vmatpush1.bf16.msra.mxu1 %v11048_v56 }
 0x5a7   :  { %4401 = vmatprep.subr.bf16.mxu0 %v11049_v10  ;;  %4442 = vmatprep.subr.bf16.mxu1 %v11050_v3 }
 0x5aa   :  { %4402 = vmatpush1.bf16.msra.mxu0 %v11051_v7  ;;  %4443 = vmatpush1.bf16.msra.mxu1 %v11052_v49 }
 0x5ab   :  { %4403 = vmatprep.subr.bf16.mxu0 %v11053_v22  ;;  %4444 = vmatprep.subr.bf16.mxu1 %v11054_v30 }
 0x5ae   :  { %4404 = vmatpush1.bf16.msra.mxu0 %v11055_v9  ;;  %4445 = vmatpush1.bf16.msra.mxu1 %v11056_v0 }
 0x5af   :  { %4405 = vmatprep.subr.bf16.mxu0 %v11057_v4  ;;  %4446 = vmatprep.subr.bf16.mxu1 %v11058_v5 }
 0x5b2   :  { %4406 = vmatpush1.bf16.msra.mxu0 %v11059_v40  ;;  %4447 = vmatpush1.bf16.msra.mxu1 %v11060_v23 }
 0x5b3   :  { %4886 = vmatprep.subr.bf16.mxu0 %v11061_v29  ;;  %4927 = vmatprep.subr.bf16.mxu1 %v11062_v31 }
 0x625   :  { %v3624_v15 = vpop.f32.mrb[48].mxu0  ;;  %v3665_v16 = vpop.f32.mrb[48].mxu1 }
 0x626   :  { %v3672_v55 = vadd.f32 %v3624_v15, %v213_v26  ;;  %v3674_v57 = vadd.f32 %v3665_v16, %v286_v54  ;;  %v3626_v28 = vpop.f32.mrb[49].mxu0  ;;  %v3667_v34 = vpop.f32.mrb[49].mxu1  ;;  %v11071_v26 = vld [vmem:[#allocation29_spill] sm:$0xff]  ;;  %v11082_v16 = vld [vmem:[#allocation78_spill] sm:$0xff] }
 0x627   :  { %v3673_v24 = vadd.f32 %v3626_v28, %v215_v46  ;;  %v3675_v48 = vadd.f32 %v3667_v34, %v288_v27  ;;  %v3628_v61 = vpop.f32.mrb[50].mxu0  ;;  %v3669_v59 = vpop.f32.mrb[50].mxu1  ;;  %v11073_v54 = vld [vmem:[#allocation69_spill] sm:$0xff]  ;;  %v11075_v46 = vld [vmem:[#allocation71_spill] sm:$0xff] }
 0x628   :  { %v7292_v36 = vmul.f32 -1.442695, %v3672_v55  ;;  %v3629_v13 = vpop.f32.mrb[51].mxu0  ;;  %v3670_v42 = vpop.f32.mrb[51].mxu1  ;;  %v11077_v27 = vld [vmem:[#allocation73_spill] sm:$0xff]  ;;  %v11083_v55 = vld [vmem:[#allocation79_spill] sm:$0xff] }
 0x629   :  { %v7293_v47 = vmul.f32 -1.442695, %v3673_v24  ;;  %v7294_v58 = vmul.f32 -1.442695, %v3675_v48  ;;  %v11081_v15 = vld [vmem:[#allocation77_spill] sm:$0xff]  ;;  %v11085_v24 = vld [vmem:[#allocation47_spill] sm:$0xff] }
 0x62a   :  { %8520 = vpow2.f32 %v7292_v36 }
 0x62b   :  { %8522 = vpow2.f32 %v7293_v47 }
 0x62c   :  { %8524 = vpow2.f32 %v7294_v58 }
 0x62d   :  { %8526 = vtanh.f32 %v3674_v57  ;;  %v11084_v57 = vld [vmem:[#allocation80_spill] sm:$0xff] }
 0x634   :  { %v8521_v56 = vpop.eup %8520 }
 0x635   :  { %v8523_v10 = vpop.eup %8522  ;;  %v3679_v3 = vadd.f32 1.0, %v8521_v56 }
 0x636   :  { %v3685_v7 = vadd.f32 1.0, %v8523_v10  ;;  %v8525_v49 = vpop.eup %8524 }
 0x637   :  { %8528 = vrcp.f32 %v3679_v3  ;;  %v8527_v22 = vpop.eup %8526  ;;  %v3692_v4 = vadd.f32 1.0, %v8525_v49  ;;  %v10200_v49 = vld [vmem:[#allocation8 + $0x144] ss:$16 sps:$4 sm:$0xff]  }
 0x638   :  { %8530 = vrcp.f32 %v3685_v7 }
 0x639   :  { %8532 = vrcp.f32 %v3692_v4  ;;  %v10212_v4 = vld [vmem:[#allocation8 + $0x164] ss:$16 sps:$4 sm:$0xff]  }
 0x641   :  { %v8529_v30 = vpop.eup %8528 }
 0x642   :  { %v8531_v9 = vpop.eup %8530  ;;  %v3696_v0 = vmul.f32 %v8529_v30, %v8527_v22  ;;  %v10202_v22 = vld [vmem:[#allocation8 + $0x14c] ss:$16 sps:$4 sm:$0xff]  }
 0x643   :  { %v3695_v5 = vmul.f32 %v8531_v9, %v9949_v45  ;;  %v8533_v23 = vpop.eup %8532  ;;  %v11070_v45 = vld [vmem:[#allocation28_spill] sm:$0xff]  ;;  %v10206_v9 = vld [vmem:[#allocation8 + $0x140] ss:$16 sps:$4 sm:$0xff]  }
 0x645   :  { %v10137_v40 = vadd.f32 %v3696_v0, %v3695_v5  ;;  %v10208_v0 = vld [vmem:[#allocation8 + $0x148] ss:$16 sps:$4 sm:$0xff]   ;;  %v10214_v5 = vld [vmem:[#allocation8 + $0x16c] ss:$16 sps:$4 sm:$0xff]  }
 0x647   :  { %8534 = vtanh.f32 %v10137_v40 }
 0x651   :  { %v8535_v29 = vpop.eup %8534 }
 0x652   :  { %v3699_v31 = vmul.f32 %v8535_v29, %v8533_v23  ;;  %v10218_v23 = vld [vmem:[#allocation8 + $0x160] ss:$16 sps:$4 sm:$0xff]   ;;  %v10220_v29 = vld [vmem:[#allocation8 + $0x168] ss:$16 sps:$4 sm:$0xff]  }
 0x654   :  { %v10140_v17 = vpack.c.bf16 %v3699_v31, %v3699_v31  ;;  %v10224_v31 = vld [vmem:[#allocation8 + $0x184] ss:$16 sps:$4 sm:$0xff]  }
 0x656   :  { %4424 = vmatmul.mubr.bf16.vlgmr.msra.gmra.mrb[56].mxu0 %v10140_v17  ;;  %4465 = vmatmul.mubr.bf16.vlgmr.msra.gmra.mrb[56].mxu1 %v10140_v17 }
 0x657   :  { %4887 = vmatpush1.bf16.msra.mxu0 %v9952_v51  ;;  %4928 = vmatpush1.bf16.msra.mxu1 %v9954_v41  ;;  %v11078_v51 = vld [vmem:[#allocation74_spill] sm:$0xff]  ;;  %v11079_v41 = vld [vmem:[#allocation75_spill] sm:$0xff] }
 0x658   :  { %4888 = vmatprep.subr.bf16.mxu0 %v9958_v33  ;;  %4929 = vmatprep.subr.bf16.mxu1 %v11070_v45  ;;  %v11080_v33 = vld [vmem:[#allocation76_spill] sm:$0xff] }
 0x659   :  { %v10226_v45 = vld [vmem:[#allocation8 + $0x18c] ss:$16 sps:$4 sm:$0xff]  }
 0x65b   :  { %4889 = vmatpush1.bf16.msra.mxu0 %v11071_v26  ;;  %4930 = vmatpush1.bf16.msra.mxu1 %v11072_v37 }
 0x65c   :  { %4890 = vmatprep.subr.bf16.mxu0 %v11073_v54  ;;  %4931 = vmatprep.subr.bf16.mxu1 %v11074_v39  ;;  %v10230_v54 = vld [vmem:[#allocation8 + $0x180] ss:$16 sps:$4 sm:$0xff]   ;;  %v10232_v39 = vld [vmem:[#allocation8 + $0x188] ss:$16 sps:$4 sm:$0xff]  }
 0x65f   :  { %4891 = vmatpush1.bf16.msra.mxu0 %v11075_v46  ;;  %4932 = vmatpush1.bf16.msra.mxu1 %v11076_v32  ;;  %v10236_v32 = vld [vmem:[#allocation8 + $0x1a4] ss:$16 sps:$4 sm:$0xff]  }
 0x660   :  { %4892 = vmatprep.subr.bf16.mxu0 %v11077_v27  ;;  %4933 = vmatprep.subr.bf16.mxu1 %v11078_v51  ;;  %v10238_v27 = vld [vmem:[#allocation8 + $0x1ac] ss:$16 sps:$4 sm:$0xff]  }
 0x663   :  { %4893 = vmatpush1.bf16.msra.mxu0 %v11079_v41  ;;  %4934 = vmatpush1.bf16.msra.mxu1 %v11080_v33 }
 0x664   :  { %4894 = vmatprep.subr.bf16.mxu0 %v11081_v15  ;;  %4935 = vmatprep.subr.bf16.mxu1 %v11082_v16  ;;  %v10243_v16 = vld [vmem:[#allocation8 + $0x1a0] ss:$16 sps:$4 sm:$0xff]  }
 0x667   :  { %4895 = vmatpush1.bf16.msra.mxu0 %v11083_v55  ;;  %4936 = vmatpush1.bf16.msra.mxu1 %v11084_v57  ;;  %v10245_v55 = vld [vmem:[#allocation8 + $0x1a8] ss:$16 sps:$4 sm:$0xff]  }
 0x668   :  { %v4119_v28 = vpop.f32.mrb[52].mxu0  ;;  %v4160_v34 = vpop.f32.mrb[52].mxu1  ;;  %4896 = vmatprep.subr.bf16.mxu0 %v10008_v12  ;;  %4937 = vmatprep.subr.bf16.mxu1 %v10010_v62 }
 0x669   :  { %v4120_v48 = vadd.f32 %v4119_v28, %v11085_v24  ;;  %v4121_v61 = vpop.f32.mrb[53].mxu0  ;;  %v4162_v59 = vpop.f32.mrb[53].mxu1  ;;  %v10251_v28 = vld [vmem:[#allocation8 + $0x1c4] ss:$16 sps:$4 sm:$0xff]  }
 0x66a   :  { %v4122_v36 = vadd.f32 %v4121_v61, %v9232_v53  ;;  %v4123_v13 = vpop.f32.mrb[54].mxu0  ;;  %v4164_v42 = vpop.f32.mrb[54].mxu1  ;;  %v4163_v12 = vadd.f32 %v4162_v59, %v10976_v63  ;;  %v10264_v61 = vld [vmem:[#allocation8 + $0x1e4] ss:$16 sps:$4 sm:$0xff]   ;;  %v10266_v59 = vld [vmem:[#allocation8 + $0x1ec] ss:$16 sps:$4 sm:$0xff]  }
 0x66b   :  { %v7359_v47 = vmul.f32 -1.442695, %v4120_v48  ;;  %v4124_v58 = vpop.f32.mrb[55].mxu0  ;;  %v4165_v56 = vpop.f32.mrb[55].mxu1  ;;  %4897 = vmatpush1.bf16.msra.mxu0 %v10014_v50  ;;  %4938 = vmatpush1.bf16.msra.mxu1 %v10016_v14  ;;  %v10175_v50 = vld [vmem:[#allocation8 + $0x104] ss:$16 sps:$4 sm:$0xff]  }
 0x66c   :  { %v7360_v10 = vmul.f32 -1.442695, %v4122_v36  ;;  %4898 = vmatprep.subr.bf16.mxu0 %v10021_v18  ;;  %4939 = vmatprep.subr.bf16.mxu1 %v10023_v35  ;;  %v10177_v14 = vld [vmem:[#allocation8 + $0x10c] ss:$16 sps:$4 sm:$0xff]   ;;  %v10181_v35 = vld [vmem:[#allocation8 + $0x100] ss:$16 sps:$4 sm:$0xff]  }
 0x66d   :  { %8536 = vpow2.f32 %v7359_v47  ;;  %v10183_v18 = vld [vmem:[#allocation8 + $0x108] ss:$16 sps:$4 sm:$0xff]   ;;  %v7361_v62 = vmul.f32 -1.442695, %v4163_v12  ;;  %v10270_v36 = vld [vmem:[#allocation8 + $0x1e0] ss:$16 sps:$4 sm:$0xff]  }
 0x66e   :  { %8538 = vpow2.f32 %v7360_v10  ;;  %v10260_v48 = vld [vmem:[#allocation8 + $0x1c8] ss:$16 sps:$4 sm:$0xff]   ;;  %v8210_v10 = vld [vmem:[#allocation6 + $0x4] ss:$16 sps:$4 sm:$0xff]   ;;  %v8213_v12 = vld [vmem:[#allocation6 + $0xc] ss:$16 sps:$4 sm:$0xff]  }
 0x66f   :  { %4899 = vmatpush1.bf16.msra.mxu0 %v10028_v25  ;;  %4940 = vmatpush1.bf16.msra.mxu1 %v10030_v52  ;;  %v10187_v52 = vld [vmem:[#allocation8 + $0x124] ss:$16 sps:$4 sm:$0xff]   ;;  %v10189_v25 = vld [vmem:[#allocation8 + $0x12c] ss:$16 sps:$4 sm:$0xff]   ;;  %8540 = vpow2.f32 %v7361_v62  ;;  %v10272_v13 = vld [vmem:[#allocation8 + $0x1e8] ss:$16 sps:$4 sm:$0xff]  }
 0x670   :  { %4900 = vmatprep.subr.bf16.mxu0 %v10034_v2  ;;  %4941 = vmatprep.subr.bf16.mxu1 %v10036_v8  ;;  %v4161_v2 = vadd.f32 %v4160_v34, %v9246_v44  ;;  %v10253_v34 = vld [vmem:[#allocation8 + $0x1cc] ss:$16 sps:$4 sm:$0xff]   ;;  %v8208_v62 = vld [vmem:[#allocation6] ss:$16 sps:$4 sm:$0xff]  }
 0x672   :  { %8542 = vtanh.f32 %v4161_v2  ;;  %v8211_v2 = vld [vmem:[#allocation6 + $0x8] ss:$16 sps:$4 sm:$0xff]  }
 0x673   :  { %4901 = vmatpush1.bf16.msra.mxu0 %v10041_v6  ;;  %4942 = vmatpush1.bf16.msra.mxu1 %v10043_v21  ;;  %v10194_v6 = vld [vmem:[#allocation8 + $0x120] ss:$16 sps:$4 sm:$0xff]   ;;  %v10196_v21 = vld [vmem:[#allocation8 + $0x128] ss:$16 sps:$4 sm:$0xff]  }
 0x674   :  { %4902 = vmatprep.subr.bf16.mxu0 %v10175_v50  ;;  %4943 = vmatprep.subr.bf16.mxu1 %v10177_v14 }
 0x677   :  { %v8537_v8 = vpop.eup %8536  ;;  %4903 = vmatpush1.bf16.msra.mxu0 %v10181_v35  ;;  %4944 = vmatpush1.bf16.msra.mxu1 %v10183_v18 }
 0x678   :  { %v8539_v3 = vpop.eup %8538  ;;  %v4170_v7 = vadd.f32 1.0, %v8537_v8  ;;  %4904 = vmatprep.subr.bf16.mxu0 %v10187_v52  ;;  %4945 = vmatprep.subr.bf16.mxu1 %v10189_v25  ;;  %v8216_v8 = vld [vmem:[#allocation6 + $0x24] ss:$16 sps:$4 sm:$0xff]  }
 0x679   :  { %v4176_v30 = vadd.f32 1.0, %v8539_v3  ;;  %v8541_v26 = vpop.eup %8540  ;;  %v8219_v3 = vld [vmem:[#allocation6 + $0x2c] ss:$16 sps:$4 sm:$0xff]  }
 0x67a   :  { %8544 = vrcp.f32 %v4170_v7  ;;  %v4183_v33 = vadd.f32 1.0, %v8541_v26  ;;  %v8214_v7 = vld [vmem:[#allocation6 + $0x20] ss:$16 sps:$4 sm:$0xff]   ;;  %v8225_v26 = vld [vmem:[#allocation6 + $0x4c] ss:$16 sps:$4 sm:$0xff]  }
 0x67b   :  { %8546 = vrcp.f32 %v4176_v30  ;;  %4905 = vmatpush1.bf16.msra.mxu0 %v10194_v6  ;;  %4946 = vmatpush1.bf16.msra.mxu1 %v10196_v21  ;;  %v8217_v30 = vld [vmem:[#allocation6 + $0x28] ss:$16 sps:$4 sm:$0xff]  }
 0x67c   :  { %4906 = vmatprep.subr.bf16.mxu0 %v10200_v49  ;;  %4947 = vmatprep.subr.bf16.mxu1 %v10202_v22  ;;  %v8543_v37 = vpop.eup %8542  ;;  %8548 = vrcp.f32 %v4183_v33  ;;  %v8229_v33 = vld [vmem:[#allocation6 + $0x68] ss:$16 sps:$4 sm:$0xff]  }
 0x67f   :  { %4907 = vmatpush1.bf16.msra.mxu0 %v10206_v9  ;;  %4948 = vmatpush1.bf16.msra.mxu1 %v10208_v0 }
 0x680   :  { %4908 = vmatprep.subr.bf16.mxu0 %v10212_v4  ;;  %4949 = vmatprep.subr.bf16.mxu1 %v10214_v5 }
 0x683   :  { %4909 = vmatpush1.bf16.msra.mxu0 %v10218_v23  ;;  %4950 = vmatpush1.bf16.msra.mxu1 %v10220_v29 }
 0x684   :  { %v8545_v46 = vpop.eup %8544  ;;  %4910 = vmatprep.subr.bf16.mxu0 %v10224_v31  ;;  %4951 = vmatprep.subr.bf16.mxu1 %v10226_v45 }
 0x685   :  { %v8547_v51 = vpop.eup %8546  ;;  %v4187_v41 = vmul.f32 %v8545_v46, %v8543_v37  ;;  %v8220_v37 = vld [vmem:[#allocation6 + $0x40] ss:$16 sps:$4 sm:$0xff]   ;;  %v8228_v46 = vld [vmem:[#allocation6 + $0x64] ss:$16 sps:$4 sm:$0xff]  }
 0x686   :  { %v4186_v15 = vmul.f32 %v8547_v51, %v10069_v38  ;;  %v10258_v38 = vld [vmem:[#allocation8 + $0x1c0] ss:$16 sps:$4 sm:$0xff]   ;;  %v8549_v42 = vpop.eup %8548  ;;  %v8231_v51 = vld [vmem:[#allocation6 + $0x6c] ss:$16 sps:$4 sm:$0xff]  }
 0x687   :  { %4911 = vmatpush1.bf16.msra.mxu0 %v10230_v54  ;;  %4952 = vmatpush1.bf16.msra.mxu1 %v10232_v39 }
 0x688   :  { %v10247_v57 = vadd.f32 %v4187_v41, %v4186_v15  ;;  %4912 = vmatprep.subr.bf16.mxu0 %v10236_v32  ;;  %4953 = vmatprep.subr.bf16.mxu1 %v10238_v27  ;;  %v8226_v41 = vld [vmem:[#allocation6 + $0x60] ss:$16 sps:$4 sm:$0xff]  }
 0x689   :  { %v8232_v15 = vld [vmem:[#allocation6 + $0x80] ss:$16 sps:$4 sm:$0xff]  }
 0x68a   :  { %8550 = vtanh.f32 %v10247_v57 }
 0x68b   :  { %4913 = vmatpush1.bf16.msra.mxu0 %v10243_v16  ;;  %4954 = vmatpush1.bf16.msra.mxu1 %v10245_v55 }
 0x68c   :  { %4914 = vmatprep.subr.bf16.mxu0 %v10251_v28  ;;  %4955 = vmatprep.subr.bf16.mxu1 %v10253_v34 }
 0x68f   :  { %4915 = vmatpush1.bf16.msra.mxu0 %v10258_v38  ;;  %4956 = vmatpush1.bf16.msra.mxu1 %v10260_v48 }
 0x690   :  { %4916 = vmatprep.subr.bf16.mxu0 %v10264_v61  ;;  %4957 = vmatprep.subr.bf16.mxu1 %v10266_v59 }
 0x693   :  { %4917 = vmatpush1.bf16.msra.mxu0 %v10270_v36  ;;  %4958 = vmatpush1.bf16.msra.mxu1 %v10272_v13 }
 0x694   :  { %v8551_v47 = vpop.eup %8550  ;;  %5192 = vmatprep.subr.bf16.mxu0 %v8210_v10  ;;  %5233 = vmatprep.subr.bf16.mxu1 %v8213_v12  ;;  %v8240_v10 = vld [vmem:[#allocation6 + $0xa4] ss:$16 sps:$4 sm:$0xff]   ;;  %v8243_v12 = vld [vmem:[#allocation6 + $0xac] ss:$16 sps:$4 sm:$0xff]  }
 0x695   :  { %v10278_v58 = vmul.f32 %v8551_v47, %v8549_v42  ;;  %v8234_v42 = vld [vmem:[#allocation6 + $0x84] ss:$16 sps:$4 sm:$0xff]   ;;  %v8235_v47 = vld [vmem:[#allocation6 + $0x88] ss:$16 sps:$4 sm:$0xff]  }
 0x697   :  { %11086 = vst [vmem:[#allocation82_spill] sm:$0xff] %v10278_v58  ;;  %v4501_v56 = vpack.c.bf16 %v10278_v58, %v10278_v58 }
 0x699   :  { %4918 = vmatprep.mubr.bf16.mxu0 %v4501_v56  ;;  %4959 = vmatprep.mubr.bf16.mxu1 %v4501_v56  ;;  %v8237_v56 = vld [vmem:[#allocation6 + $0x8c] ss:$16 sps:$4 sm:$0xff]  }
 0x69a   :  { %4919 = vmatmul.mubr.bf16.vlgmr.msra.gmra.mrb[60].mxu0 %v10140_v17  ;;  %4960 = vmatmul.mubr.bf16.vlgmr.msra.gmra.mrb[60].mxu1 %v10140_v17  ;;  %v8222_v17 = vld [vmem:[#allocation6 + $0x44] ss:$16 sps:$4 sm:$0xff]  }
 0x69b   :  { %5224 = vmatprep.mubr.bf16.mxu0 %v11034_v19  ;;  %5265 = vmatprep.mubr.bf16.mxu1 %v11034_v19  ;;  %v8223_v19 = vld [vmem:[#allocation6 + $0x48] ss:$16 sps:$4 sm:$0xff]  }
 0x69c   :  { %5193 = vmatpush1.bf16.msra.mxu0 %v8208_v62  ;;  %5234 = vmatpush1.bf16.msra.mxu1 %v8211_v2  ;;  %v8238_v62 = vld [vmem:[#allocation6 + $0xa0] ss:$16 sps:$4 sm:$0xff]   ;;  %v8241_v2 = vld [vmem:[#allocation6 + $0xa8] ss:$16 sps:$4 sm:$0xff]  }
 0x69d   :  { %5194 = vmatprep.subr.bf16.mxu0 %v8216_v8  ;;  %5235 = vmatprep.subr.bf16.mxu1 %v8219_v3  ;;  %v8246_v8 = vld [vmem:[#allocation6 + $0xc4] ss:$16 sps:$4 sm:$0xff]   ;;  %v8249_v3 = vld [vmem:[#allocation6 + $0xcc] ss:$16 sps:$4 sm:$0xff]  }
 0x6a0   :  { %5195 = vmatpush1.bf16.msra.mxu0 %v8214_v7  ;;  %5236 = vmatpush1.bf16.msra.mxu1 %v8217_v30  ;;  %v8244_v7 = vld [vmem:[#allocation6 + $0xc0] ss:$16 sps:$4 sm:$0xff]   ;;  %v8247_v30 = vld [vmem:[#allocation6 + $0xc8] ss:$16 sps:$4 sm:$0xff]  }
 0x6a1   :  { %5196 = vmatprep.subr.bf16.mxu0 %v8222_v17  ;;  %5237 = vmatprep.subr.bf16.mxu1 %v8225_v26  ;;  %v8252_v17 = vld [vmem:[#allocation6 + $0xe4] ss:$16 sps:$4 sm:$0xff]   ;;  %v8255_v26 = vld [vmem:[#allocation6 + $0xec] ss:$16 sps:$4 sm:$0xff]  }
 0x6a4   :  { %5197 = vmatpush1.bf16.msra.mxu0 %v8220_v37  ;;  %5238 = vmatpush1.bf16.msra.mxu1 %v8223_v19  ;;  %v8250_v37 = vld [vmem:[#allocation6 + $0xe0] ss:$16 sps:$4 sm:$0xff]   ;;  %v8253_v19 = vld [vmem:[#allocation6 + $0xe8] ss:$16 sps:$4 sm:$0xff]  }
 0x6a5   :  { %5198 = vmatprep.subr.bf16.mxu0 %v8228_v46  ;;  %5239 = vmatprep.subr.bf16.mxu1 %v8231_v51  ;;  %v10286_v46 = vld [vmem:[#allocation8 + $0x4] ss:$16 sps:$4 sm:$0xff]   ;;  %v10288_v51 = vld [vmem:[#allocation8 + $0xc] ss:$16 sps:$4 sm:$0xff]  }
 0x6a8   :  { %5199 = vmatpush1.bf16.msra.mxu0 %v8226_v41  ;;  %5240 = vmatpush1.bf16.msra.mxu1 %v8229_v33  ;;  %v11087_v41 = vld [vmem:[#allocation39_spill] sm:$0xff] }
 0x6a9   :  { %5200 = vmatprep.subr.bf16.mxu0 %v8234_v42  ;;  %5241 = vmatprep.subr.bf16.mxu1 %v8237_v56  ;;  %v219_v33 = vadd.f32 %v11087_v41, %v11063_v1  ;;  %v10374_v1 = vld [vmem:[#allocation8 + $0xcc] ss:$16 sps:$4 sm:$0xff]  }
 0x6ac   :  { %5201 = vmatpush1.bf16.msra.mxu0 %v8232_v15  ;;  %5242 = vmatpush1.bf16.msra.mxu1 %v8235_v47  ;;  %v11088_v15 = vld [vmem:[#allocation41_spill] sm:$0xff]  ;;  %v11089_v47 = vld [vmem:[#allocation40_spill] sm:$0xff] }
 0x6ad   :  { %5202 = vmatprep.subr.bf16.mxu0 %v8240_v10  ;;  %5243 = vmatprep.subr.bf16.mxu1 %v8243_v12  ;;  %v292_v42 = vadd.f32 %v11088_v15, %v11065_v43  ;;  %v221_v56 = vadd.f32 %v11089_v47, %v11067_v20  ;;  %v11090_v10 = vld [vmem:[#allocation43_spill] sm:$0xff] }
 0x6ae   :  { %v294_v12 = vadd.f32 %v11090_v10, %v9016_v11  ;;  %v10372_v11 = vld [vmem:[#allocation8 + $0xc4] ss:$16 sps:$4 sm:$0xff]  }
 0x6b0   :  { %5203 = vmatpush1.bf16.msra.mxu0 %v8238_v62  ;;  %5244 = vmatpush1.bf16.msra.mxu1 %v8241_v2 }
 0x6b1   :  { %5204 = vmatprep.subr.bf16.mxu0 %v8246_v8  ;;  %5245 = vmatprep.subr.bf16.mxu1 %v8249_v3 }
 0x6b4   :  { %5205 = vmatpush1.bf16.msra.mxu0 %v8244_v7  ;;  %5246 = vmatpush1.bf16.msra.mxu1 %v8247_v30 }
 0x6b5   :  { %5206 = vmatprep.subr.bf16.mxu0 %v8252_v17  ;;  %5247 = vmatprep.subr.bf16.mxu1 %v8255_v26 }
 0x6b8   :  { %5207 = vmatpush1.bf16.msra.mxu0 %v8250_v37  ;;  %5248 = vmatpush1.bf16.msra.mxu1 %v8253_v19 }
 0x6b9   :  { %5687 = vmatprep.subr.bf16.mxu0 %v10286_v46  ;;  %5728 = vmatprep.subr.bf16.mxu1 %v10288_v51 }
 0x729   :  { %v4425_v62 = vpop.f32.mrb[56].mxu0  ;;  %v4466_v2 = vpop.f32.mrb[56].mxu1 }
 0x72a   :  { %v4473_v8 = vadd.f32 %v4425_v62, %v219_v33  ;;  %v4475_v3 = vadd.f32 %v4466_v2, %v292_v42  ;;  %v4427_v7 = vpop.f32.mrb[57].mxu0  ;;  %v4468_v30 = vpop.f32.mrb[57].mxu1 }
 0x72b   :  { %v4474_v17 = vadd.f32 %v4427_v7, %v221_v56  ;;  %v4476_v26 = vadd.f32 %v4468_v30, %v294_v12  ;;  %v4429_v37 = vpop.f32.mrb[58].mxu0  ;;  %v4470_v19 = vpop.f32.mrb[58].mxu1 }
 0x72c   :  { %v7394_v41 = vmul.f32 -1.442695, %v4473_v8  ;;  %v4430_v58 = vpop.f32.mrb[59].mxu0  ;;  %v4471_v60 = vpop.f32.mrb[59].mxu1  ;;  %v10312_v37 = vld [vmem:[#allocation8 + $0x2c] ss:$16 sps:$4 sm:$0xff]  }
 0x72d   :  { %v7395_v15 = vmul.f32 -1.442695, %v4474_v17  ;;  %v7396_v47 = vmul.f32 -1.442695, %v4476_v26  ;;  %v10310_v26 = vld [vmem:[#allocation8 + $0x24] ss:$16 sps:$4 sm:$0xff]  }
 0x72e   :  { %8552 = vpow2.f32 %v7394_v41  ;;  %v10320_v19 = vld [vmem:[#allocation8 + $0x28] ss:$16 sps:$4 sm:$0xff]   ;;  %v10324_v41 = vld [vmem:[#allocation8 + $0x44] ss:$16 sps:$4 sm:$0xff]  }
 0x72f   :  { %8554 = vpow2.f32 %v7395_v15  ;;  %11092 = vst [vmem:[#allocation83_spill] sm:$0xff] %v10324_v41  ;;  %v10326_v15 = vld [vmem:[#allocation8 + $0x4c] ss:$16 sps:$4 sm:$0xff]  }
 0x730   :  { %8556 = vpow2.f32 %v7396_v47  ;;  %11093 = vst [vmem:[#allocation84_spill] sm:$0xff] %v10326_v15  ;;  %v10330_v47 = vld [vmem:[#allocation8 + $0x40] ss:$16 sps:$4 sm:$0xff]  }
 0x731   :  { %8558 = vtanh.f32 %v4475_v3  ;;  %v10304_v3 = vld [vmem:[#allocation8] ss:$16 sps:$4 sm:$0xff]   ;;  %11094 = vst [vmem:[#allocation31_spill] sm:$0xff] %v10330_v47 }
 0x738   :  { %v8553_v20 = vpop.eup %8552 }
 0x739   :  { %v8555_v43 = vpop.eup %8554  ;;  %v4480_v10 = vadd.f32 1.0, %v8553_v20 }
 0x73a   :  { %v4486_v33 = vadd.f32 1.0, %v8555_v43  ;;  %v8557_v42 = vpop.eup %8556  ;;  %v10306_v43 = vld [vmem:[#allocation8 + $0x8] ss:$16 sps:$4 sm:$0xff]  }
 0x73b   :  { %8560 = vrcp.f32 %v4480_v10  ;;  %v8559_v56 = vpop.eup %8558  ;;  %v4493_v8 = vadd.f32 1.0, %v8557_v42  ;;  %v10332_v10 = vld [vmem:[#allocation8 + $0x48] ss:$16 sps:$4 sm:$0xff]   ;;  %v10338_v42 = vld [vmem:[#allocation8 + $0x6c] ss:$16 sps:$4 sm:$0xff]  }
 0x73c   :  { %8562 = vrcp.f32 %v4486_v33  ;;  %11095 = vst [vmem:[#allocation32_spill] sm:$0xff] %v10332_v10  ;;  %v10336_v33 = vld [vmem:[#allocation8 + $0x64] ss:$16 sps:$4 sm:$0xff]   ;;  %11097 = vst [vmem:[#allocation34_spill] sm:$0xff] %v10338_v42 }
 0x73d   :  { %8564 = vrcp.f32 %v4493_v8  ;;  %11096 = vst [vmem:[#allocation33_spill] sm:$0xff] %v10336_v33  ;;  %v10354_v8 = vld [vmem:[#allocation8 + $0x80] ss:$16 sps:$4 sm:$0xff]  }
 0x73e   :  { %11102 = vst [vmem:[#allocation21_spill] sm:$0xff] %v10354_v8 }
 0x745   :  { %v8561_v12 = vpop.eup %8560 }
 0x746   :  { %v8563_v62 = vpop.eup %8562  ;;  %v4497_v2 = vmul.f32 %v8561_v12, %v8559_v56  ;;  %v10342_v56 = vld [vmem:[#allocation8 + $0x60] ss:$16 sps:$4 sm:$0xff]   ;;  %v10344_v12 = vld [vmem:[#allocation8 + $0x68] ss:$16 sps:$4 sm:$0xff]  }
 0x747   :  { %v4496_v60 = vmul.f32 %v8563_v62, %v10137_v40  ;;  %v8565_v7 = vpop.eup %8564  ;;  %v10318_v40 = vld [vmem:[#allocation8 + $0x20] ss:$16 sps:$4 sm:$0xff]   ;;  %11098 = vst [vmem:[#allocation17_spill] sm:$0xff] %v10342_v56  ;;  %11099 = vst [vmem:[#allocation18_spill] sm:$0xff] %v10344_v12  ;;  %v10348_v62 = vld [vmem:[#allocation8 + $0x84] ss:$16 sps:$4 sm:$0xff]  }
 0x748   :  { %11100 = vst [vmem:[#allocation19_spill] sm:$0xff] %v10348_v62 }
 0x749   :  { %v10301_v58 = vadd.f32 %v4497_v2, %v4496_v60  ;;  %v10350_v2 = vld [vmem:[#allocation8 + $0x8c] ss:$16 sps:$4 sm:$0xff]   ;;  %v10356_v60 = vld [vmem:[#allocation8 + $0x88] ss:$16 sps:$4 sm:$0xff]  }
 0x74a   :  { %11101 = vst [vmem:[#allocation20_spill] sm:$0xff] %v10350_v2  ;;  %11103 = vst [vmem:[#allocation22_spill] sm:$0xff] %v10356_v60 }
 0x74b   :  { %11091 = vst [vmem:[#allocation48_spill] sm:$0xff] %v10301_v58  ;;  %8566 = vtanh.f32 %v10301_v58  ;;  %v10368_v58 = vld [vmem:[#allocation8 + $0xa8] ss:$16 sps:$4 sm:$0xff]  }
 0x755   :  { %v8567_v20 = vpop.eup %8566 }
 0x756   :  { %v4500_v30 = vmul.f32 %v8567_v20, %v8565_v7  ;;  %v10360_v7 = vld [vmem:[#allocation8 + $0xa4] ss:$16 sps:$4 sm:$0xff]   ;;  %v10362_v20 = vld [vmem:[#allocation8 + $0xac] ss:$16 sps:$4 sm:$0xff]  }
 0x757   :  { %11104 = vst [vmem:[#allocation23_spill] sm:$0xff] %v10360_v7  ;;  %11105 = vst [vmem:[#allocation24_spill] sm:$0xff] %v10362_v20 }
 0x758   :  { %v10308_v17 = vpack.c.bf16 %v4500_v30, %v4500_v30  ;;  %v10366_v30 = vld [vmem:[#allocation8 + $0xa0] ss:$16 sps:$4 sm:$0xff]  }
 0x75a   :  { %5225 = vmatmul.mubr.bf16.vlgmr.msra.gmra.mrb[64].mxu0 %v10308_v17  ;;  %5266 = vmatmul.mubr.bf16.vlgmr.msra.gmra.mrb[64].mxu1 %v10308_v17 }
 0x75b   :  { %5688 = vmatpush1.bf16.msra.mxu0 %v10304_v3  ;;  %5729 = vmatpush1.bf16.msra.mxu1 %v10306_v43 }
 0x75c   :  { %5689 = vmatprep.subr.bf16.mxu0 %v10310_v26  ;;  %5730 = vmatprep.subr.bf16.mxu1 %v10312_v37 }
 0x75f   :  { %5690 = vmatpush1.bf16.msra.mxu0 %v10318_v40  ;;  %5731 = vmatpush1.bf16.msra.mxu1 %v10320_v19 }
 0x760   :  { %5691 = vmatprep.subr.bf16.mxu0 %v10324_v41  ;;  %5732 = vmatprep.subr.bf16.mxu1 %v10326_v15 }
 0x763   :  { %5692 = vmatpush1.bf16.msra.mxu0 %v10330_v47  ;;  %5733 = vmatpush1.bf16.msra.mxu1 %v10332_v10 }
 0x764   :  { %5693 = vmatprep.subr.bf16.mxu0 %v10336_v33  ;;  %5734 = vmatprep.subr.bf16.mxu1 %v10338_v42  ;;  %v10377_v42 = vld [vmem:[#allocation8 + $0xc0] ss:$16 sps:$4 sm:$0xff]  }
 0x767   :  { %5694 = vmatpush1.bf16.msra.mxu0 %v10342_v56  ;;  %5735 = vmatpush1.bf16.msra.mxu1 %v10344_v12 }
 0x768   :  { %5695 = vmatprep.subr.bf16.mxu0 %v10348_v62  ;;  %5736 = vmatprep.subr.bf16.mxu1 %v10350_v2 }
 0x76b   :  { %5696 = vmatpush1.bf16.msra.mxu0 %v10354_v8  ;;  %5737 = vmatpush1.bf16.msra.mxu1 %v10356_v60 }
 0x76c   :  { %5697 = vmatprep.subr.bf16.mxu0 %v10360_v7  ;;  %5738 = vmatprep.subr.bf16.mxu1 %v10362_v20  ;;  %v10382_v20 = vld [vmem:[#allocation8 + $0xc8] ss:$16 sps:$4 sm:$0xff]   ;;  %v10384_v7 = vld [vmem:[#allocation8 + $0xe4] ss:$16 sps:$4 sm:$0xff]  }
 0x76d   :  { %v4920_v2 = vpop.f32.mrb[60].mxu0  ;;  %v4961_v62 = vpop.f32.mrb[60].mxu1 }
 0x76e   :  { %v4921_v12 = vadd.f32 %v4920_v2, %v11085_v24  ;;  %v4922_v56 = vpop.f32.mrb[61].mxu0  ;;  %v4963_v8 = vpop.f32.mrb[61].mxu1  ;;  %v10388_v2 = vld [vmem:[#allocation8 + $0xec] ss:$16 sps:$4 sm:$0xff]  }
 0x76f   :  { %v4923_v60 = vadd.f32 %v4922_v56, %v9232_v53  ;;  %v4924_v33 = vpop.f32.mrb[62].mxu0  ;;  %v4965_v10 = vpop.f32.mrb[62].mxu1  ;;  %5698 = vmatpush1.bf16.msra.mxu0 %v10366_v30  ;;  %5739 = vmatpush1.bf16.msra.mxu1 %v10368_v58 }
 0x770   :  { %v7461_v47 = vmul.f32 -1.442695, %v4921_v12  ;;  %v4925_v15 = vpop.f32.mrb[63].mxu0  ;;  %v4966_v41 = vpop.f32.mrb[63].mxu1  ;;  %5699 = vmatprep.subr.bf16.mxu0 %v10372_v11  ;;  %5740 = vmatprep.subr.bf16.mxu1 %v10374_v1  ;;  %v10392_v10 = vld [vmem:[#allocation8 + $0xe0] ss:$16 sps:$4 sm:$0xff]  }
 0x771   :  { %v7462_v56 = vmul.f32 -1.442695, %v4923_v60  ;;  %v10394_v33 = vld [vmem:[#allocation8 + $0xe8] ss:$16 sps:$4 sm:$0xff]   ;;  %v4964_v41 = vadd.f32 %v4963_v8, %v10976_v63 }
 0x772   :  { %8568 = vpow2.f32 %v7461_v47  ;;  %v4962_v47 = vadd.f32 %v4961_v62, %v9246_v44  ;;  %v8336_v62 = vld [vmem:[#allocation8 + $0x1a4] ss:$16 sps:$4 sm:$0xff]  }
 0x773   :  { %8570 = vpow2.f32 %v7462_v56  ;;  %5700 = vmatpush1.bf16.msra.mxu0 %v10377_v42  ;;  %5741 = vmatpush1.bf16.msra.mxu1 %v10382_v20  ;;  %v7463_v15 = vmul.f32 -1.442695, %v4964_v41  ;;  %v8343_v41 = vld [vmem:[#allocation8 + $0x1c8] ss:$16 sps:$4 sm:$0xff]  }
 0x774   :  { %5701 = vmatprep.subr.bf16.mxu0 %v10384_v7  ;;  %5742 = vmatprep.subr.bf16.mxu1 %v10388_v2 }
 0x775   :  { %8572 = vpow2.f32 %v7463_v15  ;;  %v8348_v15 = vld [vmem:[#allocation8 + $0x1e4] ss:$16 sps:$4 sm:$0xff]  }
 0x776   :  { %8574 = vtanh.f32 %v4962_v47  ;;  %v8351_v47 = vld [vmem:[#allocation8 + $0x1ec] ss:$16 sps:$4 sm:$0xff]  }
 0x777   :  { %5702 = vmatpush1.bf16.msra.mxu0 %v10392_v10  ;;  %5743 = vmatpush1.bf16.msra.mxu1 %v10394_v33 }
 0x778   :  { %5703 = vmatprep.subr.bf16.mxu0 %v10175_v50  ;;  %5744 = vmatprep.subr.bf16.mxu1 %v10177_v14 }
 0x77b   :  { %5704 = vmatpush1.bf16.msra.mxu0 %v10181_v35  ;;  %5745 = vmatpush1.bf16.msra.mxu1 %v10183_v18 }
 0x77c   :  { %v8569_v12 = vpop.eup %8568  ;;  %5705 = vmatprep.subr.bf16.mxu0 %v10187_v52  ;;  %5746 = vmatprep.subr.bf16.mxu1 %v10189_v25 }
 0x77d   :  { %v8571_v8 = vpop.eup %8570  ;;  %v4971_v60 = vadd.f32 1.0, %v8569_v12  ;;  %v8346_v12 = vld [vmem:[#allocation8 + $0x1e0] ss:$16 sps:$4 sm:$0xff]  }
 0x77e   :  { %v4977_v56 = vadd.f32 1.0, %v8571_v8  ;;  %v8349_v8 = vld [vmem:[#allocation8 + $0x1e8] ss:$16 sps:$4 sm:$0xff]  }
 0x77f   :  { %8576 = vrcp.f32 %v4971_v60  ;;  %5706 = vmatpush1.bf16.msra.mxu0 %v10194_v6  ;;  %5747 = vmatpush1.bf16.msra.mxu1 %v10196_v21  ;;  %v8573_v50 = vpop.eup %8572  ;;  %v10479_v60 = vld [vmem:[%s10659_s4] sm:$0xff]  }
 0x780   :  { %8578 = vrcp.f32 %v4977_v56  ;;  %5707 = vmatprep.subr.bf16.mxu0 %v10200_v49  ;;  %5748 = vmatprep.subr.bf16.mxu1 %v10202_v22  ;;  %v8575_v14 = vpop.eup %8574  ;;  %v4984_v25 = vadd.f32 1.0, %v8573_v50  ;;  %v11120_v56 = vld [vmem:[#allocation11_spill] sm:$0xff]  ;;  %v11121_v50 = vld [vmem:[#allocation42_spill] sm:$0xff] }
 0x782   :  { %8580 = vrcp.f32 %v4984_v25  ;;  %v11124_v25 = vld [vmem:[#allocation12_spill] sm:$0xff] }
 0x783   :  { %5708 = vmatpush1.bf16.msra.mxu0 %v10206_v9  ;;  %5749 = vmatpush1.bf16.msra.mxu1 %v10208_v0 }
 0x784   :  { %5709 = vmatprep.subr.bf16.mxu0 %v10212_v4  ;;  %5750 = vmatprep.subr.bf16.mxu1 %v10214_v5  ;;  %v11106_v4 = vld [vmem:[#allocation83_spill] sm:$0xff]  ;;  %v11107_v5 = vld [vmem:[#allocation84_spill] sm:$0xff] }
 0x787   :  { %5710 = vmatpush1.bf16.msra.mxu0 %v10218_v23  ;;  %5751 = vmatpush1.bf16.msra.mxu1 %v10220_v29  ;;  %v11108_v23 = vld [vmem:[#allocation31_spill] sm:$0xff]  ;;  %v11109_v29 = vld [vmem:[#allocation32_spill] sm:$0xff] }
 0x788   :  { %5711 = vmatprep.subr.bf16.mxu0 %v10224_v31  ;;  %5752 = vmatprep.subr.bf16.mxu1 %v10226_v45  ;;  %v11110_v31 = vld [vmem:[#allocation33_spill] sm:$0xff]  ;;  %v11111_v45 = vld [vmem:[#allocation34_spill] sm:$0xff] }
 0x789   :  { %v8577_v35 = vpop.eup %8576 }
 0x78a   :  { %v8579_v18 = vpop.eup %8578  ;;  %v4988_v52 = vmul.f32 %v8577_v35, %v8575_v14  ;;  %v223_v14 = vadd.f32 %v11121_v50, %v11120_v56  ;;  %v11122_v35 = vld [vmem:[#allocation14_spill] sm:$0xff] }
 0x78b   :  { %v4987_v6 = vmul.f32 %v8579_v18, %v10247_v57  ;;  %5712 = vmatpush1.bf16.msra.mxu0 %v10230_v54  ;;  %5753 = vmatpush1.bf16.msra.mxu1 %v10232_v39  ;;  %v11112_v54 = vld [vmem:[#allocation17_spill] sm:$0xff]  ;;  %v11113_v39 = vld [vmem:[#allocation18_spill] sm:$0xff]  ;;  %v11118_v57 = vld [vmem:[#allocation23_spill] sm:$0xff] }
 0x78c   :  { %5713 = vmatprep.subr.bf16.mxu0 %v10236_v32  ;;  %5754 = vmatprep.subr.bf16.mxu1 %v10238_v27  ;;  %v8581_v49 = vpop.eup %8580  ;;  %v11114_v32 = vld [vmem:[#allocation19_spill] sm:$0xff]  ;;  %v11115_v27 = vld [vmem:[#allocation20_spill] sm:$0xff]  ;;  %v11123_v18 = vld [vmem:[#allocation45_spill] sm:$0xff] }
 0x78d   :  { %v10425_v21 = vadd.f32 %v4988_v52, %v4987_v6  ;;  %v296_v52 = vadd.f32 %v11123_v18, %v11122_v35  ;;  %v11125_v6 = vld [vmem:[#allocation44_spill] sm:$0xff] }
 0x78f   :  { %5714 = vmatpush1.bf16.msra.mxu0 %v10243_v16  ;;  %5755 = vmatpush1.bf16.msra.mxu1 %v10245_v55  ;;  %8582 = vtanh.f32 %v10425_v21  ;;  %v11116_v16 = vld [vmem:[#allocation21_spill] sm:$0xff]  ;;  %v11117_v55 = vld [vmem:[#allocation22_spill] sm:$0xff] }
 0x790   :  { %5715 = vmatprep.subr.bf16.mxu0 %v10251_v28  ;;  %5756 = vmatprep.subr.bf16.mxu1 %v10253_v34  ;;  %v11119_v28 = vld [vmem:[#allocation24_spill] sm:$0xff]  ;;  %v8306_v34 = vld [vmem:[#allocation8 + $0x104] ss:$16 sps:$4 sm:$0xff]  }
 0x793   :  { %5716 = vmatpush1.bf16.msra.mxu0 %v10258_v38  ;;  %5757 = vmatpush1.bf16.msra.mxu1 %v10260_v48  ;;  %v8304_v38 = vld [vmem:[#allocation8 + $0x100] ss:$16 sps:$4 sm:$0xff]   ;;  %v8309_v48 = vld [vmem:[#allocation8 + $0x10c] ss:$16 sps:$4 sm:$0xff]  }
 0x794   :  { %5717 = vmatprep.subr.bf16.mxu0 %v10264_v61  ;;  %5758 = vmatprep.subr.bf16.mxu1 %v10266_v59  ;;  %v8307_v61 = vld [vmem:[#allocation8 + $0x108] ss:$16 sps:$4 sm:$0xff]   ;;  %v8315_v59 = vld [vmem:[#allocation8 + $0x12c] ss:$16 sps:$4 sm:$0xff]  }
 0x797   :  { %5718 = vmatpush1.bf16.msra.mxu0 %v10270_v36  ;;  %5759 = vmatpush1.bf16.msra.mxu1 %v10272_v13  ;;  %v8313_v36 = vld [vmem:[#allocation8 + $0x128] ss:$16 sps:$4 sm:$0xff]   ;;  %v8318_v13 = vld [vmem:[#allocation8 + $0x144] ss:$16 sps:$4 sm:$0xff]  }
 0x798   :  { %6181 = vmatprep.subr.bf16.mxu0 %v10286_v46  ;;  %6222 = vmatprep.subr.bf16.mxu1 %v10288_v51  ;;  %v8316_v46 = vld [vmem:[#allocation8 + $0x140] ss:$16 sps:$4 sm:$0xff]   ;;  %v8321_v51 = vld [vmem:[#allocation8 + $0x14c] ss:$16 sps:$4 sm:$0xff]  }
 0x799   :  { %v8583_v22 = vpop.eup %8582 }
 0x79a   :  { %v10440_v9 = vmul.f32 %v8583_v22, %v8581_v49  ;;  %v225_v49 = vadd.f32 %v11125_v6, %v11124_v25  ;;  %v11126_v22 = vld [vmem:[#allocation13_spill] sm:$0xff] }
 0x79c   :  { %v5302_v0 = vpack.c.bf16 %v10440_v9, %v10440_v9 }
 0x79e   :  { %5719 = vmatprep.mubr.bf16.mxu0 %v5302_v0  ;;  %5760 = vmatprep.mubr.bf16.mxu1 %v5302_v0  ;;  %v11127_v0 = vld [vmem:[#allocation46_spill] sm:$0xff] }
 0x79f   :  { %5720 = vmatmul.mubr.bf16.vlgmr.msra.gmra.mrb[68].mxu0 %v10308_v17  ;;  %5761 = vmatmul.mubr.bf16.vlgmr.msra.gmra.mrb[68].mxu1 %v10308_v17  ;;  %v8327_v17 = vld [vmem:[#allocation8 + $0x16c] ss:$16 sps:$4 sm:$0xff]  }
 0x7a0   :  { %6182 = vmatpush1.bf16.msra.mxu0 %v10304_v3  ;;  %6223 = vmatpush1.bf16.msra.mxu1 %v10306_v43  ;;  %v8324_v3 = vld [vmem:[#allocation8 + $0x164] ss:$16 sps:$4 sm:$0xff]   ;;  %v8322_v43 = vld [vmem:[#allocation8 + $0x160] ss:$16 sps:$4 sm:$0xff]  }
 0x7a1   :  { %6183 = vmatprep.subr.bf16.mxu0 %v10310_v26  ;;  %6224 = vmatprep.subr.bf16.mxu1 %v10312_v37  ;;  %v8325_v26 = vld [vmem:[#allocation8 + $0x168] ss:$16 sps:$4 sm:$0xff]   ;;  %v8328_v37 = vld [vmem:[#allocation8 + $0x180] ss:$16 sps:$4 sm:$0xff]  }
 0x7a4   :  { %6184 = vmatpush1.bf16.msra.mxu0 %v10318_v40  ;;  %6225 = vmatpush1.bf16.msra.mxu1 %v10320_v19  ;;  %v8330_v40 = vld [vmem:[#allocation8 + $0x184] ss:$16 sps:$4 sm:$0xff]   ;;  %v8331_v19 = vld [vmem:[#allocation8 + $0x188] ss:$16 sps:$4 sm:$0xff]  }
 0x7a5   :  { %6185 = vmatprep.subr.bf16.mxu0 %v11106_v4  ;;  %6226 = vmatprep.subr.bf16.mxu1 %v11107_v5  ;;  %v298_v4 = vadd.f32 %v11127_v0, %v11126_v22 }
 0x7a8   :  { %6186 = vmatpush1.bf16.msra.mxu0 %v11108_v23  ;;  %6227 = vmatpush1.bf16.msra.mxu1 %v11109_v29 }
 0x7a9   :  { %6187 = vmatprep.subr.bf16.mxu0 %v11110_v31  ;;  %6228 = vmatprep.subr.bf16.mxu1 %v11111_v45 }
 0x7ac   :  { %6188 = vmatpush1.bf16.msra.mxu0 %v11112_v54  ;;  %6229 = vmatpush1.bf16.msra.mxu1 %v11113_v39 }
 0x7ad   :  { %6189 = vmatprep.subr.bf16.mxu0 %v11114_v32  ;;  %6230 = vmatprep.subr.bf16.mxu1 %v11115_v27 }
 0x7b0   :  { %6190 = vmatpush1.bf16.msra.mxu0 %v11116_v16  ;;  %6231 = vmatpush1.bf16.msra.mxu1 %v11117_v55 }
 0x7b1   :  { %6191 = vmatprep.subr.bf16.mxu0 %v11118_v57  ;;  %6232 = vmatprep.subr.bf16.mxu1 %v11119_v28 }
 0x7b4   :  { %6192 = vmatpush1.bf16.msra.mxu0 %v10366_v30  ;;  %6233 = vmatpush1.bf16.msra.mxu1 %v10368_v58  ;;  %v8319_v58 = vld [vmem:[#allocation8 + $0x148] ss:$16 sps:$4 sm:$0xff]  }
 0x7b5   :  { %6193 = vmatprep.subr.bf16.mxu0 %v10372_v11  ;;  %6234 = vmatprep.subr.bf16.mxu1 %v10374_v1  ;;  %v8312_v11 = vld [vmem:[#allocation8 + $0x124] ss:$16 sps:$4 sm:$0xff]   ;;  %v8310_v1 = vld [vmem:[#allocation8 + $0x120] ss:$16 sps:$4 sm:$0xff]   ;;  %v8337_v30 = vld [vmem:[#allocation8 + $0x1a8] ss:$16 sps:$4 sm:$0xff]  }
 0x7b8   :  { %6194 = vmatpush1.bf16.msra.mxu0 %v10377_v42  ;;  %6235 = vmatpush1.bf16.msra.mxu1 %v10382_v20  ;;  %v8333_v42 = vld [vmem:[#allocation8 + $0x18c] ss:$16 sps:$4 sm:$0xff]   ;;  %v8334_v20 = vld [vmem:[#allocation8 + $0x1a0] ss:$16 sps:$4 sm:$0xff]  }
 0x7b9   :  { %6195 = vmatprep.subr.bf16.mxu0 %v10384_v7  ;;  %6236 = vmatprep.subr.bf16.mxu1 %v10388_v2  ;;  %v8339_v7 = vld [vmem:[#allocation8 + $0x1ac] ss:$16 sps:$4 sm:$0xff]   ;;  %v8342_v2 = vld [vmem:[#allocation8 + $0x1c4] ss:$16 sps:$4 sm:$0xff]  }
 0x7bc   :  { %6196 = vmatpush1.bf16.msra.mxu0 %v10392_v10  ;;  %6237 = vmatpush1.bf16.msra.mxu1 %v10394_v33  ;;  %v8345_v10 = vld [vmem:[#allocation8 + $0x1cc] ss:$16 sps:$4 sm:$0xff]   ;;  %v8340_v33 = vld [vmem:[#allocation8 + $0x1c0] ss:$16 sps:$4 sm:$0xff]  }
 0x7bd   :  { %6197 = vmatprep.subr.bf16.mxu0 %v8306_v34  ;;  %6238 = vmatprep.subr.bf16.mxu1 %v8309_v48 }
 0x7c0   :  { %6198 = vmatpush1.bf16.msra.mxu0 %v8304_v38  ;;  %6239 = vmatpush1.bf16.msra.mxu1 %v8307_v61 }
 0x7c1   :  { %6199 = vmatprep.subr.bf16.mxu0 %v8312_v11  ;;  %6240 = vmatprep.subr.bf16.mxu1 %v8315_v59 }
 0x7c4   :  { %6200 = vmatpush1.bf16.msra.mxu0 %v8310_v1  ;;  %6241 = vmatpush1.bf16.msra.mxu1 %v8313_v36 }
 0x7c5   :  { %6201 = vmatprep.subr.bf16.mxu0 %v8318_v13  ;;  %6242 = vmatprep.subr.bf16.mxu1 %v8321_v51 }
 0x7c8   :  { %6202 = vmatpush1.bf16.msra.mxu0 %v8316_v46  ;;  %6243 = vmatpush1.bf16.msra.mxu1 %v8319_v58 }
 0x7c9   :  { %6203 = vmatprep.subr.bf16.mxu0 %v8324_v3  ;;  %6244 = vmatprep.subr.bf16.mxu1 %v8327_v17  ;;  %v11128_v3 = vld [vmem:[#allocation48_spill] sm:$0xff] }
 0x7cc   :  { %6204 = vmatpush1.bf16.msra.mxu0 %v8322_v43  ;;  %6245 = vmatpush1.bf16.msra.mxu1 %v8325_v26 }
 0x7cd   :  { %6205 = vmatprep.subr.bf16.mxu0 %v8330_v40  ;;  %6246 = vmatprep.subr.bf16.mxu1 %v8333_v42 }
 0x7d0   :  { %6206 = vmatpush1.bf16.msra.mxu0 %v8328_v37  ;;  %6247 = vmatpush1.bf16.msra.mxu1 %v8331_v19 }
 0x7d1   :  { %6207 = vmatprep.subr.bf16.mxu0 %v8336_v62  ;;  %6248 = vmatprep.subr.bf16.mxu1 %v8339_v7 }
 0x7d4   :  { %6208 = vmatpush1.bf16.msra.mxu0 %v8334_v20  ;;  %6249 = vmatpush1.bf16.msra.mxu1 %v8337_v30 }
 0x7d5   :  { %6209 = vmatprep.subr.bf16.mxu0 %v8342_v2  ;;  %6250 = vmatprep.subr.bf16.mxu1 %v8345_v10 }
 0x7d8   :  { %6210 = vmatpush1.bf16.msra.mxu0 %v8340_v33  ;;  %6251 = vmatpush1.bf16.msra.mxu1 %v8343_v41 }
 0x7d9   :  { %6211 = vmatprep.subr.bf16.mxu0 %v8348_v15  ;;  %6252 = vmatprep.subr.bf16.mxu1 %v8351_v47 }
 0x7dc   :  { %6212 = vmatpush1.bf16.msra.mxu0 %v8346_v12  ;;  %6253 = vmatpush1.bf16.msra.mxu1 %v8349_v8 }
 0x7dd   :  { %7695 = vmatprep.subr.bf16.mxu0 %v10479_v60 }
 0x82d   :  { %v5226_v5 = vpop.f32.mrb[64].mxu0  ;;  %v5267_v23 = vpop.f32.mrb[64].mxu1 }
 0x82e   :  { %v5274_v29 = vadd.f32 %v5226_v5, %v223_v14  ;;  %v5276_v31 = vadd.f32 %v5267_v23, %v296_v52  ;;  %v5228_v45 = vpop.f32.mrb[65].mxu0  ;;  %v5269_v54 = vpop.f32.mrb[65].mxu1 }
 0x82f   :  { %v5275_v39 = vadd.f32 %v5228_v45, %v225_v49  ;;  %v5277_v32 = vadd.f32 %v5269_v54, %v298_v4  ;;  %v5230_v27 = vpop.f32.mrb[66].mxu0  ;;  %v5271_v16 = vpop.f32.mrb[66].mxu1 }
 0x830   :  { %v7496_v55 = vmul.f32 -1.442695, %v5274_v29  ;;  %v5231_v57 = vpop.f32.mrb[67].mxu0  ;;  %v5272_v28 = vpop.f32.mrb[67].mxu1  ;;  %v8354_v16 = vld [vmem:[%s10659_s4 + $0x10] sm:$0xff]  }
 0x831   :  { %v7497_v34 = vmul.f32 -1.442695, %v5275_v39  ;;  %v7498_v38 = vmul.f32 -1.442695, %v5277_v32  ;;  %v8353_v39 = vld [vmem:[%s10659_s4 + $0x8] sm:$0xff]   ;;  %v11130_v32 = vld [vmem:[#allocation85_spill] sm:$0xff] }
 0x832   :  { %8584 = vpow2.f32 %v7496_v55  ;;  %v8355_v55 = vld [vmem:[%s10659_s4 + $0x18] sm:$0xff]   ;;  %v8356_v57 = vld [vmem:[%s10659_s4 + $0x20] sm:$0xff]   ;;  %v8358_v28 = vld [vmem:[%s10659_s4 + $0x30] sm:$0xff]  }
 0x833   :  { %8586 = vpow2.f32 %v7497_v34  ;;  %v8359_v34 = vld [vmem:[%s10659_s4 + $0x38] sm:$0xff]  }
 0x834   :  { %8588 = vpow2.f32 %v7498_v38  ;;  %v11131_v38 = vld [vmem:[#allocation16_spill] sm:$0xff] }
 0x835   :  { %8590 = vtanh.f32 %v5276_v31 }
 0x83c   :  { %v8585_v48 = vpop.eup %8584 }
 0x83d   :  { %v8587_v61 = vpop.eup %8586  ;;  %v5281_v11 = vadd.f32 1.0, %v8585_v48  ;;  %v11132_v48 = vld [vmem:[#allocation81_spill] sm:$0xff] }
 0x83e   :  { %v5287_v1 = vadd.f32 1.0, %v8587_v61  ;;  %v8589_v59 = vpop.eup %8588  ;;  %v6298_v61 = vpack.c.bf16 %v11132_v48, %v11131_v38 }
 0x83f   :  { %8592 = vrcp.f32 %v5281_v11  ;;  %v8591_v36 = vpop.eup %8590  ;;  %v5294_v58 = vadd.f32 1.0, %v8589_v59  ;;  %v11133_v11 = vld [vmem:[#allocation82_spill] sm:$0xff] }
 0x840   :  { %8594 = vrcp.f32 %v5287_v1  ;;  %v6299_v1 = vpack.c.bf16 %v10440_v9, %v11133_v11 }
 0x841   :  { %8596 = vrcp.f32 %v5294_v58 }
 0x849   :  { %v8593_v13 = vpop.eup %8592 }
 0x84a   :  { %v8595_v46 = vpop.eup %8594  ;;  %v5298_v51 = vmul.f32 %v8593_v13, %v8591_v36 }
 0x84b   :  { %v5297_v43 = vmul.f32 %v8595_v46, %v11128_v3  ;;  %v8597_v26 = vpop.eup %8596 }
 0x84d   :  { %v5299_v17 = vadd.f32 %v5298_v51, %v5297_v43 }
 0x84f   :  { %8598 = vtanh.f32 %v5299_v17 }
 0x859   :  { %v8599_v37 = vpop.eup %8598 }
 0x85a   :  { %v5301_v40 = vmul.f32 %v8599_v37, %v8597_v26 }
 0x85c   :  { %v5795_v54 = vpack.c.bf16 %v5301_v40, %v5301_v40 }
 0x872   :  { %v5721_v19 = vpop.f32.mrb[68].mxu0  ;;  %v5762_v42 = vpop.f32.mrb[68].mxu1 }
 0x873   :  { %v5722_v62 = vadd.f32 %v5721_v19, %v11085_v24  ;;  %v5723_v7 = vpop.f32.mrb[69].mxu0  ;;  %v5764_v20 = vpop.f32.mrb[69].mxu1  ;;  %v5763_v56 = vadd.f32 %v5762_v42, %v9246_v44 }
 0x874   :  { %v5724_v30 = vadd.f32 %v5723_v7, %v9232_v53  ;;  %v5725_v2 = vpop.f32.mrb[70].mxu0  ;;  %v5766_v10 = vpop.f32.mrb[70].mxu1  ;;  %v5765_v12 = vadd.f32 %v5764_v20, %v10976_v63 }
 0x875   :  { %v7563_v33 = vmul.f32 -1.442695, %v5722_v62  ;;  %v5726_v41 = vpop.f32.mrb[71].mxu0  ;;  %v5767_v15 = vpop.f32.mrb[71].mxu1 }
 0x876   :  { %v7564_v47 = vmul.f32 -1.442695, %v5724_v30  ;;  %v7565_v8 = vmul.f32 -1.442695, %v5765_v12 }
 0x877   :  { %8600 = vpow2.f32 %v7563_v33 }
 0x878   :  { %8602 = vpow2.f32 %v7564_v47 }
 0x879   :  { %8604 = vpow2.f32 %v7565_v8 }
 0x87a   :  { %8606 = vtanh.f32 %v5763_v56 }
 0x881   :  { %v8601_v50 = vpop.eup %8600 }
 0x882   :  { %v8603_v14 = vpop.eup %8602  ;;  %v5772_v35 = vadd.f32 1.0, %v8601_v50 }
 0x883   :  { %v5778_v18 = vadd.f32 1.0, %v8603_v14  ;;  %v8605_v52 = vpop.eup %8604 }
 0x884   :  { %8608 = vrcp.f32 %v5772_v35  ;;  %v8607_v25 = vpop.eup %8606  ;;  %v5785_v0 = vadd.f32 1.0, %v8605_v52 }
 0x885   :  { %8610 = vrcp.f32 %v5778_v18 }
 0x886   :  { %8612 = vrcp.f32 %v5785_v0 }
 0x88e   :  { %v8609_v6 = vpop.eup %8608 }
 0x88f   :  { %v8611_v49 = vpop.eup %8610  ;;  %v5789_v22 = vmul.f32 %v8609_v6, %v8607_v25  ;;  %v7642_v6 = vld [vmem:[%s10662_s7 + $0x9] ss:$0 sm:$0xff] }
 0x890   :  { %v5788_v4 = vmul.f32 %v8611_v49, %v10425_v21  ;;  %v8613_v23 = vpop.eup %8612  ;;  %v11129_v21 = vld [vmem:[#allocation15_spill] sm:$0xff] }
 0x891   :  { %v6297_v27 = vpack.c.bf16 %v11130_v32, %v11129_v21 }
 0x892   :  { %v10496_v5 = vadd.f32 %v5789_v22, %v5788_v4 }
 0x894   :  { %8614 = vtanh.f32 %v10496_v5 }
 0x89e   :  { %v8615_v29 = vpop.eup %8614 }
 0x89f   :  { %v10499_v31 = vmul.f32 %v8615_v29, %v8613_v23 }
 0x8a1   :  { %v5796_v45 = vpack.c.bf16 %v10499_v31, %v10499_v31 }
 0x8a3   :  { %6213 = vmatprep.mubr.bf16.mxu0 %v5796_v45  ;;  %6254 = vmatprep.mubr.bf16.mxu1 %v5796_v45 }
 0x8a4   :  { %6214 = vmatmul.mubr.bf16.vlgmr.msra.gmra.mrb[72].mxu0 %v5795_v54  ;;  %6255 = vmatmul.mubr.bf16.vlgmr.msra.gmra.mrb[72].mxu1 %v5795_v54 }
 0x8a5   :  { %7696 = vmatpush3.bf16.msra.mxu0 %v10479_v60  ;;  %7711 = vmatprep.mubr.bf16.mxu0 %v6297_v27  ;;  %v8357_v60 = vld [vmem:[%s10659_s4 + $0x28] sm:$0xff]  }
 0x8a6   :  { %7697 = vmatprep.subr.bf16.mxu0 %v8353_v39 }
 0x8a9   :  { %7698 = vmatpush3.bf16.msra.mxu0 %v8353_v39 }
 0x8aa   :  { %7699 = vmatprep.subr.bf16.mxu0 %v8354_v16 }
 0x8ad   :  { %7700 = vmatpush3.bf16.msra.mxu0 %v8354_v16 }
 0x8ae   :  { %7701 = vmatprep.subr.bf16.mxu0 %v8355_v55 }
 0x8b1   :  { %7702 = vmatpush3.bf16.msra.mxu0 %v8355_v55 }
 0x8b2   :  { %7703 = vmatprep.subr.bf16.mxu0 %v8356_v57 }
 0x8b5   :  { %7704 = vmatpush3.bf16.msra.mxu0 %v8356_v57 }
 0x8b6   :  { %7705 = vmatprep.subr.bf16.mxu0 %v8357_v60 }
 0x8b9   :  { %7706 = vmatpush3.bf16.msra.mxu0 %v8357_v60 }
 0x8ba   :  { %7707 = vmatprep.subr.bf16.mxu0 %v8358_v28 }
 0x8bd   :  { %7708 = vmatpush3.bf16.msra.mxu0 %v8358_v28 }
 0x8be   :  { %7709 = vmatprep.subr.bf16.mxu0 %v8359_v34 }
 0x8c1   :  { %7710 = vmatpush3.bf16.msra.mxu0 %v8359_v34 }
 0x8c4   :  { %7712 = vmatmul.mubr.bf16.vlgmr.msra.gmra.mrb[76].mxu0 %v6298_v61 }
 0x8c5   :  { %7715 = vmatprep.mubr.bf16.mxu0 %v6299_v1 }
 0x977   :  { %v6215_v59 = vpop.f32.mrb[72].mxu0  ;;  %v6256_v36 = vpop.f32.mrb[72].mxu1 }
 0x978   :  { %v6216_v13 = vadd.f32 %v6215_v59, %v11085_v24  ;;  %v6217_v46 = vpop.f32.mrb[73].mxu0  ;;  %v6258_v51 = vpop.f32.mrb[73].mxu1  ;;  %v6257_v62 = vadd.f32 %v6256_v36, %v9246_v44  ;;  %v7633_v44 = vld [vmem:[%s10662_s7 + $0x8] ss:$0 sm:$0xff] }
 0x979   :  { %v6218_v58 = vadd.f32 %v6217_v46, %v9232_v53  ;;  %v6219_v3 = vpop.f32.mrb[74].mxu0  ;;  %v6260_v43 = vpop.f32.mrb[74].mxu1  ;;  %v6259_v19 = vadd.f32 %v6258_v51, %v10976_v63 }
 0x97a   :  { %v7630_v17 = vmul.f32 -1.442695, %v6216_v13  ;;  %v6220_v26 = vpop.f32.mrb[75].mxu0  ;;  %v6261_v37 = vpop.f32.mrb[75].mxu1 }
 0x97b   :  { %v7631_v40 = vmul.f32 -1.442695, %v6218_v58  ;;  %v7632_v42 = vmul.f32 -1.442695, %v6259_v19  ;;  %v8747_v26 = vmov 0.0  }
 0x97c   :  { %8616 = vpow2.f32 %v7630_v17  ;;  %v8360_v17 = vld [vmem:[%s10660_s5] sm:$0xff]   ;;  %7719 = vmatprep.subr.bf16.mxu1 %v8747_v26  ;;  %7739 = vmatprep.subr.bf16.mxu0 %v8747_v26 }
 0x97d   :  { %8618 = vpow2.f32 %v7631_v40  ;;  %7720 = vmatpush3.bf16.msra.mxu1 %v8360_v17  ;;  %7735 = vmatprep.mubr.msk.bf16.mxu1 %vm8748_vm4, %v8747_v26 }
 0x97e   :  { %8620 = vpow2.f32 %v7632_v42  ;;  %7721 = vmatprep.subr.bf16.mxu1 %v8747_v26 }
 0x97f   :  { %8622 = vtanh.f32 %v6257_v62 }
 0x986   :  { %v8617_v7 = vpop.eup %8616 }
 0x987   :  { %v8619_v20 = vpop.eup %8618  ;;  %v6266_v24 = vadd.f32 1.0, %v8617_v7  ;;  %v7643_v7 = vld [vmem:[%s10662_s7 + $0xd] ss:$0 sm:$0xff] }
 0x988   :  { %v6272_v30 = vadd.f32 1.0, %v8619_v20  ;;  %v8621_v53 = vpop.eup %8620 }
 0x989   :  { %8624 = vrcp.f32 %v6266_v24  ;;  %v8623_v2 = vpop.eup %8622  ;;  %v6279_v15 = vadd.f32 1.0, %v8621_v53 }
 0x98a   :  { %8626 = vrcp.f32 %v6272_v30 }
 0x98b   :  { %8628 = vrcp.f32 %v6279_v15 }
 0x993   :  { %v8625_v10 = vpop.eup %8624 }
 0x994   :  { %v8627_v33 = vpop.eup %8626  ;;  %v6283_v41 = vmul.f32 %v8625_v10, %v8623_v2 }
 0x995   :  { %v6282_v47 = vmul.f32 %v8627_v33, %v10496_v5  ;;  %v8629_v25 = vpop.eup %8628 }
 0x997   :  { %v7713_v63 = vpop.f32.mrb[76].mxu0  ;;  %v6284_v12 = vadd.f32 %v6283_v41, %v6282_v47 }
 0x998   :  { %v6415_v8 = vadd.f32 %v7713_v63, %v7633_v44  ;;  %v6406_v56 = vpop.f32.mrb[77].mxu0 }
 0x999   :  { %v6407_v50 = vadd.f32 %v7633_v44, %v6406_v56  ;;  %v7714_v14 = vpop.f32.mrb[78].mxu0  ;;  %8630 = vtanh.f32 %v6284_v12 }
 0x99a   :  { %8632 = vtanh.f32 %v6415_v8  ;;  %v6418_v35 = vadd.f32 %v7714_v14, %v7633_v44  ;;  %v6409_v18 = vpop.f32.mrb[79].mxu0 }
 0x99b   :  { %8634 = vtanh.f32 %v6407_v50  ;;  %v6410_v52 = vadd.f32 %v7633_v44, %v6409_v18 }
 0x99c   :  { %8636 = vtanh.f32 %v6418_v35 }
 0x99d   :  { %8638 = vtanh.f32 %v6410_v52 }
 0x9a3   :  { %v8631_v49 = vpop.eup %8630 }
 0x9a4   :  { %v8633_v22 = vpop.eup %8632  ;;  %v10542_v0 = vmul.f32 %v8631_v49, %v8629_v25 }
 0x9a5   :  { %v8635_v4 = vpop.eup %8634  ;;  %v6454_v5 = vmul.f32 %v8633_v22, %v7642_v6 }
 0x9a6   :  { %v8637_v23 = vpop.eup %8636  ;;  %v6452_v29 = vmul.f32 %v8635_v4, %v7642_v6  ;;  %v6300_v45 = vpack.c.bf16 %v10542_v0, %v10499_v31 }
 0x9a7   :  { %v8639_v54 = vpop.eup %8638  ;;  %6464 = vadd.xlane.f32.xlu1 %v6454_v5  ;;  %v6455_v39 = vmul.f32 %v8637_v23, %v7642_v6 }
 0x9a8   :  { %6460 = vadd.xlane.f32.xlu0 %v6452_v29  ;;  %7716 = vmatmul.mubr.bf16.gmra.mrb[80].mxu0 %v6300_v45  ;;  %v6453_v27 = vmul.f32 %v8639_v54, %v7642_v6 }
 0x9a9   :  { %7755 = vmatprep.mubr.msk.bf16.mxu0 %vm8748_vm4, %v8747_v26 }
 0x9ab   :  { %6466 = vadd.xlane.f32.xlu1 %v6455_v39 }
 0x9ac   :  { %6462 = vadd.xlane.f32.xlu0 %v6453_v27 }
 0xa34   :  { %v6465_v40 = vpop.xlane.xlu1 %6464 }
 0xa35   :  { %v6461_v37 = vpop.xlane.xlu0 %6460  ;;  %v6485_v2 = vadd.f32 %v7643_v7, %v6465_v40 }
 0xa36   :  { %v6483_v33 = vadd.f32 %v7643_v7, %v6461_v37 }
 0xa37   :  { %v6494_v14 = vsel %vm6491_vm3, %v6485_v2, -inf }
 0xa38   :  { %v6467_v42 = vpop.xlane.xlu1 %6466  ;;  %v6492_v35 = vsel %vm6491_vm3, %v6483_v33, -inf }
 0xa39   :  { %v6463_v19 = vpop.xlane.xlu0 %6462  ;;  %v6486_v41 = vadd.f32 %v7643_v7, %v6467_v42 }
 0xa3a   :  { %v6484_v24 = vadd.f32 %v7643_v7, %v6463_v19 }
 0xa3b   :  { %v6495_v18 = vsel %vm6491_vm3, %v6486_v41, -inf }
 0xa3c   :  { %v6493_v63 = vsel %vm6491_vm3, %v6484_v24, -inf }
 0xa7b   :  { %v7717_v16 = vpop.f32.mrb[80].mxu0 }
 0xa7c   :  { %v6431_v55 = vadd.f32 %v7717_v16, %v7633_v44  ;;  %v6422_v57 = vpop.f32.mrb[81].mxu0 }
 0xa7d   :  { %v6423_v60 = vadd.f32 %v7633_v44, %v6422_v57  ;;  %v7718_v28 = vpop.f32.mrb[82].mxu0 }
 0xa7e   :  { %v6425_v34 = vpop.f32.mrb[83].mxu0  ;;  %v6434_v61 = vadd.f32 %v7718_v28, %v7633_v44 }
 0xa7f   :  { %8640 = vtanh.f32 %v6423_v60  ;;  %v6426_v1 = vadd.f32 %v7633_v44, %v6425_v34 }
 0xa80   :  { %8642 = vtanh.f32 %v6431_v55 }
 0xa81   :  { %8644 = vtanh.f32 %v6426_v1 }
 0xa82   :  { %8646 = vtanh.f32 %v6434_v61 }
 0xa89   :  { %v8641_v59 = vpop.eup %8640 }
 0xa8a   :  { %v8643_v36 = vpop.eup %8642  ;;  %v6456_v13 = vmul.f32 %v8641_v59, %v7642_v6 }
 0xa8b   :  { %v8645_v46 = vpop.eup %8644  ;;  %v6458_v3 = vmul.f32 %v8643_v36, %v7642_v6 }
 0xa8c   :  { %6468 = vadd.xlane.f32.xlu0 %v6456_v13  ;;  %v6457_v51 = vmul.f32 %v8645_v46, %v7642_v6  ;;  %v8647_v58 = vpop.eup %8646 }
 0xa8d   :  { %v6459_v43 = vmul.f32 %v8647_v58, %v7642_v6 }
 0xa8e   :  { %6470 = vadd.xlane.f32.xlu1 %v6457_v51 }
 0xa90   :  { %6472 = vadd.xlane.f32.xlu0 %v6458_v3 }
 0xa92   :  { %6474 = vadd.xlane.f32.xlu1 %v6459_v43 }
 0xb19   :  { %v6469_v62 = vpop.xlane.xlu0 %6468 }
 0xb1a   :  { %v6487_v30 = vadd.f32 %v7643_v7, %v6469_v62 }
 0xb1b   :  { %v6471_v20 = vpop.xlane.xlu1 %6470 }
 0xb1c   :  { %v6488_v53 = vadd.f32 %v7643_v7, %v6471_v20  ;;  %v6496_v12 = vsel %vm6491_vm3, %v6487_v30, -inf }
 0xb1d   :  { %v6473_v10 = vpop.xlane.xlu0 %6472  ;;  %v6497_v25 = vmax.f32 %v6492_v35, %v6496_v12 }
 0xb1e   :  { %v6498_v15 = vsel %vm6491_vm3, %v6488_v53, -inf  ;;  %v6489_v47 = vadd.f32 %v7643_v7, %v6473_v10 }
 0xb1f   :  { %v6475_v44 = vpop.xlane.xlu1 %6474  ;;  %v6499_v50 = vmax.f32 %v6493_v63, %v6498_v15 }
 0xb20   :  { %v6500_v8 = vsel %vm6491_vm3, %v6489_v47, -inf  ;;  %v6490_v56 = vadd.f32 %v7643_v7, %v6475_v44 }
 0xb21   :  { %v6501_v6 = vmax.f32 %v6494_v14, %v6500_v8  ;;  %v6504_v22 = vmax.f32 %v6497_v25, %v6499_v50  ;;  %v8362_v14 = vld [vmem:[%s10660_s5 + $0x10] sm:$0xff]   ;;  %v8364_v25 = vld [vmem:[%s10660_s5 + $0x20] sm:$0xff]  }
 0xb22   :  { %v6502_v52 = vsel %vm6491_vm3, %v6490_v56, -inf }
 0xb23   :  { %v6503_v49 = vmax.f32 %v6495_v18, %v6502_v52  ;;  %v8363_v18 = vld [vmem:[%s10660_s5 + $0x18] sm:$0xff]  }
 0xb25   :  { %v6505_v4 = vmax.f32 %v6501_v6, %v6503_v49  ;;  %v8365_v49 = vld [vmem:[%s10660_s5 + $0x28] sm:$0xff]  }
 0xb27   :  { %v6506_v5 = vmax.f32 %v6504_v22, %v6505_v4  ;;  %v8366_v4 = vld [vmem:[%s10660_s5 + $0x30] sm:$0xff]  }
 0xb29   :  { %v6509_v23 = vsub.f32 %v6485_v2, %v6506_v5  ;;  %v6507_v29 = vsub.f32 %v6483_v33, %v6506_v5  ;;  %v6508_v45 = vsub.f32 %v6484_v24, %v6506_v5  ;;  %v6510_v54 = vsub.f32 %v6486_v41, %v6506_v5 }
 0xb2a   :  { %v6511_v16 = vsub.f32 %v6487_v30, %v6506_v5  ;;  %v6512_v57 = vsub.f32 %v6488_v53, %v6506_v5  ;;  %v6513_v28 = vsub.f32 %v6489_v47, %v6506_v5  ;;  %v6514_v61 = vsub.f32 %v6490_v56, %v6506_v5  ;;  %v8361_v56 = vld [vmem:[%s10660_s5 + $0x8] sm:$0xff]   ;;  %v8367_v5 = vld [vmem:[%s10660_s5 + $0x38] sm:$0xff]  }
 0xb2b   :  { %v6519_v39 = vmul.f32 1.442695, %v6509_v23  ;;  %v6515_v27 = vmul.f32 1.442695, %v6507_v29  ;;  %v6517_v55 = vmul.f32 1.442695, %v6508_v45  ;;  %7722 = vmatpush3.bf16.msra.mxu1 %v8361_v56 }
 0xb2c   :  { %v6521_v60 = vmul.f32 1.442695, %v6510_v54  ;;  %v6523_v34 = vmul.f32 1.442695, %v6511_v16  ;;  %v6525_v1 = vmul.f32 1.442695, %v6512_v57  ;;  %7723 = vmatprep.subr.bf16.mxu1 %v8747_v26 }
 0xb2d   :  { %8648 = vpow2.f32 %v6519_v39  ;;  %v6527_v59 = vmul.f32 1.442695, %v6513_v28  ;;  %v6529_v36 = vmul.f32 1.442695, %v6514_v61  ;;  %v8368_v23 = vld [vmem:[%s10661_s6] sm:$0xff]   ;;  %v8369_v29 = vld [vmem:[%s10661_s6 + $0x8] sm:$0xff]  }
 0xb2e   :  { %8650 = vpow2.f32 %v6515_v27  ;;  %7740 = vmatpush3.bf16.msra.mxu0 %v8368_v23  ;;  %v8370_v45 = vld [vmem:[%s10661_s6 + $0x10] sm:$0xff]   ;;  %v8371_v54 = vld [vmem:[%s10661_s6 + $0x18] sm:$0xff]   ;;  %v8372_v39 = vld [vmem:[%s10661_s6 + $0x20] sm:$0xff]  }
 0xb2f   :  { %8652 = vpow2.f32 %v6517_v55  ;;  %7724 = vmatpush3.bf16.msra.mxu1 %v8362_v14  ;;  %7741 = vmatprep.subr.bf16.mxu0 %v8747_v26  ;;  %v8373_v27 = vld [vmem:[%s10661_s6 + $0x28] sm:$0xff]  }
 0xb30   :  { %8654 = vpow2.f32 %v6521_v60  ;;  %7725 = vmatprep.subr.bf16.mxu1 %v8747_v26 }
 0xb31   :  { %8656 = vpow2.f32 %v6523_v34 }
 0xb32   :  { %8658 = vpow2.f32 %v6525_v1  ;;  %7742 = vmatpush3.bf16.msra.mxu0 %v8369_v29 }
 0xb33   :  { %8660 = vpow2.f32 %v6527_v59  ;;  %7726 = vmatpush3.bf16.msra.mxu1 %v8363_v18  ;;  %7743 = vmatprep.subr.bf16.mxu0 %v8747_v26 }
 0xb34   :  { %8662 = vpow2.f32 %v6529_v36  ;;  %7727 = vmatprep.subr.bf16.mxu1 %v8747_v26 }
 0xb36   :  { %7744 = vmatpush3.bf16.msra.mxu0 %v8370_v45 }
 0xb37   :  { %v8649_v13 = vpop.eup %8648  ;;  %7728 = vmatpush3.bf16.msra.mxu1 %v8364_v25  ;;  %7745 = vmatprep.subr.bf16.mxu0 %v8747_v26 }
 0xb38   :  { %v8651_v46 = vpop.eup %8650  ;;  %v6534_v37 = vsel %vm6491_vm3, %v8649_v13, 0.0  ;;  %7729 = vmatprep.subr.bf16.mxu1 %v8747_v26 }
 0xb39   :  { %v8653_v51 = vpop.eup %8652  ;;  %v6531_v58 = vsel %vm6491_vm3, %v8651_v46, 0.0 }
 0xb3a   :  { %v6532_v3 = vsel %vm6491_vm3, %v8653_v51, 0.0  ;;  %v8655_v43 = vpop.eup %8654  ;;  %7746 = vmatpush3.bf16.msra.mxu0 %v8371_v54 }
 0xb3b   :  { %v6533_v17 = vadd.f32 %v6532_v3, %v6531_v58  ;;  %v8657_v40 = vpop.eup %8656  ;;  %v6536_v42 = vsel %vm6491_vm3, %v8655_v43, 0.0  ;;  %7730 = vmatpush3.bf16.msra.mxu1 %v8365_v49  ;;  %7747 = vmatprep.subr.bf16.mxu0 %v8747_v26 }
 0xb3c   :  { %v8659_v62 = vpop.eup %8658  ;;  %v6538_v20 = vsel %vm6491_vm3, %v8657_v40, 0.0  ;;  %7731 = vmatprep.subr.bf16.mxu1 %v8747_v26 }
 0xb3d   :  { %v6535_v19 = vadd.f32 %v6534_v37, %v6533_v17  ;;  %v8661_v24 = vpop.eup %8660  ;;  %v6540_v53 = vsel %vm6491_vm3, %v8659_v62, 0.0 }
 0xb3e   :  { %v8663_v2 = vpop.eup %8662  ;;  %v6542_v33 = vsel %vm6491_vm3, %v8661_v24, 0.0  ;;  %7748 = vmatpush3.bf16.msra.mxu0 %v8372_v39 }
 0xb3f   :  { %v6537_v7 = vadd.f32 %v6536_v42, %v6535_v19  ;;  %v6544_v15 = vsel %vm6491_vm3, %v8663_v2, 0.0  ;;  %7732 = vmatpush3.bf16.msra.mxu1 %v8366_v4  ;;  %7749 = vmatprep.subr.bf16.mxu0 %v8747_v26 }
 0xb40   :  { %7733 = vmatprep.subr.bf16.mxu1 %v8747_v26 }
 0xb41   :  { %v6539_v30 = vadd.f32 %v6538_v20, %v6537_v7 }
 0xb42   :  { %7750 = vmatpush3.bf16.msra.mxu0 %v8373_v27 }
 0xb43   :  { %v6541_v10 = vadd.f32 %v6540_v53, %v6539_v30  ;;  %7734 = vmatpush3.bf16.msra.mxu1 %v8367_v5  ;;  %7751 = vmatprep.subr.bf16.mxu0 %v8747_v26 }
 0xb45   :  { %v6543_v41 = vadd.f32 %v6542_v33, %v6541_v10 }
 0xb47   :  { %v6545_v47 = vadd.f32 %v6544_v15, %v6543_v41  ;;  %v7662_v41 = vld [vmem:[%s10662_s7 + $0xc] ss:$0 sm:$0xff] }
 0xb49   :  { %8664 = vrcp.f32 %v6545_v47 }
 0xb53   :  { %v8665_v44 = vpop.eup %8664 }
 0xb54   :  { %v6548_v63 = vmul.f32 %v8665_v44, %v8653_v51  ;;  %v6547_v12 = vmul.f32 %v8665_v44, %v8651_v46  ;;  %v6549_v8 = vmul.f32 %v8665_v44, %v8649_v13  ;;  %v6550_v50 = vmul.f32 %v8665_v44, %v8655_v43 }
 0xb55   :  { %v6551_v35 = vmul.f32 %v8665_v44, %v8657_v40  ;;  %v6552_v52 = vmul.f32 %v8665_v44, %v8659_v62  ;;  %v6553_v6 = vmul.f32 %v8665_v44, %v8661_v24  ;;  %v6554_v22 = vmul.f32 %v8665_v44, %v8663_v2 }
 0xb56   :  { %6562 = vperm.xlu1 %7769, %v6548_v63   ;;  %6557 = vperm.xlu0 %7768, %v6547_v12   ;;  %v7663_v12 = vld [vmem:[%s10662_s7 + $0xe] ss:$0 sm:$0xff] }
 0xb5a   :  { %6567 = vperm.xlu1 %7769, %v6549_v8  }
 0xb5e   :  { %6572 = vperm.xlu1 %7769, %v6550_v50  }
 0xb62   :  { %6577 = vperm.xlu1 %7769, %v6551_v35  }
 0xb66   :  { %6582 = vperm.xlu1 %7769, %v6552_v52  }
 0xb6a   :  { %6587 = vperm.xlu1 %7769, %v6553_v6  }
 0xb6e   :  { %6592 = vperm.xlu1 %7769, %v6554_v22  }
 0xbd5   :  { %v6563_v16 = vpop.permute.xlu1 %6562  ;;  %v6558_v57 = vpop.permute.xlu0 %6557 }
 0xbd6   :  { %v6596_v28 = vmul.f32 %v6563_v16, %v11130_v32  ;;  %v6595_v34 = vmul.f32 %v6558_v57, %v11129_v21 }
 0xbd8   :  { %v6603_v59 = vadd.f32 %v6596_v28, %v6595_v34 }
 0xbd9   :  { %v6568_v55 = vpop.permute.xlu1 %6567 }
 0xbda   :  { %v6597_v1 = vmul.f32 %v6568_v55, %v11131_v38 }
 0xbdc   :  { %v6604_v46 = vadd.f32 %v6603_v59, %v6597_v1 }
 0xbdd   :  { %v6573_v60 = vpop.permute.xlu1 %6572 }
 0xbde   :  { %v6598_v36 = vmul.f32 %v6573_v60, %v11132_v48  ;;  %v8374_v48 = vld [vmem:[%s10661_s6 + $0x30] sm:$0xff]  }
 0xbdf   :  { %7752 = vmatpush3.bf16.msra.mxu0 %v8374_v48 }
 0xbe0   :  { %v6605_v58 = vadd.f32 %v6604_v46, %v6598_v36  ;;  %7753 = vmatprep.subr.bf16.mxu0 %v8747_v26  ;;  %v7653_v26 = vld [vmem:[%s10662_s7 + $0xb] ss:$0 sm:$0xff] }
 0xbe1   :  { %v6578_v61 = vpop.permute.xlu1 %6577 }
 0xbe2   :  { %v6599_v51 = vmul.f32 %v6578_v61, %v11133_v11 }
 0xbe4   :  { %v6606_v17 = vadd.f32 %v6605_v58, %v6599_v51 }
 0xbe5   :  { %v6583_v13 = vpop.permute.xlu1 %6582 }
 0xbe6   :  { %v6600_v3 = vmul.f32 %v6583_v13, %v10440_v9  ;;  %v8375_v9 = vld [vmem:[%s10661_s6 + $0x38] sm:$0xff]  }
 0xbe7   :  { %7754 = vmatpush3.bf16.msra.mxu0 %v8375_v9 }
 0xbe8   :  { %v6607_v32 = vadd.f32 %v6606_v17, %v6600_v3 }
 0xbe9   :  { %v6588_v43 = vpop.permute.xlu1 %6587 }
 0xbea   :  { %v6601_v37 = vmul.f32 %v6588_v43, %v10499_v31  ;;  %v7644_v31 = vld [vmem:[%s10662_s7 + $0xa] ss:$0 sm:$0xff] }
 0xbec   :  { %v6608_v21 = vadd.f32 %v6607_v32, %v6601_v37 }
 0xbed   :  { %v6593_v40 = vpop.permute.xlu1 %6592 }
 0xbee   :  { %v6602_v19 = vmul.f32 %v6593_v40, %v10542_v0 }
 0xbf0   :  { %v6609_v38 = vadd.f32 %v6608_v21, %v6602_v19 }
 0xbf2   :  { %v6610_v42 = vpack.c.bf16 %v6609_v38, %v6609_v38 }
 0xbf4   :  { %7736 = vmatmul.mubr.bf16.vlgmr.msra.gmra.mrb[76].mxu1 %v6610_v42 }
 0xcc7   :  { %v6716_v11 = vpop.f32.mrb[76].mxu1 }
 0xcc8   :  { %v6717_v0 = vadd.f32 %v7644_v31, %v6716_v11  ;;  %v7737_v62 = vpop.f32.mrb[77].mxu1 }
 0xcc9   :  { %v6719_v7 = vpop.f32.mrb[78].mxu1 }
 0xcca   :  { %v6722_v20 = vmax.f32 %v6717_v0, 0.0  ;;  %v7738_v24 = vpop.f32.mrb[79].mxu1 }
 0xccc   :  { %v6723_v30 = vpack.c.bf16 %v6722_v20, %v6722_v20 }
 0xcce   :  { %7756 = vmatmul.mubr.bf16.vlgmr.msra.gmra.mrb[84].mxu0 %v6723_v30 }
 0xda1   :  { %v6829_v53 = vpop.f32.mrb[84].mxu0 }
 0xda2   :  { %v6830_v2 = vadd.f32 %v7653_v26, %v6829_v53  ;;  %v7757_v10 = vpop.f32.mrb[85].mxu0 }
 0xda3   :  { %v6832_v33 = vpop.f32.mrb[86].mxu0 }
 0xda4   :  { %v6835_v15 = vmax.f32 %v6830_v2, 0.0  ;;  %v7758_v47 = vpop.f32.mrb[87].mxu0 }
 0xda6   :  { %v6843_v44 = vmul.f32 %v7662_v41, %v6835_v15 }
 0xda8   :  { %v6845_v63 = vsel %vm6844_vm5, %v6843_v44, 0.0 }
 0xda9   :  { %6846 = vadd.xlane.f32.xlu1 %v6845_v63 }
 0xe36   :  { %v6847_v8 = vpop.xlane.xlu1 %6846 }
 0xe37   :  { %v6855_v56 = vadd.f32 %v7663_v12, %v6847_v8 }
 0xe39   :  { %v7664_v50 = vmul.f32 -1.442695, %v6855_v56 }
 0xe3b   :  { %8666 = vpow2.f32 %v7664_v50 }
 0xe45   :  { %v8667_v14 = vpop.eup %8666 }
 0xe46   :  { %v6859_v35 = vadd.f32 1.0, %v8667_v14 }
 0xe48   :  { %8668 = vrcp.f32 %v6859_v35 }
 0xe52   :  { %v8669_v18 = vpop.eup %8668 }
 0xe53   :  { %6862 = vst.msk [vmem:[%s10663_s8] sm:$0xff] %vm6491_vm3, %v8669_v18 }
 0xe54   :  { %6867 = vsyncpa [#allocation5], 1 }
 0xe55   :  { %6868 = vsyncpa [#allocation7], 1 }

</bundles_post_ra>
